<compile_context>
chip_gen: v7x
topology: tpu7x:2x2x1
jax: 0.10.0
libtpu: 0.0.40
codegen_flags: <defaults>
</compile_context>

<pallas_src>
import functools

import jax
import jax.numpy as jnp
import numpy as np
from jax import lax
from jax.experimental import pallas as pl
from jax.experimental.pallas import tpu as pltpu

HIDDEN = 64  # matches LSTM2(hidden_layers=64) default


def _lstm2_kernel(g1_ref, wih1_ref, b1_ref, whh1_ref, wih2_ref, b2_ref,
                  whh2_ref, wlin_ref, blin_ref, out_ref, h2_sc,
                  *, seq, future, H):
    # g1_ref:     (seq, B, 4H)       precomputed layer-1 input gates (x*Wih1+b1)
    # wih1_ref:   (1, 4H)            layer-1 input weights (gate order i,f,o,g)
    # b1_ref:     (1, 4H)            fused layer-1 bias (AR feedback path only)
    # whh1_ref:   (H, 4H)            layer-1 recurrent weights
    # wih2_ref:   (H, 4H)            layer-2 input weights
    # b2_ref:     (1, 4H)            fused layer-2 bias
    # whh2_ref:   (H, 4H)            layer-2 recurrent weights
    # wlin_ref:   (1, H)             linear head weight (row)
    # blin_ref:   (1, 1)             linear head bias
    # out_ref:    (seq+future, B)    time-major output
    # h2_sc:      (seq+future, B, H) scratch: stashed layer-2 hidden states
    B = g1_ref.shape[1]
    H3 = 3 * H

    def cell(gates, c):
        # gate layout [i | f | o | g]: one sigmoid over a contiguous 3H slice.
        s = jax.nn.sigmoid(gates[:, :H3])
        i = s[:, :H]
        f = s[:, H:2 * H]
        o = s[:, 2 * H:H3]
        g = jnp.tanh(gates[:, H3:])
        c_new = f * c + i * g
        h_new = o * jnp.tanh(c_new)
        return h_new, c_new

    zeros_h = jnp.zeros((B, H), jnp.float32)

    # ---- teacher-forced recurrence over the input sequence ----
    def tf_step(t, carry):
        h1, c1, h2, c2 = carry
        # Two small recurrent dots (no concat, no zero-block latch waste).
        rec1 = jnp.dot(h1, whh1_ref[...], preferred_element_type=jnp.float32)
        rec2 = jnp.dot(h2, whh2_ref[...], preferred_element_type=jnp.float32)
        h1, c1 = cell(g1_ref[t] + rec1, c1)
        g2 = (jnp.dot(h1, wih2_ref[...], preferred_element_type=jnp.float32)
              + rec2 + b2_ref[...])
        h2, c2 = cell(g2, c2)
        h2_sc[t] = h2                      # stash only; head + store deferred
        return (h1, c1, h2, c2)

    h1, c1, h2, c2 = lax.fori_loop(
        0, seq, tf_step, (zeros_h, zeros_h, zeros_h, zeros_h), unroll=True)

    # ---- autoregressive future steps (output feeds back as input) ----
    if future > 0:
        x_t = (jnp.sum(h2 * wlin_ref[...], axis=1, keepdims=True)
               + blin_ref[...])                                  # (B, 1)

        def ar_step(i, carry):
            h1, c1, h2, c2, x_t = carry
            g1x = x_t * wih1_ref[...] + b1_ref[...]              # (B, 4H)
            rec1 = jnp.dot(h1, whh1_ref[...],
                           preferred_element_type=jnp.float32)
            rec2 = jnp.dot(h2, whh2_ref[...],
                           preferred_element_type=jnp.float32)
            h1, c1 = cell(g1x + rec1, c1)
            g2 = (jnp.dot(h1, wih2_ref[...],
                          preferred_element_type=jnp.float32)
                  + rec2 + b2_ref[...])
            h2, c2 = cell(g2, c2)
            h2_sc[seq + i] = h2            # stash; no per-step out_ref store
            # head recomputed in-loop only because it feeds back as x_{t+1}
            x_t = (jnp.sum(h2 * wlin_ref[...], axis=1, keepdims=True)
                   + blin_ref[...])                              # (B, 1)
            return (h1, c1, h2, c2, x_t)

        lax.fori_loop(0, future, ar_step, (h1, c1, h2, c2, x_t), unroll=True)

    # Deferred, batched linear head for ALL steps (teacher-forced + AR):
    # one broadcast-multiply + lane reduce (XLU, off the recurrence) and a
    # single slab store.
    outs = jnp.sum(h2_sc[...] * wlin_ref[...], axis=-1) + blin_ref[...]
    out_ref[...] = outs.astype(out_ref.dtype)                    # (total, B)


def _pack_params(params, H):
    """Repack PyTorch-layout params for the kernel.

    - permute 4H gate columns from PyTorch order [i,f,g,o] to [i,f,o,g]
    - transpose the head weight to a (1, H) row for the multiply+reduce head
    """
    (wih1, whh1, b1, wih2, whh2, b2, wlin, blin) = params
    perm = np.concatenate([np.arange(0, 2 * H),        # i, f
                           np.arange(3 * H, 4 * H),    # o
                           np.arange(2 * H, 3 * H)])   # g
    wih1_p = wih1[:, perm]
    b1_p = b1[:, perm]
    whh1_p = whh1[:, perm]
    wih2_p = wih2[:, perm]
    b2_p = b2[:, perm]
    whh2_p = whh2[:, perm]
    wlin_row = jnp.transpose(wlin, (1, 0))             # (1, H)
    return wih1_p, b1_p, whh1_p, wih2_p, b2_p, whh2_p, wlin_row, blin


def lstm2_forward(x, params, future_preds=0):
    """x: (B, T) float32 -> (B, T + future_preds) float32."""
    B, seq = x.shape
    H = params[1].shape[0]
    total = seq + future_preds

    (wih1_p, b1_p, whh1_p, wih2_p, b2_p, whh2_p,
     wlin_row, blin) = _pack_params(params, H)

    # Precompute layer-1 input-gate pre-activations for every teacher-forced
    # step in plain XLA (fully parallel, off the recurrence) in time-major
    # layout; this also removes the trailing-1 input dim from the kernel.
    x_tm = jnp.transpose(x, (1, 0))                              # (seq, B)
    g1_all = x_tm[:, :, None] * wih1_p + b1_p                    # (seq, B, 4H)

    out = pl.pallas_call(
        functools.partial(_lstm2_kernel, seq=seq, future=future_preds, H=H),
        out_shape=jax.ShapeDtypeStruct((total, B), jnp.float32),
        in_specs=[pl.BlockSpec(memory_space=pltpu.MemorySpace.VMEM)] * 9,
        out_specs=pl.BlockSpec(memory_space=pltpu.MemorySpace.VMEM),
        scratch_shapes=[pltpu.VMEM((total, B, H), jnp.float32)],
    )(g1_all, wih1_p, b1_p, whh1_p, wih2_p, b2_p, whh2_p, wlin_row, blin)

    return jnp.transpose(out, (1, 0))


def init_params(key, H=HIDDEN):
    """Deterministic init mirroring PyTorch's U(-1/sqrt(fan), 1/sqrt(fan)).

    Weights are stored in PyTorch gate order (i, f, g, o), pre-transposed for
    right-multiplication; biases fused (b_ih + b_hh).
    """
    ks = jax.random.split(key, 10)
    k_lstm = 1.0 / np.sqrt(H)
    k_lin = 1.0 / np.sqrt(H)
    u = lambda k, shape, b: jax.random.uniform(k, shape, jnp.float32, -b, b)
    wih1 = u(ks[0], (1, 4 * H), k_lstm)
    whh1 = u(ks[1], (H, 4 * H), k_lstm)
    b1 = u(ks[2], (1, 4 * H), k_lstm) + u(ks[3], (1, 4 * H), k_lstm)
    wih2 = u(ks[4], (H, 4 * H), k_lstm)
    whh2 = u(ks[5], (H, 4 * H), k_lstm)
    b2 = u(ks[6], (1, 4 * H), k_lstm) + u(ks[7], (1, 4 * H), k_lstm)
    wlin = u(ks[8], (H, 1), k_lin)
    blin = u(ks[9], (1, 1), k_lin)
    return (wih1, whh1, b1, wih2, whh2, b2, wlin, blin)


def lstm2_reference(x, params, future_preds=0):
    """Pure-JAX reference with identical semantics (for validation)."""
    (wih1, whh1, b1, wih2, whh2, b2, wlin, blin) = params
    B, seq = x.shape
    H = whh1.shape[0]

    def cell(gx, h, c, whh, b):
        g = gx + h @ whh + b
        i, f, gg, o = (jax.nn.sigmoid(g[:, :H]), jax.nn.sigmoid(g[:, H:2 * H]),
                       jnp.tanh(g[:, 2 * H:3 * H]), jax.nn.sigmoid(g[:, 3 * H:]))
        c = f * c + i * gg
        return o * jnp.tanh(c), c

    h1 = c1 = h2 = c2 = jnp.zeros((B, H), jnp.float32)
    out = jnp.zeros((B, 1), jnp.float32)
    outs = []
    for t in range(seq + future_preds):
        x_t = x[:, t:t + 1] if t < seq else out
        h1, c1 = cell(x_t * wih1, h1, c1, whh1, b1)
        h2, c2 = cell(h1 @ wih2, h2, c2, whh2, b2)
        out = h2 @ wlin + blin
        outs.append(out)
    return jnp.concatenate(outs, axis=1)


if __name__ == "__main__":
    key = jax.random.PRNGKey(0)
    k_x, k_p = jax.random.split(key)

    B, T = 2, 8
    x = jax.random.normal(k_x, (B, T), dtype=jnp.float32)
    params = init_params(k_p, HIDDEN)

    future = 3
    out = lstm2_forward(x, params, future_preds=future)
    out = jax.block_until_ready(out)
    assert out.shape == (B, T + future), out.shape

    ref = lstm2_reference(x, params, future_preds=future)
    np.testing.assert_allclose(np.asarray(out), np.asarray(ref),
                               rtol=1e-3, atol=1e-4)

    # also exercise the future_preds == 0 path
    out0 = jax.block_until_ready(lstm2_forward(x, params, future_preds=0))
    ref0 = lstm2_reference(x, params, future_preds=0)
    np.testing.assert_allclose(np.asarray(out0), np.asarray(ref0),
                               rtol=1e-3, atol=1e-4)

    print("KERNEL_OK")
</pallas_src>

<mosaic_0001>
module attributes {stable_mosaic.version = 11 : i64} {
  func.func @_lstm2_kernel(%arg0: memref<8x2x256xf32, #tpu.memory_space<vmem>>, %arg1: memref<1x256xf32, #tpu.memory_space<vmem>>, %arg2: memref<1x256xf32, #tpu.memory_space<vmem>>, %arg3: memref<64x256xf32, #tpu.memory_space<vmem>>, %arg4: memref<64x256xf32, #tpu.memory_space<vmem>>, %arg5: memref<1x256xf32, #tpu.memory_space<vmem>>, %arg6: memref<64x256xf32, #tpu.memory_space<vmem>>, %arg7: memref<1x64xf32, #tpu.memory_space<vmem>>, %arg8: memref<1x1xf32, #tpu.memory_space<vmem>>, %arg9: memref<11x2xf32, #tpu.memory_space<vmem>>, %arg10: memref<11x2x64xf32, #tpu.memory_space<vmem>>) attributes {dimension_semantics = [], scalar_prefetch = 0 : i64, scratch_operands = 1 : i64, tpu.core_type = #tpu.core_type<tc>} {
    %cst = arith.constant 0.000000e+00 : f32
    %0 = vector.broadcast %cst : f32 to vector<2x64xf32>
    %c0_i32 = arith.constant 0 : i32
    %c0 = arith.constant 0 : index
    %c0_0 = arith.constant 0 : index
    %1 = vector.load %arg3[%c0, %c0_0] : memref<64x256xf32, #tpu.memory_space<vmem>>, vector<64x256xf32>
    %cst_1 = arith.constant dense<0.000000e+00> : vector<2x256xf32>
    %2 = tpu.matmul %0, %1, %cst_1 {dimension_numbers = #tpu.dot_dimension_numbers<[1], [0], [0], [1], [0, 0, 1, 1], [], []>} : vector<2x64xf32>, vector<64x256xf32>, vector<2x256xf32> -> vector<2x256xf32>
    %c0_2 = arith.constant 0 : index
    %c0_3 = arith.constant 0 : index
    %3 = vector.load %arg6[%c0_2, %c0_3] : memref<64x256xf32, #tpu.memory_space<vmem>>, vector<64x256xf32>
    %cst_4 = arith.constant dense<0.000000e+00> : vector<2x256xf32>
    %4 = tpu.matmul %0, %3, %cst_4 {dimension_numbers = #tpu.dot_dimension_numbers<[1], [0], [0], [1], [0, 0, 1, 1], [], []>} : vector<2x64xf32>, vector<64x256xf32>, vector<2x256xf32> -> vector<2x256xf32>
    %5 = arith.index_cast %c0_i32 : i32 to index
    %c0_5 = arith.constant 0 : index
    %c0_6 = arith.constant 0 : index
    %6 = vector.load %arg0[%5, %c0_5, %c0_6] : memref<8x2x256xf32, #tpu.memory_space<vmem>>, vector<1x2x256xf32>
    %7 = vector.shape_cast %6 : vector<1x2x256xf32> to vector<2x256xf32>
    %8 = arith.addf %7, %2 : vector<2x256xf32>
    %9 = vector.extract_strided_slice %8 {offsets = [0, 0], sizes = [2, 192], strides = [1, 1]} : vector<2x256xf32> to vector<2x192xf32>
    %10 = arith.negf %9 : vector<2x192xf32>
    %11 = math.exp %10 : vector<2x192xf32>
    %cst_7 = arith.constant 1.000000e+00 : f32
    %12 = vector.broadcast %cst_7 : f32 to vector<2x192xf32>
    %13 = arith.addf %12, %11 : vector<2x192xf32>
    %14 = arith.divf %12, %13 : vector<2x192xf32>
    %15 = vector.extract_strided_slice %14 {offsets = [0, 0], sizes = [2, 64], strides = [1, 1]} : vector<2x192xf32> to vector<2x64xf32>
    %16 = vector.extract_strided_slice %14 {offsets = [0, 64], sizes = [2, 64], strides = [1, 1]} : vector<2x192xf32> to vector<2x64xf32>
    %17 = vector.extract_strided_slice %14 {offsets = [0, 128], sizes = [2, 64], strides = [1, 1]} : vector<2x192xf32> to vector<2x64xf32>
    %18 = vector.extract_strided_slice %8 {offsets = [0, 192], sizes = [2, 64], strides = [1, 1]} : vector<2x256xf32> to vector<2x64xf32>
    %19 = math.tanh %18 : vector<2x64xf32>
    %20 = arith.mulf %16, %0 : vector<2x64xf32>
    %21 = arith.mulf %15, %19 : vector<2x64xf32>
    %22 = arith.addf %20, %21 : vector<2x64xf32>
    %23 = math.tanh %22 : vector<2x64xf32>
    %24 = arith.mulf %17, %23 : vector<2x64xf32>
    %c0_8 = arith.constant 0 : index
    %c0_9 = arith.constant 0 : index
    %25 = vector.load %arg4[%c0_8, %c0_9] : memref<64x256xf32, #tpu.memory_space<vmem>>, vector<64x256xf32>
    %cst_10 = arith.constant dense<0.000000e+00> : vector<2x256xf32>
    %26 = tpu.matmul %24, %25, %cst_10 {dimension_numbers = #tpu.dot_dimension_numbers<[1], [0], [0], [1], [0, 0, 1, 1], [], []>} : vector<2x64xf32>, vector<64x256xf32>, vector<2x256xf32> -> vector<2x256xf32>
    %27 = arith.addf %26, %4 : vector<2x256xf32>
    %c0_11 = arith.constant 0 : index
    %c0_12 = arith.constant 0 : index
    %28 = vector.load %arg5[%c0_11, %c0_12] : memref<1x256xf32, #tpu.memory_space<vmem>>, vector<1x256xf32>
    %29 = vector.broadcast %28 : vector<1x256xf32> to vector<2x256xf32>
    %30 = arith.addf %27, %29 : vector<2x256xf32>
    %31 = vector.extract_strided_slice %30 {offsets = [0, 0], sizes = [2, 192], strides = [1, 1]} : vector<2x256xf32> to vector<2x192xf32>
    %32 = arith.negf %31 : vector<2x192xf32>
    %33 = math.exp %32 : vector<2x192xf32>
    %cst_13 = arith.constant 1.000000e+00 : f32
    %34 = vector.broadcast %cst_13 : f32 to vector<2x192xf32>
    %35 = arith.addf %34, %33 : vector<2x192xf32>
    %36 = arith.divf %34, %35 : vector<2x192xf32>
    %37 = vector.extract_strided_slice %36 {offsets = [0, 0], sizes = [2, 64], strides = [1, 1]} : vector<2x192xf32> to vector<2x64xf32>
    %38 = vector.extract_strided_slice %36 {offsets = [0, 64], sizes = [2, 64], strides = [1, 1]} : vector<2x192xf32> to vector<2x64xf32>
    %39 = vector.extract_strided_slice %36 {offsets = [0, 128], sizes = [2, 64], strides = [1, 1]} : vector<2x192xf32> to vector<2x64xf32>
    %40 = vector.extract_strided_slice %30 {offsets = [0, 192], sizes = [2, 64], strides = [1, 1]} : vector<2x256xf32> to vector<2x64xf32>
    %41 = math.tanh %40 : vector<2x64xf32>
    %42 = arith.mulf %38, %0 : vector<2x64xf32>
    %43 = arith.mulf %37, %41 : vector<2x64xf32>
    %44 = arith.addf %42, %43 : vector<2x64xf32>
    %45 = math.tanh %44 : vector<2x64xf32>
    %46 = arith.mulf %39, %45 : vector<2x64xf32>
    %47 = arith.index_cast %c0_i32 : i32 to index
    %c0_14 = arith.constant 0 : index
    %c0_15 = arith.constant 0 : index
    %48 = vector.load %arg10[%47, %c0_14, %c0_15] : memref<11x2x64xf32, #tpu.memory_space<vmem>>, vector<1x2x64xf32>
    %49 = vector.shape_cast %48 : vector<1x2x64xf32> to vector<2x64xf32>
    %50 = vector.shape_cast %46 : vector<2x64xf32> to vector<1x2x64xf32>
    tpu.vector_store %arg10[%47, %c0_14, %c0_15], %50 {strides = array<i32>} : memref<11x2x64xf32, #tpu.memory_space<vmem>>, vector<1x2x64xf32>,
    %c1_i32 = arith.constant 1 : i32
    %c0_16 = arith.constant 0 : index
    %c0_17 = arith.constant 0 : index
    %51 = vector.load %arg3[%c0_16, %c0_17] : memref<64x256xf32, #tpu.memory_space<vmem>>, vector<64x256xf32>
    %cst_18 = arith.constant dense<0.000000e+00> : vector<2x256xf32>
    %52 = tpu.matmul %24, %51, %cst_18 {dimension_numbers = #tpu.dot_dimension_numbers<[1], [0], [0], [1], [0, 0, 1, 1], [], []>} : vector<2x64xf32>, vector<64x256xf32>, vector<2x256xf32> -> vector<2x256xf32>
    %c0_19 = arith.constant 0 : index
    %c0_20 = arith.constant 0 : index
    %53 = vector.load %arg6[%c0_19, %c0_20] : memref<64x256xf32, #tpu.memory_space<vmem>>, vector<64x256xf32>
    %cst_21 = arith.constant dense<0.000000e+00> : vector<2x256xf32>
    %54 = tpu.matmul %46, %53, %cst_21 {dimension_numbers = #tpu.dot_dimension_numbers<[1], [0], [0], [1], [0, 0, 1, 1], [], []>} : vector<2x64xf32>, vector<64x256xf32>, vector<2x256xf32> -> vector<2x256xf32>
    %55 = arith.index_cast %c1_i32 : i32 to index
    %c0_22 = arith.constant 0 : index
    %c0_23 = arith.constant 0 : index
    %56 = vector.load %arg0[%55, %c0_22, %c0_23] : memref<8x2x256xf32, #tpu.memory_space<vmem>>, vector<1x2x256xf32>
    %57 = vector.shape_cast %56 : vector<1x2x256xf32> to vector<2x256xf32>
    %58 = arith.addf %57, %52 : vector<2x256xf32>
    %59 = vector.extract_strided_slice %58 {offsets = [0, 0], sizes = [2, 192], strides = [1, 1]} : vector<2x256xf32> to vector<2x192xf32>
    %60 = arith.negf %59 : vector<2x192xf32>
    %61 = math.exp %60 : vector<2x192xf32>
    %cst_24 = arith.constant 1.000000e+00 : f32
    %62 = vector.broadcast %cst_24 : f32 to vector<2x192xf32>
    %63 = arith.addf %62, %61 : vector<2x192xf32>
    %64 = arith.divf %62, %63 : vector<2x192xf32>
    %65 = vector.extract_strided_slice %64 {offsets = [0, 0], sizes = [2, 64], strides = [1, 1]} : vector<2x192xf32> to vector<2x64xf32>
    %66 = vector.extract_strided_slice %64 {offsets = [0, 64], sizes = [2, 64], strides = [1, 1]} : vector<2x192xf32> to vector<2x64xf32>
    %67 = vector.extract_strided_slice %64 {offsets = [0, 128], sizes = [2, 64], strides = [1, 1]} : vector<2x192xf32> to vector<2x64xf32>
    %68 = vector.extract_strided_slice %58 {offsets = [0, 192], sizes = [2, 64], strides = [1, 1]} : vector<2x256xf32> to vector<2x64xf32>
    %69 = math.tanh %68 : vector<2x64xf32>
    %70 = arith.mulf %66, %22 : vector<2x64xf32>
    %71 = arith.mulf %65, %69 : vector<2x64xf32>
    %72 = arith.addf %70, %71 : vector<2x64xf32>
    %73 = math.tanh %72 : vector<2x64xf32>
    %74 = arith.mulf %67, %73 : vector<2x64xf32>
    %c0_25 = arith.constant 0 : index
    %c0_26 = arith.constant 0 : index
    %75 = vector.load %arg4[%c0_25, %c0_26] : memref<64x256xf32, #tpu.memory_space<vmem>>, vector<64x256xf32>
    %cst_27 = arith.constant dense<0.000000e+00> : vector<2x256xf32>
    %76 = tpu.matmul %74, %75, %cst_27 {dimension_numbers = #tpu.dot_dimension_numbers<[1], [0], [0], [1], [0, 0, 1, 1], [], []>} : vector<2x64xf32>, vector<64x256xf32>, vector<2x256xf32> -> vector<2x256xf32>
    %77 = arith.addf %76, %54 : vector<2x256xf32>
    %c0_28 = arith.constant 0 : index
    %c0_29 = arith.constant 0 : index
    %78 = vector.load %arg5[%c0_28, %c0_29] : memref<1x256xf32, #tpu.memory_space<vmem>>, vector<1x256xf32>
    %79 = vector.broadcast %78 : vector<1x256xf32> to vector<2x256xf32>
    %80 = arith.addf %77, %79 : vector<2x256xf32>
    %81 = vector.extract_strided_slice %80 {offsets = [0, 0], sizes = [2, 192], strides = [1, 1]} : vector<2x256xf32> to vector<2x192xf32>
    %82 = arith.negf %81 : vector<2x192xf32>
    %83 = math.exp %82 : vector<2x192xf32>
    %cst_30 = arith.constant 1.000000e+00 : f32
    %84 = vector.broadcast %cst_30 : f32 to vector<2x192xf32>
    %85 = arith.addf %84, %83 : vector<2x192xf32>
    %86 = arith.divf %84, %85 : vector<2x192xf32>
    %87 = vector.extract_strided_slice %86 {offsets = [0, 0], sizes = [2, 64], strides = [1, 1]} : vector<2x192xf32> to vector<2x64xf32>
    %88 = vector.extract_strided_slice %86 {offsets = [0, 64], sizes = [2, 64], strides = [1, 1]} : vector<2x192xf32> to vector<2x64xf32>
    %89 = vector.extract_strided_slice %86 {offsets = [0, 128], sizes = [2, 64], strides = [1, 1]} : vector<2x192xf32> to vector<2x64xf32>
    %90 = vector.extract_strided_slice %80 {offsets = [0, 192], sizes = [2, 64], strides = [1, 1]} : vector<2x256xf32> to vector<2x64xf32>
    %91 = math.tanh %90 : vector<2x64xf32>
    %92 = arith.mulf %88, %44 : vector<2x64xf32>
    %93 = arith.mulf %87, %91 : vector<2x64xf32>
    %94 = arith.addf %92, %93 : vector<2x64xf32>
    %95 = math.tanh %94 : vector<2x64xf32>
    %96 = arith.mulf %89, %95 : vector<2x64xf32>
    %97 = arith.index_cast %c1_i32 : i32 to index
    %c0_31 = arith.constant 0 : index
    %c0_32 = arith.constant 0 : index
    %98 = vector.load %arg10[%97, %c0_31, %c0_32] : memref<11x2x64xf32, #tpu.memory_space<vmem>>, vector<1x2x64xf32>
    %99 = vector.shape_cast %98 : vector<1x2x64xf32> to vector<2x64xf32>
    %100 = vector.shape_cast %96 : vector<2x64xf32> to vector<1x2x64xf32>
    tpu.vector_store %arg10[%97, %c0_31, %c0_32], %100 {strides = array<i32>} : memref<11x2x64xf32, #tpu.memory_space<vmem>>, vector<1x2x64xf32>,
    %c2_i32 = arith.constant 2 : i32
    %c0_33 = arith.constant 0 : index
    %c0_34 = arith.constant 0 : index
    %101 = vector.load %arg3[%c0_33, %c0_34] : memref<64x256xf32, #tpu.memory_space<vmem>>, vector<64x256xf32>
    %cst_35 = arith.constant dense<0.000000e+00> : vector<2x256xf32>
    %102 = tpu.matmul %74, %101, %cst_35 {dimension_numbers = #tpu.dot_dimension_numbers<[1], [0], [0], [1], [0, 0, 1, 1], [], []>} : vector<2x64xf32>, vector<64x256xf32>, vector<2x256xf32> -> vector<2x256xf32>
    %c0_36 = arith.constant 0 : index
    %c0_37 = arith.constant 0 : index
    %103 = vector.load %arg6[%c0_36, %c0_37] : memref<64x256xf32, #tpu.memory_space<vmem>>, vector<64x256xf32>
    %cst_38 = arith.constant dense<0.000000e+00> : vector<2x256xf32>
    %104 = tpu.matmul %96, %103, %cst_38 {dimension_numbers = #tpu.dot_dimension_numbers<[1], [0], [0], [1], [0, 0, 1, 1], [], []>} : vector<2x64xf32>, vector<64x256xf32>, vector<2x256xf32> -> vector<2x256xf32>
    %105 = arith.index_cast %c2_i32 : i32 to index
    %c0_39 = arith.constant 0 : index
    %c0_40 = arith.constant 0 : index
    %106 = vector.load %arg0[%105, %c0_39, %c0_40] : memref<8x2x256xf32, #tpu.memory_space<vmem>>, vector<1x2x256xf32>
    %107 = vector.shape_cast %106 : vector<1x2x256xf32> to vector<2x256xf32>
    %108 = arith.addf %107, %102 : vector<2x256xf32>
    %109 = vector.extract_strided_slice %108 {offsets = [0, 0], sizes = [2, 192], strides = [1, 1]} : vector<2x256xf32> to vector<2x192xf32>
    %110 = arith.negf %109 : vector<2x192xf32>
    %111 = math.exp %110 : vector<2x192xf32>
    %cst_41 = arith.constant 1.000000e+00 : f32
    %112 = vector.broadcast %cst_41 : f32 to vector<2x192xf32>
    %113 = arith.addf %112, %111 : vector<2x192xf32>
    %114 = arith.divf %112, %113 : vector<2x192xf32>
    %115 = vector.extract_strided_slice %114 {offsets = [0, 0], sizes = [2, 64], strides = [1, 1]} : vector<2x192xf32> to vector<2x64xf32>
    %116 = vector.extract_strided_slice %114 {offsets = [0, 64], sizes = [2, 64], strides = [1, 1]} : vector<2x192xf32> to vector<2x64xf32>
    %117 = vector.extract_strided_slice %114 {offsets = [0, 128], sizes = [2, 64], strides = [1, 1]} : vector<2x192xf32> to vector<2x64xf32>
    %118 = vector.extract_strided_slice %108 {offsets = [0, 192], sizes = [2, 64], strides = [1, 1]} : vector<2x256xf32> to vector<2x64xf32>
    %119 = math.tanh %118 : vector<2x64xf32>
    %120 = arith.mulf %116, %72 : vector<2x64xf32>
    %121 = arith.mulf %115, %119 : vector<2x64xf32>
    %122 = arith.addf %120, %121 : vector<2x64xf32>
    %123 = math.tanh %122 : vector<2x64xf32>
    %124 = arith.mulf %117, %123 : vector<2x64xf32>
    %c0_42 = arith.constant 0 : index
    %c0_43 = arith.constant 0 : index
    %125 = vector.load %arg4[%c0_42, %c0_43] : memref<64x256xf32, #tpu.memory_space<vmem>>, vector<64x256xf32>
    %cst_44 = arith.constant dense<0.000000e+00> : vector<2x256xf32>
    %126 = tpu.matmul %124, %125, %cst_44 {dimension_numbers = #tpu.dot_dimension_numbers<[1], [0], [0], [1], [0, 0, 1, 1], [], []>} : vector<2x64xf32>, vector<64x256xf32>, vector<2x256xf32> -> vector<2x256xf32>
    %127 = arith.addf %126, %104 : vector<2x256xf32>
    %c0_45 = arith.constant 0 : index
    %c0_46 = arith.constant 0 : index
    %128 = vector.load %arg5[%c0_45, %c0_46] : memref<1x256xf32, #tpu.memory_space<vmem>>, vector<1x256xf32>
    %129 = vector.broadcast %128 : vector<1x256xf32> to vector<2x256xf32>
    %130 = arith.addf %127, %129 : vector<2x256xf32>
    %131 = vector.extract_strided_slice %130 {offsets = [0, 0], sizes = [2, 192], strides = [1, 1]} : vector<2x256xf32> to vector<2x192xf32>
    %132 = arith.negf %131 : vector<2x192xf32>
    %133 = math.exp %132 : vector<2x192xf32>
    %cst_47 = arith.constant 1.000000e+00 : f32
    %134 = vector.broadcast %cst_47 : f32 to vector<2x192xf32>
    %135 = arith.addf %134, %133 : vector<2x192xf32>
    %136 = arith.divf %134, %135 : vector<2x192xf32>
    %137 = vector.extract_strided_slice %136 {offsets = [0, 0], sizes = [2, 64], strides = [1, 1]} : vector<2x192xf32> to vector<2x64xf32>
    %138 = vector.extract_strided_slice %136 {offsets = [0, 64], sizes = [2, 64], strides = [1, 1]} : vector<2x192xf32> to vector<2x64xf32>
    %139 = vector.extract_strided_slice %136 {offsets = [0, 128], sizes = [2, 64], strides = [1, 1]} : vector<2x192xf32> to vector<2x64xf32>
    %140 = vector.extract_strided_slice %130 {offsets = [0, 192], sizes = [2, 64], strides = [1, 1]} : vector<2x256xf32> to vector<2x64xf32>
    %141 = math.tanh %140 : vector<2x64xf32>
    %142 = arith.mulf %138, %94 : vector<2x64xf32>
    %143 = arith.mulf %137, %141 : vector<2x64xf32>
    %144 = arith.addf %142, %143 : vector<2x64xf32>
    %145 = math.tanh %144 : vector<2x64xf32>
    %146 = arith.mulf %139, %145 : vector<2x64xf32>
    %147 = arith.index_cast %c2_i32 : i32 to index
    %c0_48 = arith.constant 0 : index
    %c0_49 = arith.constant 0 : index
    %148 = vector.load %arg10[%147, %c0_48, %c0_49] : memref<11x2x64xf32, #tpu.memory_space<vmem>>, vector<1x2x64xf32>
    %149 = vector.shape_cast %148 : vector<1x2x64xf32> to vector<2x64xf32>
    %150 = vector.shape_cast %146 : vector<2x64xf32> to vector<1x2x64xf32>
    tpu.vector_store %arg10[%147, %c0_48, %c0_49], %150 {strides = array<i32>} : memref<11x2x64xf32, #tpu.memory_space<vmem>>, vector<1x2x64xf32>,
    %c3_i32 = arith.constant 3 : i32
    %c0_50 = arith.constant 0 : index
    %c0_51 = arith.constant 0 : index
    %151 = vector.load %arg3[%c0_50, %c0_51] : memref<64x256xf32, #tpu.memory_space<vmem>>, vector<64x256xf32>
    %cst_52 = arith.constant dense<0.000000e+00> : vector<2x256xf32>
    %152 = tpu.matmul %124, %151, %cst_52 {dimension_numbers = #tpu.dot_dimension_numbers<[1], [0], [0], [1], [0, 0, 1, 1], [], []>} : vector<2x64xf32>, vector<64x256xf32>, vector<2x256xf32> -> vector<2x256xf32>
    %c0_53 = arith.constant 0 : index
    %c0_54 = arith.constant 0 : index
    %153 = vector.load %arg6[%c0_53, %c0_54] : memref<64x256xf32, #tpu.memory_space<vmem>>, vector<64x256xf32>
    %cst_55 = arith.constant dense<0.000000e+00> : vector<2x256xf32>
    %154 = tpu.matmul %146, %153, %cst_55 {dimension_numbers = #tpu.dot_dimension_numbers<[1], [0], [0], [1], [0, 0, 1, 1], [], []>} : vector<2x64xf32>, vector<64x256xf32>, vector<2x256xf32> -> vector<2x256xf32>
    %155 = arith.index_cast %c3_i32 : i32 to index
    %c0_56 = arith.constant 0 : index
    %c0_57 = arith.constant 0 : index
    %156 = vector.load %arg0[%155, %c0_56, %c0_57] : memref<8x2x256xf32, #tpu.memory_space<vmem>>, vector<1x2x256xf32>
    %157 = vector.shape_cast %156 : vector<1x2x256xf32> to vector<2x256xf32>
    %158 = arith.addf %157, %152 : vector<2x256xf32>
    %159 = vector.extract_strided_slice %158 {offsets = [0, 0], sizes = [2, 192], strides = [1, 1]} : vector<2x256xf32> to vector<2x192xf32>
    %160 = arith.negf %159 : vector<2x192xf32>
    %161 = math.exp %160 : vector<2x192xf32>
    %cst_58 = arith.constant 1.000000e+00 : f32
    %162 = vector.broadcast %cst_58 : f32 to vector<2x192xf32>
    %163 = arith.addf %162, %161 : vector<2x192xf32>
    %164 = arith.divf %162, %163 : vector<2x192xf32>
    %165 = vector.extract_strided_slice %164 {offsets = [0, 0], sizes = [2, 64], strides = [1, 1]} : vector<2x192xf32> to vector<2x64xf32>
    %166 = vector.extract_strided_slice %164 {offsets = [0, 64], sizes = [2, 64], strides = [1, 1]} : vector<2x192xf32> to vector<2x64xf32>
    %167 = vector.extract_strided_slice %164 {offsets = [0, 128], sizes = [2, 64], strides = [1, 1]} : vector<2x192xf32> to vector<2x64xf32>
    %168 = vector.extract_strided_slice %158 {offsets = [0, 192], sizes = [2, 64], strides = [1, 1]} : vector<2x256xf32> to vector<2x64xf32>
    %169 = math.tanh %168 : vector<2x64xf32>
    %170 = arith.mulf %166, %122 : vector<2x64xf32>
    %171 = arith.mulf %165, %169 : vector<2x64xf32>
    %172 = arith.addf %170, %171 : vector<2x64xf32>
    %173 = math.tanh %172 : vector<2x64xf32>
    %174 = arith.mulf %167, %173 : vector<2x64xf32>
    %c0_59 = arith.constant 0 : index
    %c0_60 = arith.constant 0 : index
    %175 = vector.load %arg4[%c0_59, %c0_60] : memref<64x256xf32, #tpu.memory_space<vmem>>, vector<64x256xf32>
    %cst_61 = arith.constant dense<0.000000e+00> : vector<2x256xf32>
    %176 = tpu.matmul %174, %175, %cst_61 {dimension_numbers = #tpu.dot_dimension_numbers<[1], [0], [0], [1], [0, 0, 1, 1], [], []>} : vector<2x64xf32>, vector<64x256xf32>, vector<2x256xf32> -> vector<2x256xf32>
    %177 = arith.addf %176, %154 : vector<2x256xf32>
    %c0_62 = arith.constant 0 : index
    %c0_63 = arith.constant 0 : index
    %178 = vector.load %arg5[%c0_62, %c0_63] : memref<1x256xf32, #tpu.memory_space<vmem>>, vector<1x256xf32>
    %179 = vector.broadcast %178 : vector<1x256xf32> to vector<2x256xf32>
    %180 = arith.addf %177, %179 : vector<2x256xf32>
    %181 = vector.extract_strided_slice %180 {offsets = [0, 0], sizes = [2, 192], strides = [1, 1]} : vector<2x256xf32> to vector<2x192xf32>
    %182 = arith.negf %181 : vector<2x192xf32>
    %183 = math.exp %182 : vector<2x192xf32>
    %cst_64 = arith.constant 1.000000e+00 : f32
    %184 = vector.broadcast %cst_64 : f32 to vector<2x192xf32>
    %185 = arith.addf %184, %183 : vector<2x192xf32>
    %186 = arith.divf %184, %185 : vector<2x192xf32>
    %187 = vector.extract_strided_slice %186 {offsets = [0, 0], sizes = [2, 64], strides = [1, 1]} : vector<2x192xf32> to vector<2x64xf32>
    %188 = vector.extract_strided_slice %186 {offsets = [0, 64], sizes = [2, 64], strides = [1, 1]} : vector<2x192xf32> to vector<2x64xf32>
    %189 = vector.extract_strided_slice %186 {offsets = [0, 128], sizes = [2, 64], strides = [1, 1]} : vector<2x192xf32> to vector<2x64xf32>
    %190 = vector.extract_strided_slice %180 {offsets = [0, 192], sizes = [2, 64], strides = [1, 1]} : vector<2x256xf32> to vector<2x64xf32>
    %191 = math.tanh %190 : vector<2x64xf32>
    %192 = arith.mulf %188, %144 : vector<2x64xf32>
    %193 = arith.mulf %187, %191 : vector<2x64xf32>
    %194 = arith.addf %192, %193 : vector<2x64xf32>
    %195 = math.tanh %194 : vector<2x64xf32>
    %196 = arith.mulf %189, %195 : vector<2x64xf32>
    %197 = arith.index_cast %c3_i32 : i32 to index
    %c0_65 = arith.constant 0 : index
    %c0_66 = arith.constant 0 : index
    %198 = vector.load %arg10[%197, %c0_65, %c0_66] : memref<11x2x64xf32, #tpu.memory_space<vmem>>, vector<1x2x64xf32>
    %199 = vector.shape_cast %198 : vector<1x2x64xf32> to vector<2x64xf32>
    %200 = vector.shape_cast %196 : vector<2x64xf32> to vector<1x2x64xf32>
    tpu.vector_store %arg10[%197, %c0_65, %c0_66], %200 {strides = array<i32>} : memref<11x2x64xf32, #tpu.memory_space<vmem>>, vector<1x2x64xf32>,
    %c4_i32 = arith.constant 4 : i32
    %c0_67 = arith.constant 0 : index
    %c0_68 = arith.constant 0 : index
    %201 = vector.load %arg3[%c0_67, %c0_68] : memref<64x256xf32, #tpu.memory_space<vmem>>, vector<64x256xf32>
    %cst_69 = arith.constant dense<0.000000e+00> : vector<2x256xf32>
    %202 = tpu.matmul %174, %201, %cst_69 {dimension_numbers = #tpu.dot_dimension_numbers<[1], [0], [0], [1], [0, 0, 1, 1], [], []>} : vector<2x64xf32>, vector<64x256xf32>, vector<2x256xf32> -> vector<2x256xf32>
    %c0_70 = arith.constant 0 : index
    %c0_71 = arith.constant 0 : index
    %203 = vector.load %arg6[%c0_70, %c0_71] : memref<64x256xf32, #tpu.memory_space<vmem>>, vector<64x256xf32>
    %cst_72 = arith.constant dense<0.000000e+00> : vector<2x256xf32>
    %204 = tpu.matmul %196, %203, %cst_72 {dimension_numbers = #tpu.dot_dimension_numbers<[1], [0], [0], [1], [0, 0, 1, 1], [], []>} : vector<2x64xf32>, vector<64x256xf32>, vector<2x256xf32> -> vector<2x256xf32>
    %205 = arith.index_cast %c4_i32 : i32 to index
    %c0_73 = arith.constant 0 : index
    %c0_74 = arith.constant 0 : index
    %206 = vector.load %arg0[%205, %c0_73, %c0_74] : memref<8x2x256xf32, #tpu.memory_space<vmem>>, vector<1x2x256xf32>
    %207 = vector.shape_cast %206 : vector<1x2x256xf32> to vector<2x256xf32>
    %208 = arith.addf %207, %202 : vector<2x256xf32>
    %209 = vector.extract_strided_slice %208 {offsets = [0, 0], sizes = [2, 192], strides = [1, 1]} : vector<2x256xf32> to vector<2x192xf32>
    %210 = arith.negf %209 : vector<2x192xf32>
    %211 = math.exp %210 : vector<2x192xf32>
    %cst_75 = arith.constant 1.000000e+00 : f32
    %212 = vector.broadcast %cst_75 : f32 to vector<2x192xf32>
    %213 = arith.addf %212, %211 : vector<2x192xf32>
    %214 = arith.divf %212, %213 : vector<2x192xf32>
    %215 = vector.extract_strided_slice %214 {offsets = [0, 0], sizes = [2, 64], strides = [1, 1]} : vector<2x192xf32> to vector<2x64xf32>
    %216 = vector.extract_strided_slice %214 {offsets = [0, 64], sizes = [2, 64], strides = [1, 1]} : vector<2x192xf32> to vector<2x64xf32>
    %217 = vector.extract_strided_slice %214 {offsets = [0, 128], sizes = [2, 64], strides = [1, 1]} : vector<2x192xf32> to vector<2x64xf32>
    %218 = vector.extract_strided_slice %208 {offsets = [0, 192], sizes = [2, 64], strides = [1, 1]} : vector<2x256xf32> to vector<2x64xf32>
    %219 = math.tanh %218 : vector<2x64xf32>
    %220 = arith.mulf %216, %172 : vector<2x64xf32>
    %221 = arith.mulf %215, %219 : vector<2x64xf32>
    %222 = arith.addf %220, %221 : vector<2x64xf32>
    %223 = math.tanh %222 : vector<2x64xf32>
    %224 = arith.mulf %217, %223 : vector<2x64xf32>
    %c0_76 = arith.constant 0 : index
    %c0_77 = arith.constant 0 : index
    %225 = vector.load %arg4[%c0_76, %c0_77] : memref<64x256xf32, #tpu.memory_space<vmem>>, vector<64x256xf32>
    %cst_78 = arith.constant dense<0.000000e+00> : vector<2x256xf32>
    %226 = tpu.matmul %224, %225, %cst_78 {dimension_numbers = #tpu.dot_dimension_numbers<[1], [0], [0], [1], [0, 0, 1, 1], [], []>} : vector<2x64xf32>, vector<64x256xf32>, vector<2x256xf32> -> vector<2x256xf32>
    %227 = arith.addf %226, %204 : vector<2x256xf32>
    %c0_79 = arith.constant 0 : index
    %c0_80 = arith.constant 0 : index
    %228 = vector.load %arg5[%c0_79, %c0_80] : memref<1x256xf32, #tpu.memory_space<vmem>>, vector<1x256xf32>
    %229 = vector.broadcast %228 : vector<1x256xf32> to vector<2x256xf32>
    %230 = arith.addf %227, %229 : vector<2x256xf32>
    %231 = vector.extract_strided_slice %230 {offsets = [0, 0], sizes = [2, 192], strides = [1, 1]} : vector<2x256xf32> to vector<2x192xf32>
    %232 = arith.negf %231 : vector<2x192xf32>
    %233 = math.exp %232 : vector<2x192xf32>
    %cst_81 = arith.constant 1.000000e+00 : f32
    %234 = vector.broadcast %cst_81 : f32 to vector<2x192xf32>
    %235 = arith.addf %234, %233 : vector<2x192xf32>
    %236 = arith.divf %234, %235 : vector<2x192xf32>
    %237 = vector.extract_strided_slice %236 {offsets = [0, 0], sizes = [2, 64], strides = [1, 1]} : vector<2x192xf32> to vector<2x64xf32>
    %238 = vector.extract_strided_slice %236 {offsets = [0, 64], sizes = [2, 64], strides = [1, 1]} : vector<2x192xf32> to vector<2x64xf32>
    %239 = vector.extract_strided_slice %236 {offsets = [0, 128], sizes = [2, 64], strides = [1, 1]} : vector<2x192xf32> to vector<2x64xf32>
    %240 = vector.extract_strided_slice %230 {offsets = [0, 192], sizes = [2, 64], strides = [1, 1]} : vector<2x256xf32> to vector<2x64xf32>
    %241 = math.tanh %240 : vector<2x64xf32>
    %242 = arith.mulf %238, %194 : vector<2x64xf32>
    %243 = arith.mulf %237, %241 : vector<2x64xf32>
    %244 = arith.addf %242, %243 : vector<2x64xf32>
    %245 = math.tanh %244 : vector<2x64xf32>
    %246 = arith.mulf %239, %245 : vector<2x64xf32>
    %247 = arith.index_cast %c4_i32 : i32 to index
    %c0_82 = arith.constant 0 : index
    %c0_83 = arith.constant 0 : index
    %248 = vector.load %arg10[%247, %c0_82, %c0_83] : memref<11x2x64xf32, #tpu.memory_space<vmem>>, vector<1x2x64xf32>
    %249 = vector.shape_cast %248 : vector<1x2x64xf32> to vector<2x64xf32>
    %250 = vector.shape_cast %246 : vector<2x64xf32> to vector<1x2x64xf32>
    tpu.vector_store %arg10[%247, %c0_82, %c0_83], %250 {strides = array<i32>} : memref<11x2x64xf32, #tpu.memory_space<vmem>>, vector<1x2x64xf32>,
    %c5_i32 = arith.constant 5 : i32
    %c0_84 = arith.constant 0 : index
    %c0_85 = arith.constant 0 : index
    %251 = vector.load %arg3[%c0_84, %c0_85] : memref<64x256xf32, #tpu.memory_space<vmem>>, vector<64x256xf32>
    %cst_86 = arith.constant dense<0.000000e+00> : vector<2x256xf32>
    %252 = tpu.matmul %224, %251, %cst_86 {dimension_numbers = #tpu.dot_dimension_numbers<[1], [0], [0], [1], [0, 0, 1, 1], [], []>} : vector<2x64xf32>, vector<64x256xf32>, vector<2x256xf32> -> vector<2x256xf32>
    %c0_87 = arith.constant 0 : index
    %c0_88 = arith.constant 0 : index
    %253 = vector.load %arg6[%c0_87, %c0_88] : memref<64x256xf32, #tpu.memory_space<vmem>>, vector<64x256xf32>
    %cst_89 = arith.constant dense<0.000000e+00> : vector<2x256xf32>
    %254 = tpu.matmul %246, %253, %cst_89 {dimension_numbers = #tpu.dot_dimension_numbers<[1], [0], [0], [1], [0, 0, 1, 1], [], []>} : vector<2x64xf32>, vector<64x256xf32>, vector<2x256xf32> -> vector<2x256xf32>
    %255 = arith.index_cast %c5_i32 : i32 to index
    %c0_90 = arith.constant 0 : index
    %c0_91 = arith.constant 0 : index
    %256 = vector.load %arg0[%255, %c0_90, %c0_91] : memref<8x2x256xf32, #tpu.memory_space<vmem>>, vector<1x2x256xf32>
    %257 = vector.shape_cast %256 : vector<1x2x256xf32> to vector<2x256xf32>
    %258 = arith.addf %257, %252 : vector<2x256xf32>
    %259 = vector.extract_strided_slice %258 {offsets = [0, 0], sizes = [2, 192], strides = [1, 1]} : vector<2x256xf32> to vector<2x192xf32>
    %260 = arith.negf %259 : vector<2x192xf32>
    %261 = math.exp %260 : vector<2x192xf32>
    %cst_92 = arith.constant 1.000000e+00 : f32
    %262 = vector.broadcast %cst_92 : f32 to vector<2x192xf32>
    %263 = arith.addf %262, %261 : vector<2x192xf32>
    %264 = arith.divf %262, %263 : vector<2x192xf32>
    %265 = vector.extract_strided_slice %264 {offsets = [0, 0], sizes = [2, 64], strides = [1, 1]} : vector<2x192xf32> to vector<2x64xf32>
    %266 = vector.extract_strided_slice %264 {offsets = [0, 64], sizes = [2, 64], strides = [1, 1]} : vector<2x192xf32> to vector<2x64xf32>
    %267 = vector.extract_strided_slice %264 {offsets = [0, 128], sizes = [2, 64], strides = [1, 1]} : vector<2x192xf32> to vector<2x64xf32>
    %268 = vector.extract_strided_slice %258 {offsets = [0, 192], sizes = [2, 64], strides = [1, 1]} : vector<2x256xf32> to vector<2x64xf32>
    %269 = math.tanh %268 : vector<2x64xf32>
    %270 = arith.mulf %266, %222 : vector<2x64xf32>
    %271 = arith.mulf %265, %269 : vector<2x64xf32>
    %272 = arith.addf %270, %271 : vector<2x64xf32>
    %273 = math.tanh %272 : vector<2x64xf32>
    %274 = arith.mulf %267, %273 : vector<2x64xf32>
    %c0_93 = arith.constant 0 : index
    %c0_94 = arith.constant 0 : index
    %275 = vector.load %arg4[%c0_93, %c0_94] : memref<64x256xf32, #tpu.memory_space<vmem>>, vector<64x256xf32>
    %cst_95 = arith.constant dense<0.000000e+00> : vector<2x256xf32>
    %276 = tpu.matmul %274, %275, %cst_95 {dimension_numbers = #tpu.dot_dimension_numbers<[1], [0], [0], [1], [0, 0, 1, 1], [], []>} : vector<2x64xf32>, vector<64x256xf32>, vector<2x256xf32> -> vector<2x256xf32>
    %277 = arith.addf %276, %254 : vector<2x256xf32>
    %c0_96 = arith.constant 0 : index
    %c0_97 = arith.constant 0 : index
    %278 = vector.load %arg5[%c0_96, %c0_97] : memref<1x256xf32, #tpu.memory_space<vmem>>, vector<1x256xf32>
    %279 = vector.broadcast %278 : vector<1x256xf32> to vector<2x256xf32>
    %280 = arith.addf %277, %279 : vector<2x256xf32>
    %281 = vector.extract_strided_slice %280 {offsets = [0, 0], sizes = [2, 192], strides = [1, 1]} : vector<2x256xf32> to vector<2x192xf32>
    %282 = arith.negf %281 : vector<2x192xf32>
    %283 = math.exp %282 : vector<2x192xf32>
    %cst_98 = arith.constant 1.000000e+00 : f32
    %284 = vector.broadcast %cst_98 : f32 to vector<2x192xf32>
    %285 = arith.addf %284, %283 : vector<2x192xf32>
    %286 = arith.divf %284, %285 : vector<2x192xf32>
    %287 = vector.extract_strided_slice %286 {offsets = [0, 0], sizes = [2, 64], strides = [1, 1]} : vector<2x192xf32> to vector<2x64xf32>
    %288 = vector.extract_strided_slice %286 {offsets = [0, 64], sizes = [2, 64], strides = [1, 1]} : vector<2x192xf32> to vector<2x64xf32>
    %289 = vector.extract_strided_slice %286 {offsets = [0, 128], sizes = [2, 64], strides = [1, 1]} : vector<2x192xf32> to vector<2x64xf32>
    %290 = vector.extract_strided_slice %280 {offsets = [0, 192], sizes = [2, 64], strides = [1, 1]} : vector<2x256xf32> to vector<2x64xf32>
    %291 = math.tanh %290 : vector<2x64xf32>
    %292 = arith.mulf %288, %244 : vector<2x64xf32>
    %293 = arith.mulf %287, %291 : vector<2x64xf32>
    %294 = arith.addf %292, %293 : vector<2x64xf32>
    %295 = math.tanh %294 : vector<2x64xf32>
    %296 = arith.mulf %289, %295 : vector<2x64xf32>
    %297 = arith.index_cast %c5_i32 : i32 to index
    %c0_99 = arith.constant 0 : index
    %c0_100 = arith.constant 0 : index
    %298 = vector.load %arg10[%297, %c0_99, %c0_100] : memref<11x2x64xf32, #tpu.memory_space<vmem>>, vector<1x2x64xf32>
    %299 = vector.shape_cast %298 : vector<1x2x64xf32> to vector<2x64xf32>
    %300 = vector.shape_cast %296 : vector<2x64xf32> to vector<1x2x64xf32>
    tpu.vector_store %arg10[%297, %c0_99, %c0_100], %300 {strides = array<i32>} : memref<11x2x64xf32, #tpu.memory_space<vmem>>, vector<1x2x64xf32>,
    %c6_i32 = arith.constant 6 : i32
    %c0_101 = arith.constant 0 : index
    %c0_102 = arith.constant 0 : index
    %301 = vector.load %arg3[%c0_101, %c0_102] : memref<64x256xf32, #tpu.memory_space<vmem>>, vector<64x256xf32>
    %cst_103 = arith.constant dense<0.000000e+00> : vector<2x256xf32>
    %302 = tpu.matmul %274, %301, %cst_103 {dimension_numbers = #tpu.dot_dimension_numbers<[1], [0], [0], [1], [0, 0, 1, 1], [], []>} : vector<2x64xf32>, vector<64x256xf32>, vector<2x256xf32> -> vector<2x256xf32>
    %c0_104 = arith.constant 0 : index
    %c0_105 = arith.constant 0 : index
    %303 = vector.load %arg6[%c0_104, %c0_105] : memref<64x256xf32, #tpu.memory_space<vmem>>, vector<64x256xf32>
    %cst_106 = arith.constant dense<0.000000e+00> : vector<2x256xf32>
    %304 = tpu.matmul %296, %303, %cst_106 {dimension_numbers = #tpu.dot_dimension_numbers<[1], [0], [0], [1], [0, 0, 1, 1], [], []>} : vector<2x64xf32>, vector<64x256xf32>, vector<2x256xf32> -> vector<2x256xf32>
    %305 = arith.index_cast %c6_i32 : i32 to index
    %c0_107 = arith.constant 0 : index
    %c0_108 = arith.constant 0 : index
    %306 = vector.load %arg0[%305, %c0_107, %c0_108] : memref<8x2x256xf32, #tpu.memory_space<vmem>>, vector<1x2x256xf32>
    %307 = vector.shape_cast %306 : vector<1x2x256xf32> to vector<2x256xf32>
    %308 = arith.addf %307, %302 : vector<2x256xf32>
    %309 = vector.extract_strided_slice %308 {offsets = [0, 0], sizes = [2, 192], strides = [1, 1]} : vector<2x256xf32> to vector<2x192xf32>
    %310 = arith.negf %309 : vector<2x192xf32>
    %311 = math.exp %310 : vector<2x192xf32>
    %cst_109 = arith.constant 1.000000e+00 : f32
    %312 = vector.broadcast %cst_109 : f32 to vector<2x192xf32>
    %313 = arith.addf %312, %311 : vector<2x192xf32>
    %314 = arith.divf %312, %313 : vector<2x192xf32>
    %315 = vector.extract_strided_slice %314 {offsets = [0, 0], sizes = [2, 64], strides = [1, 1]} : vector<2x192xf32> to vector<2x64xf32>
    %316 = vector.extract_strided_slice %314 {offsets = [0, 64], sizes = [2, 64], strides = [1, 1]} : vector<2x192xf32> to vector<2x64xf32>
    %317 = vector.extract_strided_slice %314 {offsets = [0, 128], sizes = [2, 64], strides = [1, 1]} : vector<2x192xf32> to vector<2x64xf32>
    %318 = vector.extract_strided_slice %308 {offsets = [0, 192], sizes = [2, 64], strides = [1, 1]} : vector<2x256xf32> to vector<2x64xf32>
    %319 = math.tanh %318 : vector<2x64xf32>
    %320 = arith.mulf %316, %272 : vector<2x64xf32>
    %321 = arith.mulf %315, %319 : vector<2x64xf32>
    %322 = arith.addf %320, %321 : vector<2x64xf32>
    %323 = math.tanh %322 : vector<2x64xf32>
    %324 = arith.mulf %317, %323 : vector<2x64xf32>
    %c0_110 = arith.constant 0 : index
    %c0_111 = arith.constant 0 : index
    %325 = vector.load %arg4[%c0_110, %c0_111] : memref<64x256xf32, #tpu.memory_space<vmem>>, vector<64x256xf32>
    %cst_112 = arith.constant dense<0.000000e+00> : vector<2x256xf32>
    %326 = tpu.matmul %324, %325, %cst_112 {dimension_numbers = #tpu.dot_dimension_numbers<[1], [0], [0], [1], [0, 0, 1, 1], [], []>} : vector<2x64xf32>, vector<64x256xf32>, vector<2x256xf32> -> vector<2x256xf32>
    %327 = arith.addf %326, %304 : vector<2x256xf32>
    %c0_113 = arith.constant 0 : index
    %c0_114 = arith.constant 0 : index
    %328 = vector.load %arg5[%c0_113, %c0_114] : memref<1x256xf32, #tpu.memory_space<vmem>>, vector<1x256xf32>
    %329 = vector.broadcast %328 : vector<1x256xf32> to vector<2x256xf32>
    %330 = arith.addf %327, %329 : vector<2x256xf32>
    %331 = vector.extract_strided_slice %330 {offsets = [0, 0], sizes = [2, 192], strides = [1, 1]} : vector<2x256xf32> to vector<2x192xf32>
    %332 = arith.negf %331 : vector<2x192xf32>
    %333 = math.exp %332 : vector<2x192xf32>
    %cst_115 = arith.constant 1.000000e+00 : f32
    %334 = vector.broadcast %cst_115 : f32 to vector<2x192xf32>
    %335 = arith.addf %334, %333 : vector<2x192xf32>
    %336 = arith.divf %334, %335 : vector<2x192xf32>
    %337 = vector.extract_strided_slice %336 {offsets = [0, 0], sizes = [2, 64], strides = [1, 1]} : vector<2x192xf32> to vector<2x64xf32>
    %338 = vector.extract_strided_slice %336 {offsets = [0, 64], sizes = [2, 64], strides = [1, 1]} : vector<2x192xf32> to vector<2x64xf32>
    %339 = vector.extract_strided_slice %336 {offsets = [0, 128], sizes = [2, 64], strides = [1, 1]} : vector<2x192xf32> to vector<2x64xf32>
    %340 = vector.extract_strided_slice %330 {offsets = [0, 192], sizes = [2, 64], strides = [1, 1]} : vector<2x256xf32> to vector<2x64xf32>
    %341 = math.tanh %340 : vector<2x64xf32>
    %342 = arith.mulf %338, %294 : vector<2x64xf32>
    %343 = arith.mulf %337, %341 : vector<2x64xf32>
    %344 = arith.addf %342, %343 : vector<2x64xf32>
    %345 = math.tanh %344 : vector<2x64xf32>
    %346 = arith.mulf %339, %345 : vector<2x64xf32>
    %347 = arith.index_cast %c6_i32 : i32 to index
    %c0_116 = arith.constant 0 : index
    %c0_117 = arith.constant 0 : index
    %348 = vector.load %arg10[%347, %c0_116, %c0_117] : memref<11x2x64xf32, #tpu.memory_space<vmem>>, vector<1x2x64xf32>
    %349 = vector.shape_cast %348 : vector<1x2x64xf32> to vector<2x64xf32>
    %350 = vector.shape_cast %346 : vector<2x64xf32> to vector<1x2x64xf32>
    tpu.vector_store %arg10[%347, %c0_116, %c0_117], %350 {strides = array<i32>} : memref<11x2x64xf32, #tpu.memory_space<vmem>>, vector<1x2x64xf32>,
    %c7_i32 = arith.constant 7 : i32
    %c0_118 = arith.constant 0 : index
    %c0_119 = arith.constant 0 : index
    %351 = vector.load %arg3[%c0_118, %c0_119] : memref<64x256xf32, #tpu.memory_space<vmem>>, vector<64x256xf32>
    %cst_120 = arith.constant dense<0.000000e+00> : vector<2x256xf32>
    %352 = tpu.matmul %324, %351, %cst_120 {dimension_numbers = #tpu.dot_dimension_numbers<[1], [0], [0], [1], [0, 0, 1, 1], [], []>} : vector<2x64xf32>, vector<64x256xf32>, vector<2x256xf32> -> vector<2x256xf32>
    %c0_121 = arith.constant 0 : index
    %c0_122 = arith.constant 0 : index
    %353 = vector.load %arg6[%c0_121, %c0_122] : memref<64x256xf32, #tpu.memory_space<vmem>>, vector<64x256xf32>
    %cst_123 = arith.constant dense<0.000000e+00> : vector<2x256xf32>
    %354 = tpu.matmul %346, %353, %cst_123 {dimension_numbers = #tpu.dot_dimension_numbers<[1], [0], [0], [1], [0, 0, 1, 1], [], []>} : vector<2x64xf32>, vector<64x256xf32>, vector<2x256xf32> -> vector<2x256xf32>
    %355 = arith.index_cast %c7_i32 : i32 to index
    %c0_124 = arith.constant 0 : index
    %c0_125 = arith.constant 0 : index
    %356 = vector.load %arg0[%355, %c0_124, %c0_125] : memref<8x2x256xf32, #tpu.memory_space<vmem>>, vector<1x2x256xf32>
    %357 = vector.shape_cast %356 : vector<1x2x256xf32> to vector<2x256xf32>
    %358 = arith.addf %357, %352 : vector<2x256xf32>
    %359 = vector.extract_strided_slice %358 {offsets = [0, 0], sizes = [2, 192], strides = [1, 1]} : vector<2x256xf32> to vector<2x192xf32>
    %360 = arith.negf %359 : vector<2x192xf32>
    %361 = math.exp %360 : vector<2x192xf32>
    %cst_126 = arith.constant 1.000000e+00 : f32
    %362 = vector.broadcast %cst_126 : f32 to vector<2x192xf32>
    %363 = arith.addf %362, %361 : vector<2x192xf32>
    %364 = arith.divf %362, %363 : vector<2x192xf32>
    %365 = vector.extract_strided_slice %364 {offsets = [0, 0], sizes = [2, 64], strides = [1, 1]} : vector<2x192xf32> to vector<2x64xf32>
    %366 = vector.extract_strided_slice %364 {offsets = [0, 64], sizes = [2, 64], strides = [1, 1]} : vector<2x192xf32> to vector<2x64xf32>
    %367 = vector.extract_strided_slice %364 {offsets = [0, 128], sizes = [2, 64], strides = [1, 1]} : vector<2x192xf32> to vector<2x64xf32>
    %368 = vector.extract_strided_slice %358 {offsets = [0, 192], sizes = [2, 64], strides = [1, 1]} : vector<2x256xf32> to vector<2x64xf32>
    %369 = math.tanh %368 : vector<2x64xf32>
    %370 = arith.mulf %366, %322 : vector<2x64xf32>
    %371 = arith.mulf %365, %369 : vector<2x64xf32>
    %372 = arith.addf %370, %371 : vector<2x64xf32>
    %373 = math.tanh %372 : vector<2x64xf32>
    %374 = arith.mulf %367, %373 : vector<2x64xf32>
    %c0_127 = arith.constant 0 : index
    %c0_128 = arith.constant 0 : index
    %375 = vector.load %arg4[%c0_127, %c0_128] : memref<64x256xf32, #tpu.memory_space<vmem>>, vector<64x256xf32>
    %cst_129 = arith.constant dense<0.000000e+00> : vector<2x256xf32>
    %376 = tpu.matmul %374, %375, %cst_129 {dimension_numbers = #tpu.dot_dimension_numbers<[1], [0], [0], [1], [0, 0, 1, 1], [], []>} : vector<2x64xf32>, vector<64x256xf32>, vector<2x256xf32> -> vector<2x256xf32>
    %377 = arith.addf %376, %354 : vector<2x256xf32>
    %c0_130 = arith.constant 0 : index
    %c0_131 = arith.constant 0 : index
    %378 = vector.load %arg5[%c0_130, %c0_131] : memref<1x256xf32, #tpu.memory_space<vmem>>, vector<1x256xf32>
    %379 = vector.broadcast %378 : vector<1x256xf32> to vector<2x256xf32>
    %380 = arith.addf %377, %379 : vector<2x256xf32>
    %381 = vector.extract_strided_slice %380 {offsets = [0, 0], sizes = [2, 192], strides = [1, 1]} : vector<2x256xf32> to vector<2x192xf32>
    %382 = arith.negf %381 : vector<2x192xf32>
    %383 = math.exp %382 : vector<2x192xf32>
    %cst_132 = arith.constant 1.000000e+00 : f32
    %384 = vector.broadcast %cst_132 : f32 to vector<2x192xf32>
    %385 = arith.addf %384, %383 : vector<2x192xf32>
    %386 = arith.divf %384, %385 : vector<2x192xf32>
    %387 = vector.extract_strided_slice %386 {offsets = [0, 0], sizes = [2, 64], strides = [1, 1]} : vector<2x192xf32> to vector<2x64xf32>
    %388 = vector.extract_strided_slice %386 {offsets = [0, 64], sizes = [2, 64], strides = [1, 1]} : vector<2x192xf32> to vector<2x64xf32>
    %389 = vector.extract_strided_slice %386 {offsets = [0, 128], sizes = [2, 64], strides = [1, 1]} : vector<2x192xf32> to vector<2x64xf32>
    %390 = vector.extract_strided_slice %380 {offsets = [0, 192], sizes = [2, 64], strides = [1, 1]} : vector<2x256xf32> to vector<2x64xf32>
    %391 = math.tanh %390 : vector<2x64xf32>
    %392 = arith.mulf %388, %344 : vector<2x64xf32>
    %393 = arith.mulf %387, %391 : vector<2x64xf32>
    %394 = arith.addf %392, %393 : vector<2x64xf32>
    %395 = math.tanh %394 : vector<2x64xf32>
    %396 = arith.mulf %389, %395 : vector<2x64xf32>
    %397 = arith.index_cast %c7_i32 : i32 to index
    %c0_133 = arith.constant 0 : index
    %c0_134 = arith.constant 0 : index
    %398 = vector.load %arg10[%397, %c0_133, %c0_134] : memref<11x2x64xf32, #tpu.memory_space<vmem>>, vector<1x2x64xf32>
    %399 = vector.shape_cast %398 : vector<1x2x64xf32> to vector<2x64xf32>
    %400 = vector.shape_cast %396 : vector<2x64xf32> to vector<1x2x64xf32>
    tpu.vector_store %arg10[%397, %c0_133, %c0_134], %400 {strides = array<i32>} : memref<11x2x64xf32, #tpu.memory_space<vmem>>, vector<1x2x64xf32>,
    %c8_i32 = arith.constant 8 : i32
    %c0_135 = arith.constant 0 : index
    %c0_136 = arith.constant 0 : index
    %401 = vector.load %arg7[%c0_135, %c0_136] : memref<1x64xf32, #tpu.memory_space<vmem>>, vector<1x64xf32>
    %402 = vector.broadcast %401 : vector<1x64xf32> to vector<2x64xf32>
    %403 = arith.mulf %396, %402 : vector<2x64xf32>
    %cst_137 = arith.constant dense<0.000000e+00> : vector<2xf32>
    %404 = vector.multi_reduction <add>, %403, %cst_137 [1] : vector<2x64xf32> to vector<2xf32>
    %405 = vector.shape_cast %404 : vector<2xf32> to vector<2x1xf32>
    %c0_138 = arith.constant 0 : index
    %c0_139 = arith.constant 0 : index
    %406 = vector.load %arg8[%c0_138, %c0_139] : memref<1x1xf32, #tpu.memory_space<vmem>>, vector<1x1xf32>
    %407 = vector.broadcast %406 : vector<1x1xf32> to vector<2x1xf32>
    %408 = arith.addf %405, %407 : vector<2x1xf32>
    %c0_i32_140 = arith.constant 0 : i32
    %c0_141 = arith.constant 0 : index
    %c0_142 = arith.constant 0 : index
    %409 = vector.load %arg1[%c0_141, %c0_142] : memref<1x256xf32, #tpu.memory_space<vmem>>, vector<1x256xf32>
    %410 = vector.broadcast %408 : vector<2x1xf32> to vector<2x256xf32>
    %411 = vector.broadcast %409 : vector<1x256xf32> to vector<2x256xf32>
    %412 = arith.mulf %410, %411 : vector<2x256xf32>
    %c0_143 = arith.constant 0 : index
    %c0_144 = arith.constant 0 : index
    %413 = vector.load %arg2[%c0_143, %c0_144] : memref<1x256xf32, #tpu.memory_space<vmem>>, vector<1x256xf32>
    %414 = vector.broadcast %413 : vector<1x256xf32> to vector<2x256xf32>
    %415 = arith.addf %412, %414 : vector<2x256xf32>
    %c0_145 = arith.constant 0 : index
    %c0_146 = arith.constant 0 : index
    %416 = vector.load %arg3[%c0_145, %c0_146] : memref<64x256xf32, #tpu.memory_space<vmem>>, vector<64x256xf32>
    %cst_147 = arith.constant dense<0.000000e+00> : vector<2x256xf32>
    %417 = tpu.matmul %374, %416, %cst_147 {dimension_numbers = #tpu.dot_dimension_numbers<[1], [0], [0], [1], [0, 0, 1, 1], [], []>} : vector<2x64xf32>, vector<64x256xf32>, vector<2x256xf32> -> vector<2x256xf32>
    %c0_148 = arith.constant 0 : index
    %c0_149 = arith.constant 0 : index
    %418 = vector.load %arg6[%c0_148, %c0_149] : memref<64x256xf32, #tpu.memory_space<vmem>>, vector<64x256xf32>
    %cst_150 = arith.constant dense<0.000000e+00> : vector<2x256xf32>
    %419 = tpu.matmul %396, %418, %cst_150 {dimension_numbers = #tpu.dot_dimension_numbers<[1], [0], [0], [1], [0, 0, 1, 1], [], []>} : vector<2x64xf32>, vector<64x256xf32>, vector<2x256xf32> -> vector<2x256xf32>
    %420 = arith.addf %415, %417 : vector<2x256xf32>
    %421 = vector.extract_strided_slice %420 {offsets = [0, 0], sizes = [2, 192], strides = [1, 1]} : vector<2x256xf32> to vector<2x192xf32>
    %422 = arith.negf %421 : vector<2x192xf32>
    %423 = math.exp %422 : vector<2x192xf32>
    %cst_151 = arith.constant 1.000000e+00 : f32
    %424 = vector.broadcast %cst_151 : f32 to vector<2x192xf32>
    %425 = arith.addf %424, %423 : vector<2x192xf32>
    %426 = arith.divf %424, %425 : vector<2x192xf32>
    %427 = vector.extract_strided_slice %426 {offsets = [0, 0], sizes = [2, 64], strides = [1, 1]} : vector<2x192xf32> to vector<2x64xf32>
    %428 = vector.extract_strided_slice %426 {offsets = [0, 64], sizes = [2, 64], strides = [1, 1]} : vector<2x192xf32> to vector<2x64xf32>
    %429 = vector.extract_strided_slice %426 {offsets = [0, 128], sizes = [2, 64], strides = [1, 1]} : vector<2x192xf32> to vector<2x64xf32>
    %430 = vector.extract_strided_slice %420 {offsets = [0, 192], sizes = [2, 64], strides = [1, 1]} : vector<2x256xf32> to vector<2x64xf32>
    %431 = math.tanh %430 : vector<2x64xf32>
    %432 = arith.mulf %428, %372 : vector<2x64xf32>
    %433 = arith.mulf %427, %431 : vector<2x64xf32>
    %434 = arith.addf %432, %433 : vector<2x64xf32>
    %435 = math.tanh %434 : vector<2x64xf32>
    %436 = arith.mulf %429, %435 : vector<2x64xf32>
    %c0_152 = arith.constant 0 : index
    %c0_153 = arith.constant 0 : index
    %437 = vector.load %arg4[%c0_152, %c0_153] : memref<64x256xf32, #tpu.memory_space<vmem>>, vector<64x256xf32>
    %cst_154 = arith.constant dense<0.000000e+00> : vector<2x256xf32>
    %438 = tpu.matmul %436, %437, %cst_154 {dimension_numbers = #tpu.dot_dimension_numbers<[1], [0], [0], [1], [0, 0, 1, 1], [], []>} : vector<2x64xf32>, vector<64x256xf32>, vector<2x256xf32> -> vector<2x256xf32>
    %439 = arith.addf %438, %419 : vector<2x256xf32>
    %c0_155 = arith.constant 0 : index
    %c0_156 = arith.constant 0 : index
    %440 = vector.load %arg5[%c0_155, %c0_156] : memref<1x256xf32, #tpu.memory_space<vmem>>, vector<1x256xf32>
    %441 = vector.broadcast %440 : vector<1x256xf32> to vector<2x256xf32>
    %442 = arith.addf %439, %441 : vector<2x256xf32>
    %443 = vector.extract_strided_slice %442 {offsets = [0, 0], sizes = [2, 192], strides = [1, 1]} : vector<2x256xf32> to vector<2x192xf32>
    %444 = arith.negf %443 : vector<2x192xf32>
    %445 = math.exp %444 : vector<2x192xf32>
    %cst_157 = arith.constant 1.000000e+00 : f32
    %446 = vector.broadcast %cst_157 : f32 to vector<2x192xf32>
    %447 = arith.addf %446, %445 : vector<2x192xf32>
    %448 = arith.divf %446, %447 : vector<2x192xf32>
    %449 = vector.extract_strided_slice %448 {offsets = [0, 0], sizes = [2, 64], strides = [1, 1]} : vector<2x192xf32> to vector<2x64xf32>
    %450 = vector.extract_strided_slice %448 {offsets = [0, 64], sizes = [2, 64], strides = [1, 1]} : vector<2x192xf32> to vector<2x64xf32>
    %451 = vector.extract_strided_slice %448 {offsets = [0, 128], sizes = [2, 64], strides = [1, 1]} : vector<2x192xf32> to vector<2x64xf32>
    %452 = vector.extract_strided_slice %442 {offsets = [0, 192], sizes = [2, 64], strides = [1, 1]} : vector<2x256xf32> to vector<2x64xf32>
    %453 = math.tanh %452 : vector<2x64xf32>
    %454 = arith.mulf %450, %394 : vector<2x64xf32>
    %455 = arith.mulf %449, %453 : vector<2x64xf32>
    %456 = arith.addf %454, %455 : vector<2x64xf32>
    %457 = math.tanh %456 : vector<2x64xf32>
    %458 = arith.mulf %451, %457 : vector<2x64xf32>
    %c8_i32_158 = arith.constant 8 : i32
    %459 = arith.addi %c8_i32_158, %c0_i32_140 : i32
    %460 = arith.index_cast %459 : i32 to index
    %c0_159 = arith.constant 0 : index
    %c0_160 = arith.constant 0 : index
    %461 = vector.load %arg10[%460, %c0_159, %c0_160] : memref<11x2x64xf32, #tpu.memory_space<vmem>>, vector<1x2x64xf32>
    %462 = vector.shape_cast %461 : vector<1x2x64xf32> to vector<2x64xf32>
    %463 = vector.shape_cast %458 : vector<2x64xf32> to vector<1x2x64xf32>
    tpu.vector_store %arg10[%460, %c0_159, %c0_160], %463 {strides = array<i32>} : memref<11x2x64xf32, #tpu.memory_space<vmem>>, vector<1x2x64xf32>,
    %c0_161 = arith.constant 0 : index
    %c0_162 = arith.constant 0 : index
    %464 = vector.load %arg7[%c0_161, %c0_162] : memref<1x64xf32, #tpu.memory_space<vmem>>, vector<1x64xf32>
    %465 = vector.broadcast %464 : vector<1x64xf32> to vector<2x64xf32>
    %466 = arith.mulf %458, %465 : vector<2x64xf32>
    %cst_163 = arith.constant dense<0.000000e+00> : vector<2xf32>
    %467 = vector.multi_reduction <add>, %466, %cst_163 [1] : vector<2x64xf32> to vector<2xf32>
    %468 = vector.shape_cast %467 : vector<2xf32> to vector<2x1xf32>
    %c0_164 = arith.constant 0 : index
    %c0_165 = arith.constant 0 : index
    %469 = vector.load %arg8[%c0_164, %c0_165] : memref<1x1xf32, #tpu.memory_space<vmem>>, vector<1x1xf32>
    %470 = vector.broadcast %469 : vector<1x1xf32> to vector<2x1xf32>
    %471 = arith.addf %468, %470 : vector<2x1xf32>
    %c1_i32_166 = arith.constant 1 : i32
    %c0_167 = arith.constant 0 : index
    %c0_168 = arith.constant 0 : index
    %472 = vector.load %arg1[%c0_167, %c0_168] : memref<1x256xf32, #tpu.memory_space<vmem>>, vector<1x256xf32>
    %473 = vector.broadcast %471 : vector<2x1xf32> to vector<2x256xf32>
    %474 = vector.broadcast %472 : vector<1x256xf32> to vector<2x256xf32>
    %475 = arith.mulf %473, %474 : vector<2x256xf32>
    %c0_169 = arith.constant 0 : index
    %c0_170 = arith.constant 0 : index
    %476 = vector.load %arg2[%c0_169, %c0_170] : memref<1x256xf32, #tpu.memory_space<vmem>>, vector<1x256xf32>
    %477 = vector.broadcast %476 : vector<1x256xf32> to vector<2x256xf32>
    %478 = arith.addf %475, %477 : vector<2x256xf32>
    %c0_171 = arith.constant 0 : index
    %c0_172 = arith.constant 0 : index
    %479 = vector.load %arg3[%c0_171, %c0_172] : memref<64x256xf32, #tpu.memory_space<vmem>>, vector<64x256xf32>
    %cst_173 = arith.constant dense<0.000000e+00> : vector<2x256xf32>
    %480 = tpu.matmul %436, %479, %cst_173 {dimension_numbers = #tpu.dot_dimension_numbers<[1], [0], [0], [1], [0, 0, 1, 1], [], []>} : vector<2x64xf32>, vector<64x256xf32>, vector<2x256xf32> -> vector<2x256xf32>
    %c0_174 = arith.constant 0 : index
    %c0_175 = arith.constant 0 : index
    %481 = vector.load %arg6[%c0_174, %c0_175] : memref<64x256xf32, #tpu.memory_space<vmem>>, vector<64x256xf32>
    %cst_176 = arith.constant dense<0.000000e+00> : vector<2x256xf32>
    %482 = tpu.matmul %458, %481, %cst_176 {dimension_numbers = #tpu.dot_dimension_numbers<[1], [0], [0], [1], [0, 0, 1, 1], [], []>} : vector<2x64xf32>, vector<64x256xf32>, vector<2x256xf32> -> vector<2x256xf32>
    %483 = arith.addf %478, %480 : vector<2x256xf32>
    %484 = vector.extract_strided_slice %483 {offsets = [0, 0], sizes = [2, 192], strides = [1, 1]} : vector<2x256xf32> to vector<2x192xf32>
    %485 = arith.negf %484 : vector<2x192xf32>
    %486 = math.exp %485 : vector<2x192xf32>
    %cst_177 = arith.constant 1.000000e+00 : f32
    %487 = vector.broadcast %cst_177 : f32 to vector<2x192xf32>
    %488 = arith.addf %487, %486 : vector<2x192xf32>
    %489 = arith.divf %487, %488 : vector<2x192xf32>
    %490 = vector.extract_strided_slice %489 {offsets = [0, 0], sizes = [2, 64], strides = [1, 1]} : vector<2x192xf32> to vector<2x64xf32>
    %491 = vector.extract_strided_slice %489 {offsets = [0, 64], sizes = [2, 64], strides = [1, 1]} : vector<2x192xf32> to vector<2x64xf32>
    %492 = vector.extract_strided_slice %489 {offsets = [0, 128], sizes = [2, 64], strides = [1, 1]} : vector<2x192xf32> to vector<2x64xf32>
    %493 = vector.extract_strided_slice %483 {offsets = [0, 192], sizes = [2, 64], strides = [1, 1]} : vector<2x256xf32> to vector<2x64xf32>
    %494 = math.tanh %493 : vector<2x64xf32>
    %495 = arith.mulf %491, %434 : vector<2x64xf32>
    %496 = arith.mulf %490, %494 : vector<2x64xf32>
    %497 = arith.addf %495, %496 : vector<2x64xf32>
    %498 = math.tanh %497 : vector<2x64xf32>
    %499 = arith.mulf %492, %498 : vector<2x64xf32>
    %c0_178 = arith.constant 0 : index
    %c0_179 = arith.constant 0 : index
    %500 = vector.load %arg4[%c0_178, %c0_179] : memref<64x256xf32, #tpu.memory_space<vmem>>, vector<64x256xf32>
    %cst_180 = arith.constant dense<0.000000e+00> : vector<2x256xf32>
    %501 = tpu.matmul %499, %500, %cst_180 {dimension_numbers = #tpu.dot_dimension_numbers<[1], [0], [0], [1], [0, 0, 1, 1], [], []>} : vector<2x64xf32>, vector<64x256xf32>, vector<2x256xf32> -> vector<2x256xf32>
    %502 = arith.addf %501, %482 : vector<2x256xf32>
    %c0_181 = arith.constant 0 : index
    %c0_182 = arith.constant 0 : index
    %503 = vector.load %arg5[%c0_181, %c0_182] : memref<1x256xf32, #tpu.memory_space<vmem>>, vector<1x256xf32>
    %504 = vector.broadcast %503 : vector<1x256xf32> to vector<2x256xf32>
    %505 = arith.addf %502, %504 : vector<2x256xf32>
    %506 = vector.extract_strided_slice %505 {offsets = [0, 0], sizes = [2, 192], strides = [1, 1]} : vector<2x256xf32> to vector<2x192xf32>
    %507 = arith.negf %506 : vector<2x192xf32>
    %508 = math.exp %507 : vector<2x192xf32>
    %cst_183 = arith.constant 1.000000e+00 : f32
    %509 = vector.broadcast %cst_183 : f32 to vector<2x192xf32>
    %510 = arith.addf %509, %508 : vector<2x192xf32>
    %511 = arith.divf %509, %510 : vector<2x192xf32>
    %512 = vector.extract_strided_slice %511 {offsets = [0, 0], sizes = [2, 64], strides = [1, 1]} : vector<2x192xf32> to vector<2x64xf32>
    %513 = vector.extract_strided_slice %511 {offsets = [0, 64], sizes = [2, 64], strides = [1, 1]} : vector<2x192xf32> to vector<2x64xf32>
    %514 = vector.extract_strided_slice %511 {offsets = [0, 128], sizes = [2, 64], strides = [1, 1]} : vector<2x192xf32> to vector<2x64xf32>
    %515 = vector.extract_strided_slice %505 {offsets = [0, 192], sizes = [2, 64], strides = [1, 1]} : vector<2x256xf32> to vector<2x64xf32>
    %516 = math.tanh %515 : vector<2x64xf32>
    %517 = arith.mulf %513, %456 : vector<2x64xf32>
    %518 = arith.mulf %512, %516 : vector<2x64xf32>
    %519 = arith.addf %517, %518 : vector<2x64xf32>
    %520 = math.tanh %519 : vector<2x64xf32>
    %521 = arith.mulf %514, %520 : vector<2x64xf32>
    %c8_i32_184 = arith.constant 8 : i32
    %522 = arith.addi %c8_i32_184, %c1_i32_166 : i32
    %523 = arith.index_cast %522 : i32 to index
    %c0_185 = arith.constant 0 : index
    %c0_186 = arith.constant 0 : index
    %524 = vector.load %arg10[%523, %c0_185, %c0_186] : memref<11x2x64xf32, #tpu.memory_space<vmem>>, vector<1x2x64xf32>
    %525 = vector.shape_cast %524 : vector<1x2x64xf32> to vector<2x64xf32>
    %526 = vector.shape_cast %521 : vector<2x64xf32> to vector<1x2x64xf32>
    tpu.vector_store %arg10[%523, %c0_185, %c0_186], %526 {strides = array<i32>} : memref<11x2x64xf32, #tpu.memory_space<vmem>>, vector<1x2x64xf32>,
    %c0_187 = arith.constant 0 : index
    %c0_188 = arith.constant 0 : index
    %527 = vector.load %arg7[%c0_187, %c0_188] : memref<1x64xf32, #tpu.memory_space<vmem>>, vector<1x64xf32>
    %528 = vector.broadcast %527 : vector<1x64xf32> to vector<2x64xf32>
    %529 = arith.mulf %521, %528 : vector<2x64xf32>
    %cst_189 = arith.constant dense<0.000000e+00> : vector<2xf32>
    %530 = vector.multi_reduction <add>, %529, %cst_189 [1] : vector<2x64xf32> to vector<2xf32>
    %531 = vector.shape_cast %530 : vector<2xf32> to vector<2x1xf32>
    %c0_190 = arith.constant 0 : index
    %c0_191 = arith.constant 0 : index
    %532 = vector.load %arg8[%c0_190, %c0_191] : memref<1x1xf32, #tpu.memory_space<vmem>>, vector<1x1xf32>
    %533 = vector.broadcast %532 : vector<1x1xf32> to vector<2x1xf32>
    %534 = arith.addf %531, %533 : vector<2x1xf32>
    %c2_i32_192 = arith.constant 2 : i32
    %c0_193 = arith.constant 0 : index
    %c0_194 = arith.constant 0 : index
    %535 = vector.load %arg1[%c0_193, %c0_194] : memref<1x256xf32, #tpu.memory_space<vmem>>, vector<1x256xf32>
    %536 = vector.broadcast %534 : vector<2x1xf32> to vector<2x256xf32>
    %537 = vector.broadcast %535 : vector<1x256xf32> to vector<2x256xf32>
    %538 = arith.mulf %536, %537 : vector<2x256xf32>
    %c0_195 = arith.constant 0 : index
    %c0_196 = arith.constant 0 : index
    %539 = vector.load %arg2[%c0_195, %c0_196] : memref<1x256xf32, #tpu.memory_space<vmem>>, vector<1x256xf32>
    %540 = vector.broadcast %539 : vector<1x256xf32> to vector<2x256xf32>
    %541 = arith.addf %538, %540 : vector<2x256xf32>
    %c0_197 = arith.constant 0 : index
    %c0_198 = arith.constant 0 : index
    %542 = vector.load %arg3[%c0_197, %c0_198] : memref<64x256xf32, #tpu.memory_space<vmem>>, vector<64x256xf32>
    %cst_199 = arith.constant dense<0.000000e+00> : vector<2x256xf32>
    %543 = tpu.matmul %499, %542, %cst_199 {dimension_numbers = #tpu.dot_dimension_numbers<[1], [0], [0], [1], [0, 0, 1, 1], [], []>} : vector<2x64xf32>, vector<64x256xf32>, vector<2x256xf32> -> vector<2x256xf32>
    %c0_200 = arith.constant 0 : index
    %c0_201 = arith.constant 0 : index
    %544 = vector.load %arg6[%c0_200, %c0_201] : memref<64x256xf32, #tpu.memory_space<vmem>>, vector<64x256xf32>
    %cst_202 = arith.constant dense<0.000000e+00> : vector<2x256xf32>
    %545 = tpu.matmul %521, %544, %cst_202 {dimension_numbers = #tpu.dot_dimension_numbers<[1], [0], [0], [1], [0, 0, 1, 1], [], []>} : vector<2x64xf32>, vector<64x256xf32>, vector<2x256xf32> -> vector<2x256xf32>
    %546 = arith.addf %541, %543 : vector<2x256xf32>
    %547 = vector.extract_strided_slice %546 {offsets = [0, 0], sizes = [2, 192], strides = [1, 1]} : vector<2x256xf32> to vector<2x192xf32>
    %548 = arith.negf %547 : vector<2x192xf32>
    %549 = math.exp %548 : vector<2x192xf32>
    %cst_203 = arith.constant 1.000000e+00 : f32
    %550 = vector.broadcast %cst_203 : f32 to vector<2x192xf32>
    %551 = arith.addf %550, %549 : vector<2x192xf32>
    %552 = arith.divf %550, %551 : vector<2x192xf32>
    %553 = vector.extract_strided_slice %552 {offsets = [0, 0], sizes = [2, 64], strides = [1, 1]} : vector<2x192xf32> to vector<2x64xf32>
    %554 = vector.extract_strided_slice %552 {offsets = [0, 64], sizes = [2, 64], strides = [1, 1]} : vector<2x192xf32> to vector<2x64xf32>
    %555 = vector.extract_strided_slice %552 {offsets = [0, 128], sizes = [2, 64], strides = [1, 1]} : vector<2x192xf32> to vector<2x64xf32>
    %556 = vector.extract_strided_slice %546 {offsets = [0, 192], sizes = [2, 64], strides = [1, 1]} : vector<2x256xf32> to vector<2x64xf32>
    %557 = math.tanh %556 : vector<2x64xf32>
    %558 = arith.mulf %554, %497 : vector<2x64xf32>
    %559 = arith.mulf %553, %557 : vector<2x64xf32>
    %560 = arith.addf %558, %559 : vector<2x64xf32>
    %561 = math.tanh %560 : vector<2x64xf32>
    %562 = arith.mulf %555, %561 : vector<2x64xf32>
    %c0_204 = arith.constant 0 : index
    %c0_205 = arith.constant 0 : index
    %563 = vector.load %arg4[%c0_204, %c0_205] : memref<64x256xf32, #tpu.memory_space<vmem>>, vector<64x256xf32>
    %cst_206 = arith.constant dense<0.000000e+00> : vector<2x256xf32>
    %564 = tpu.matmul %562, %563, %cst_206 {dimension_numbers = #tpu.dot_dimension_numbers<[1], [0], [0], [1], [0, 0, 1, 1], [], []>} : vector<2x64xf32>, vector<64x256xf32>, vector<2x256xf32> -> vector<2x256xf32>
    %565 = arith.addf %564, %545 : vector<2x256xf32>
    %c0_207 = arith.constant 0 : index
    %c0_208 = arith.constant 0 : index
    %566 = vector.load %arg5[%c0_207, %c0_208] : memref<1x256xf32, #tpu.memory_space<vmem>>, vector<1x256xf32>
    %567 = vector.broadcast %566 : vector<1x256xf32> to vector<2x256xf32>
    %568 = arith.addf %565, %567 : vector<2x256xf32>
    %569 = vector.extract_strided_slice %568 {offsets = [0, 0], sizes = [2, 192], strides = [1, 1]} : vector<2x256xf32> to vector<2x192xf32>
    %570 = arith.negf %569 : vector<2x192xf32>
    %571 = math.exp %570 : vector<2x192xf32>
    %cst_209 = arith.constant 1.000000e+00 : f32
    %572 = vector.broadcast %cst_209 : f32 to vector<2x192xf32>
    %573 = arith.addf %572, %571 : vector<2x192xf32>
    %574 = arith.divf %572, %573 : vector<2x192xf32>
    %575 = vector.extract_strided_slice %574 {offsets = [0, 0], sizes = [2, 64], strides = [1, 1]} : vector<2x192xf32> to vector<2x64xf32>
    %576 = vector.extract_strided_slice %574 {offsets = [0, 64], sizes = [2, 64], strides = [1, 1]} : vector<2x192xf32> to vector<2x64xf32>
    %577 = vector.extract_strided_slice %574 {offsets = [0, 128], sizes = [2, 64], strides = [1, 1]} : vector<2x192xf32> to vector<2x64xf32>
    %578 = vector.extract_strided_slice %568 {offsets = [0, 192], sizes = [2, 64], strides = [1, 1]} : vector<2x256xf32> to vector<2x64xf32>
    %579 = math.tanh %578 : vector<2x64xf32>
    %580 = arith.mulf %576, %519 : vector<2x64xf32>
    %581 = arith.mulf %575, %579 : vector<2x64xf32>
    %582 = arith.addf %580, %581 : vector<2x64xf32>
    %583 = math.tanh %582 : vector<2x64xf32>
    %584 = arith.mulf %577, %583 : vector<2x64xf32>
    %c8_i32_210 = arith.constant 8 : i32
    %585 = arith.addi %c8_i32_210, %c2_i32_192 : i32
    %586 = arith.index_cast %585 : i32 to index
    %c0_211 = arith.constant 0 : index
    %c0_212 = arith.constant 0 : index
    %587 = vector.load %arg10[%586, %c0_211, %c0_212] : memref<11x2x64xf32, #tpu.memory_space<vmem>>, vector<1x2x64xf32>
    %588 = vector.shape_cast %587 : vector<1x2x64xf32> to vector<2x64xf32>
    %589 = vector.shape_cast %584 : vector<2x64xf32> to vector<1x2x64xf32>
    tpu.vector_store %arg10[%586, %c0_211, %c0_212], %589 {strides = array<i32>} : memref<11x2x64xf32, #tpu.memory_space<vmem>>, vector<1x2x64xf32>,
    %c0_213 = arith.constant 0 : index
    %c0_214 = arith.constant 0 : index
    %590 = vector.load %arg7[%c0_213, %c0_214] : memref<1x64xf32, #tpu.memory_space<vmem>>, vector<1x64xf32>
    %591 = vector.broadcast %590 : vector<1x64xf32> to vector<2x64xf32>
    %592 = arith.mulf %584, %591 : vector<2x64xf32>
    %cst_215 = arith.constant dense<0.000000e+00> : vector<2xf32>
    %593 = vector.multi_reduction <add>, %592, %cst_215 [1] : vector<2x64xf32> to vector<2xf32>
    %594 = vector.shape_cast %593 : vector<2xf32> to vector<2x1xf32>
    %c0_216 = arith.constant 0 : index
    %c0_217 = arith.constant 0 : index
    %595 = vector.load %arg8[%c0_216, %c0_217] : memref<1x1xf32, #tpu.memory_space<vmem>>, vector<1x1xf32>
    %596 = vector.broadcast %595 : vector<1x1xf32> to vector<2x1xf32>
    %597 = arith.addf %594, %596 : vector<2x1xf32>
    %c3_i32_218 = arith.constant 3 : i32
    %c0_219 = arith.constant 0 : index
    %c0_220 = arith.constant 0 : index
    %c0_221 = arith.constant 0 : index
    %598 = vector.load %arg10[%c0_219, %c0_220, %c0_221] : memref<11x2x64xf32, #tpu.memory_space<vmem>>, vector<11x2x64xf32>
    %c0_222 = arith.constant 0 : index
    %c0_223 = arith.constant 0 : index
    %599 = vector.load %arg7[%c0_222, %c0_223] : memref<1x64xf32, #tpu.memory_space<vmem>>, vector<1x64xf32>
    %600 = vector.shape_cast %599 : vector<1x64xf32> to vector<1x1x64xf32>
    %601 = vector.broadcast %600 : vector<1x1x64xf32> to vector<11x2x64xf32>
    %602 = arith.mulf %598, %601 : vector<11x2x64xf32>
    %cst_224 = arith.constant dense<0.000000e+00> : vector<11x2xf32>
    %603 = vector.multi_reduction <add>, %602, %cst_224 [2] : vector<11x2x64xf32> to vector<11x2xf32>
    %c0_225 = arith.constant 0 : index
    %c0_226 = arith.constant 0 : index
    %604 = vector.load %arg8[%c0_225, %c0_226] : memref<1x1xf32, #tpu.memory_space<vmem>>, vector<1x1xf32>
    %605 = vector.broadcast %604 : vector<1x1xf32> to vector<11x2xf32>
    %606 = arith.addf %603, %605 : vector<11x2xf32>
    %c0_227 = arith.constant 0 : index
    %c0_228 = arith.constant 0 : index
    %607 = vector.load %arg9[%c0_227, %c0_228] : memref<11x2xf32, #tpu.memory_space<vmem>>, vector<11x2xf32>
    tpu.vector_store %arg9[%c0_227, %c0_228], %606 {strides = array<i32>} : memref<11x2xf32, #tpu.memory_space<vmem>>, vector<11x2xf32>,
    return
  }
}

</mosaic_0001>

<bundles_post_ra>
// kernel: tpu_custom_call.1
= control target key start
LH: loop header
LB: loop body
LE: loop exit
PB: predicated region body
PF: predicated region fallthrough
CT: control target
= control target key end

     0   :  { %s6252_s0 = inlined_call_operand.hbm [shape: f32[8,2,256], index: 0, kind: input, shape index: {}]   ;;  %s6253_s1 = inlined_call_operand.vmem [shape: f32[1,256], index: 1, kind: input, shape index: {}]   ;;  %s6254_s2 = inlined_call_operand.vmem [shape: f32[1,256], index: 2, kind: input, shape index: {}]   ;;  %s6255_s3 = inlined_call_operand.hbm [shape: f32[64,256], index: 3, kind: input, shape index: {}]   ;;  %s6256_s4 = inlined_call_operand.hbm [shape: f32[64,256], index: 4, kind: input, shape index: {}]   ;;  %s6257_s5 = inlined_call_operand.vmem [shape: f32[1,256], index: 5, kind: input, shape index: {}]   ;;  %s6258_s6 = inlined_call_operand.hbm [shape: f32[64,256], index: 6, kind: input, shape index: {}]   ;;  %s6259_s7 = inlined_call_operand.vmem [shape: f32[1,64], index: 7, kind: input, shape index: {}]   ;;  %s6260_s8 = inlined_call_operand.<no memory space> [shape: f32[1,1], index: 8, kind: input, shape index: {}]   ;;  %s6261_s9 = inlined_call_operand.vmem [shape: f32[11,2], index: 9, kind: output, shape index: {}]  }
   0x1   :  { %v14_v0 = vstv %s6260_s8 }
   0x2   :  { %15 = vst [vmem:[#allocation3] sm:$0x1] %v14_v0 }
   0x3   :  { %16 = vsyncpa [#allocation5], 0 }
   0x4   :  { %17 = vsyncpa [#allocation7], 0 }
   0x5   :  { %18 = vsyncpa [#allocation10], 0  ;;  %s5253_s11 = smov [#allocation6]   ;;  %s5159_s15 = scalar_lea.hbm %s6255_s3, 2048 }
   0x6   :  { %s40_s12 = sshll.u32 %s5253_s11, 4  ;;  %p5160_p0 = scmp.ne.s32.totalorder %s6255_s3, %s5159_s15  ;;  %s41_s12 = int_to_ptr.vmem [resolvable:$true] %s40_s12 }
   0x7   :  { %p5163_p1 = scmp.lt.u32.totalorder %s5159_s15, %s6255_s3 }
   0x9   :  { %p5165_p2 = pnand %p5163_p1, %p5160_p0 }
   0xb   :  { %5168 = shalt.err (!%p5165_p2)
}
   0xc   :  { %s5169_s8 = scalar_lea.vmem %s41_s12, 2048  ;;  %p5174_p4 = scmp.lt.s32.totalorder %s41_s12, %s41_s12 }
   0xd   :  { %p5170_p3 = scmp.ne.s32.totalorder %s41_s12, %s5169_s8  ;;  %p5175_p5 = scmp.lt.s32.totalorder %s5169_s8, %s5169_s8 }
   0xf   :  { %p5176_p6 = por %p5175_p5, %p5174_p4 }
  0x11   :  { %p5177_p7 = pnand %p5176_p6, %p5170_p3 }
  0x13   :  { %5180 = shalt.err (!%p5177_p7)
}
  0x14   :  { %s5254_s20 = smov 256   ;;  %s5255_s21 = smov 16  }
  0x15   :  { %46 = dma.hbm_to_vmem [thread:$0]  %s6255_s3, 2048, %s41_s12, [#allocation7], %s5254_s20, %s5254_s20, %s5255_s21  }
  0x16   :  { %s5256_s24 = smov [#allocation4]   ;;  %s5181_s28 = scalar_lea.hbm %s6252_s0, 512 }
  0x17   :  { %s24_s25 = sshll.u32 %s5256_s24, 4  ;;  %p5182_p8 = scmp.ne.s32.totalorder %s6252_s0, %s5181_s28  ;;  %s25_s25 = int_to_ptr.vmem [resolvable:$true] %s24_s25 }
  0x18   :  { %p5185_p9 = scmp.lt.u32.totalorder %s5181_s28, %s6252_s0 }
  0x1a   :  { %p5187_p10 = pnand %p5185_p9, %p5182_p8 }
  0x1c   :  { %5190 = shalt.err (!%p5187_p10)
}
  0x1d   :  { %s5191_s13 = scalar_lea.vmem %s25_s25, 512  ;;  %p5196_p12 = scmp.lt.s32.totalorder %s25_s25, %s25_s25 }
  0x1e   :  { %p5192_p11 = scmp.ne.s32.totalorder %s25_s25, %s5191_s13  ;;  %p5197_p13 = scmp.lt.s32.totalorder %s5191_s13, %s5191_s13 }
  0x20   :  { %p5198_p0 = por %p5197_p13, %p5196_p12 }
  0x22   :  { %p5199_p1 = pnand %p5198_p0, %p5192_p11 }
  0x24   :  { %5202 = shalt.err (!%p5199_p1)
}
  0x25   :  { %s5257_s3 = smov 64   ;;  %s5258_s12 = smov 4  }
  0x26   :  { %30 = dma.hbm_to_vmem [thread:$0]  %s6252_s0, 512, %s25_s25, [#allocation5], %s5257_s3, %s5257_s3, %s5258_s12  }
  0x27   :  { %s5259_s16 = smov [#allocation8]   ;;  %s5260_s18 = smov [#allocation9]  }
  0x28   :  { %s52_s17 = sshll.u32 %s5259_s16, 4  ;;  %s66_s19 = sshll.u32 %s5260_s18, 4  ;;  %s53_s17 = int_to_ptr.vmem [resolvable:$true] %s52_s17  ;;  %s5346_s19 = int_to_ptr.vmem [resolvable:$true] %s66_s19 }
  0x29   :  { %s5203_s23 = scalar_lea.hbm %s6256_s4, 2048 }
  0x2a   :  { %p5204_p2 = scmp.ne.s32.totalorder %s6256_s4, %s5203_s23  ;;  %p5207_p3 = scmp.lt.u32.totalorder %s5203_s23, %s6256_s4 }
  0x2c   :  { %p5209_p4 = pnand %p5207_p3, %p5204_p2 }
  0x2e   :  { %5212 = shalt.err (!%p5209_p4)
}
  0x2f   :  { %s5213_s0 = scalar_lea.vmem %s53_s17, 2048  ;;  %p5218_p6 = scmp.lt.s32.totalorder %s53_s17, %s53_s17 }
  0x30   :  { %p5214_p5 = scmp.ne.s32.totalorder %s53_s17, %s5213_s0  ;;  %p5219_p7 = scmp.lt.s32.totalorder %s5213_s0, %s5213_s0 }
  0x32   :  { %p5220_p8 = por %p5219_p7, %p5218_p6 }
  0x34   :  { %p5221_p9 = pnand %p5220_p8, %p5214_p5 }
  0x36   :  { %5224 = shalt.err (!%p5221_p9)
}
  0x37   :  { %58 = dma.hbm_to_vmem [thread:$0]  %s6256_s4, 2048, %s53_s17, [#allocation7], %s5254_s20, %s5254_s20, %s5255_s21  }
  0x38   :  { %s5225_s11 = scalar_lea.hbm %s6258_s6, 2048 }
  0x39   :  { %p5226_p10 = scmp.ne.s32.totalorder %s6258_s6, %s5225_s11  ;;  %p5229_p11 = scmp.lt.u32.totalorder %s5225_s11, %s6258_s6 }
  0x3b   :  { %p5231_p12 = pnand %p5229_p11, %p5226_p10 }
  0x3d   :  { %5234 = shalt.err (!%p5231_p12)
}
  0x3e   :  { %s5235_s16 = scalar_lea.vmem %s5346_s19, 2048  ;;  %p5240_p0 = scmp.lt.s32.totalorder %s5346_s19, %s5346_s19 }
  0x3f   :  { %p5236_p13 = scmp.ne.s32.totalorder %s5346_s19, %s5235_s16  ;;  %p5241_p1 = scmp.lt.s32.totalorder %s5235_s16, %s5235_s16 }
  0x41   :  { %p5242_p2 = por %p5241_p1, %p5240_p0 }
  0x43   :  { %p5243_p3 = pnand %p5242_p2, %p5236_p13 }
  0x45   :  { %5246 = shalt.err (!%p5243_p3)
}
  0x46   :  { %72 = dma.hbm_to_vmem [thread:$0]  %s6258_s6, 2048, %s5346_s19, [#allocation10], %s5254_s20, %s5254_s20, %s5255_s21  }
  0x47   :  { %5247 = dma.done.wait [#allocation5], 512  }
  0x48   :  { %5248 = vsyncadd [#allocation5], 4294966784 }
  0x49   :  { %5249 = dma.done.wait [#allocation7], 4096  }
  0x4a   :  { %5250 = vsyncadd [#allocation7], 4294963200 }
  0x4b   :  { %5251 = dma.done.wait [#allocation10], 2048  }
  0x4c   :  { %5252 = vsyncadd [#allocation10], 4294965248  ;;  %v5261_v1 = vmov 0.0   ;;  %v90_v2 = vld [vmem:[#allocation6 + $0x8] sm:$0xff]  ;;  %v92_v3 = vld [vmem:[#allocation6 + $0x18] sm:$0xff]  ;;  %v274_v26 = vlaneseq  ;;  %vm105_vm0 = vcmask 523264  }
  0x4d   :  { %173 = vmatprep.mubr.f32.mxu0 %v5261_v1  ;;  %260 = vmatprep.mubr.f32.mxu1 %v5261_v1  ;;  %v89_v4 = vld [vmem:[#allocation6] sm:$0xff]  ;;  %v5385_v5 = vpack.c.bf16 %v92_v3, %v90_v2  ;;  %v91_v6 = vld [vmem:[#allocation6 + $0x10] sm:$0xff]  ;;  %v94_v7 = vld [vmem:[#allocation6 + $0x28] sm:$0xff]  ;;  %v5262_v30 = vmov 1983009808   ;;  %vm442_vm1 = vcmask 517120  }
  0x4e   :  { %v96_v8 = vld [vmem:[#allocation6 + $0x38] sm:$0xff]  ;;  %v5387_v9 = vpack.c.bf16 %v91_v6, %v89_v4  ;;  %v93_v11 = vld [vmem:[#allocation6 + $0x20] sm:$0xff]  ;;  %v95_v12 = vld [vmem:[#allocation6 + $0x30] sm:$0xff]  ;;  %v5419_v27 = vshrl.u32 %v274_v26, 7  ;;  %v4215_v28 = vand.u32 127, %v274_v26  ;;  %v272_v31 = vunpack.c.l.s4 %v5262_v30 }
  0x4f   :  { %v5389_v10 = vpack.c.bf16 %v96_v8, %v94_v7  ;;  %v98_v13 = vld [vmem:[#allocation6 + $0x48] sm:$0xff]  ;;  %4365 = vmatprep.subr.bf16.mxu0 %v5385_v5  ;;  %v100_v14 = vld [vmem:[#allocation6 + $0x58] sm:$0xff]  ;;  %v5393_v15 = vpack.c.bf16 %v95_v12, %v93_v11  ;;  %v97_v17 = vld [vmem:[#allocation6 + $0x40] sm:$0xff]  ;;  %vm4260_vm2 = vcmask 1041409   ;;  %vm4262_vm3 = vcmask 1042434  }
  0x50   :  { %4367 = vmatpush1.bf16.msra.mxu0 %v5387_v9  ;;  %v5396_v16 = vpack.c.bf16 %v100_v14, %v98_v13  ;;  %v99_v18 = vld [vmem:[#allocation6 + $0x50] sm:$0xff]  ;;  %v102_v19 = vld [vmem:[#allocation6 + $0x68] sm:$0xff]  ;;  %v104_v20 = vld [vmem:[#allocation6 + $0x78] sm:$0xff]  ;;  %v5422_v29 = vsub.s32 %v4215_v28, %v5419_v27  ;;  %v273_v32 = vunpack.c.0.s8 %v272_v31  ;;  %vm4264_vm4 = vcmask 1043459  }
  0x51   :  { %4369 = vmatprep.subr.bf16.mxu0 %v5389_v10  ;;  %v5399_v21 = vpack.c.bf16 %v99_v18, %v97_v17  ;;  %v5402_v22 = vpack.c.bf16 %v104_v20, %v102_v19  ;;  %v101_v23 = vld [vmem:[#allocation6 + $0x60] sm:$0xff]  ;;  %v103_v24 = vld [vmem:[#allocation6 + $0x70] sm:$0xff]  ;;  %v181_v48 = vld [vmem:[#allocation9 + $0x8] sm:$0xff]  ;;  %vm4266_vm5 = vcmask 1044484   ;;  %vm4268_vm6 = vcmask 1045509  }
  0x52   :  { %v5405_v25 = vpack.c.bf16 %v103_v24, %v101_v23  ;;  %v5425_v34 = vsub.s32 %v273_v32, %v5419_v27  ;;  %v267_v37 = vld [vmem:[#allocation4] sm:$0xf]  ;;  %v183_v49 = vld [vmem:[#allocation9 + $0x18] sm:$0xff]  ;;  %v182_v52 = vld [vmem:[#allocation9 + $0x10] sm:$0xff]  ;;  %vm4270_vm7 = vcmask 1046534   ;;  %vm4272_vm8 = vcmask 1047559  }
  0x53   :  { %v180_v50 = vld [vmem:[#allocation9] sm:$0xff]  ;;  %v5433_v51 = vpack.c.bf16 %v183_v49, %v181_v48  ;;  %v185_v53 = vld [vmem:[#allocation9 + $0x28] sm:$0xff]  ;;  %v187_v54 = vld [vmem:[#allocation9 + $0x38] sm:$0xff]  ;;  %vm4278_vm9 = vcmask 15360   ;;  %vm4280_vm10 = vcmask 10240  }
  0x54   :  { %4371 = vmatpush1.bf16.msra.mxu0 %v5393_v15  ;;  %v5435_v55 = vpack.c.bf16 %v182_v52, %v180_v50  ;;  %v5437_v56 = vpack.c.bf16 %v187_v54, %v185_v53  ;;  %v184_v57 = vld [vmem:[#allocation9 + $0x20] sm:$0xff]  ;;  %v186_v58 = vld [vmem:[#allocation9 + $0x30] sm:$0xff]  ;;  %v189_v59 = vld [vmem:[#allocation9 + $0x48] sm:$0xff]  ;;  %v5515_v53 = vsub.s32 1, %v5419_v27 }
  0x55   :  { %4373 = vmatprep.subr.bf16.mxu0 %v5396_v16  ;;  %4381 = vmatprep.subr.bf16.mxu1 %v5433_v51  ;;  %v191_v60 = vld [vmem:[#allocation9 + $0x58] sm:$0xff]  ;;  %v5442_v61 = vpack.c.bf16 %v186_v58, %v184_v57  ;;  %v188_v63 = vld [vmem:[#allocation9 + $0x40] sm:$0xff]  ;;  %v190_v0 = vld [vmem:[#allocation9 + $0x50] sm:$0xff] }
  0x56   :  { %4383 = vmatpush1.bf16.msra.mxu1 %v5435_v55  ;;  %v5445_v62 = vpack.c.bf16 %v191_v60, %v189_v59  ;;  %v193_v2 = vld [vmem:[#allocation9 + $0x68] sm:$0xff]  ;;  %v195_v3 = vld [vmem:[#allocation9 + $0x78] sm:$0xff]  ;;  %v5448_v4 = vpack.c.bf16 %v190_v0, %v188_v63  ;;  %v192_v7 = vld [vmem:[#allocation9 + $0x60] sm:$0xff] }
  0x57   :  { %4385 = vmatprep.subr.bf16.mxu1 %v5437_v56  ;;  %v5451_v6 = vpack.c.bf16 %v195_v3, %v193_v2  ;;  %v194_v8 = vld [vmem:[#allocation9 + $0x70] sm:$0xff]  ;;  %v309_v11 = vld [vmem:[#allocation8 + $0x8] sm:$0xff]  ;;  %v311_v12 = vld [vmem:[#allocation8 + $0x18] sm:$0xff] }
  0x58   :  { %4375 = vmatpush1.bf16.msra.mxu0 %v5399_v21  ;;  %v5454_v13 = vpack.c.bf16 %v194_v8, %v192_v7  ;;  %v5457_v14 = vpack.c.bf16 %v311_v12, %v309_v11  ;;  %v308_v17 = vld [vmem:[#allocation8] sm:$0xff]  ;;  %v310_v18 = vld [vmem:[#allocation8 + $0x10] sm:$0xff]  ;;  %v313_v19 = vld [vmem:[#allocation8 + $0x28] sm:$0xff] }
  0x59   :  { %4377 = vmatprep.subr.bf16.mxu0 %v5402_v22  ;;  %v315_v20 = vld [vmem:[#allocation8 + $0x38] sm:$0xff]  ;;  %v5460_v23 = vpack.c.bf16 %v310_v18, %v308_v17  ;;  %v312_v26 = vld [vmem:[#allocation8 + $0x20] sm:$0xff]  ;;  %v314_v28 = vld [vmem:[#allocation8 + $0x30] sm:$0xff] }
  0x5a   :  { %4387 = vmatpush1.bf16.msra.mxu1 %v5442_v61  ;;  %v5463_v24 = vpack.c.bf16 %v315_v20, %v313_v19  ;;  %v317_v30 = vld [vmem:[#allocation8 + $0x48] sm:$0xff]  ;;  %v319_v31 = vld [vmem:[#allocation8 + $0x58] sm:$0xff]  ;;  %v5467_v32 = vpack.c.bf16 %v314_v28, %v312_v26  ;;  %v622_v8 = vld [vmem:[#allocation4 + $0x4] sm:$0xf] }
  0x5b   :  { %4389 = vmatprep.subr.bf16.mxu1 %v5445_v62  ;;  %v398_v54 = vld [vmem:[%s6257_s5] sm:$0x3] }
  0x5c   :  { %4379 = vmatpush1.bf16.msra.mxu0 %v5405_v25  ;;  %v407_v58 = vrot.slane %v398_v54, %v5515_v53 }
  0x5d   :  { %4413 = vmatprep.subr.bf16.mxu0 %v5385_v5 }
  0x5e   :  { %4391 = vmatpush1.bf16.msra.mxu1 %v5448_v4 }
  0x5f   :  { %174 = vmatmul.mubr.f32.vlgmr.msra.gmra.mrb[0].mxu0 %v5261_v1  ;;  %4393 = vmatprep.subr.bf16.mxu1 %v5451_v6 }
  0x60   :  { %4415 = vmatpush1.bf16.msra.mxu0 %v5387_v9  ;;  %524 = vmatprep.mubr.f32.mxu0 %v5261_v1 }
  0x61   :  { %4417 = vmatprep.subr.bf16.mxu0 %v5389_v10 }
  0x62   :  { %4395 = vmatpush1.bf16.msra.mxu1 %v5454_v13 }
  0x63   :  { %4397 = vmatprep.subr.bf16.mxu1 %v5457_v14 }
  0x64   :  { %4419 = vmatpush1.bf16.msra.mxu0 %v5393_v15 }
  0x65   :  { %4421 = vmatprep.subr.bf16.mxu0 %v5396_v16  ;;  %261 = vmatmul.mubr.f32.vlgmr.msra.gmra.mrb[0].mxu1 %v5261_v1 }
  0x66   :  { %4399 = vmatpush1.bf16.msra.mxu1 %v5460_v23  ;;  %391 = vmatprep.mubr.f32.mxu1 %v5261_v1 }
  0x67   :  { %4401 = vmatprep.subr.bf16.mxu1 %v5463_v24 }
  0x68   :  { %4423 = vmatpush1.bf16.msra.mxu0 %v5399_v21 }
  0x69   :  { %4425 = vmatprep.subr.bf16.mxu0 %v5402_v22 }
  0x6a   :  { %4403 = vmatpush1.bf16.msra.mxu1 %v5467_v32 }
  0x6c   :  { %4427 = vmatpush1.bf16.msra.mxu0 %v5405_v25 }
  0x6d   :  { %4429 = vmatprep.subr.bf16.mxu0 %v5433_v51 }
 0x132   :  { %v175_v33 = vpop.f32.mrb[0].mxu0 }
 0x133   :  { %v177_v35 = vpop.f32.mrb[1].mxu0 }
 0x134   :  { %v270_v36 = vcombine.low %v175_v33, %v177_v35  ;;  %v5471_v33 = vpack.c.bf16 %v319_v31, %v317_v30  ;;  %v316_v35 = vld [vmem:[#allocation8 + $0x40] sm:$0xff] }
 0x136   :  { %v277_v38 = vrot.slane %v270_v36, %v5425_v34  ;;  %v318_v36 = vld [vmem:[#allocation8 + $0x50] sm:$0xff]  ;;  %4405 = vmatprep.subr.bf16.mxu1 %v5471_v33 }
 0x138   :  { %v279_v39 = vadd.f32 %v277_v38, %v267_v37  ;;  %v321_v37 = vld [vmem:[#allocation8 + $0x68] sm:$0xff]  ;;  %v323_v38 = vld [vmem:[#allocation8 + $0x78] sm:$0xff] }
 0x13a   :  { %287 = vrot.lane.b32.xlu0 %v279_v39, %s5257_s3  ;;  %v4289_v40 = vmul.f32 -1.442695, %v279_v39  ;;  %v5474_v39 = vpack.c.bf16 %v318_v36, %v316_v35 }
 0x13c   :  { %4927 = vpow2.f32 %v4289_v40  ;;  %v5477_v40 = vpack.c.bf16 %v323_v38, %v321_v37  ;;  %4407 = vmatpush1.bf16.msra.mxu1 %v5474_v39 }
 0x13e   :  { %4409 = vmatprep.subr.bf16.mxu1 %v5477_v40 }
 0x146   :  { %v4928_v41 = vpop.eup %4927 }
 0x147   :  { %v283_v42 = vadd.f32 1.0, %v4928_v41  ;;  %v320_v41 = vld [vmem:[#allocation8 + $0x60] sm:$0xff] }
 0x149   :  { %4929 = vrcp.f32 %v283_v42  ;;  %v322_v42 = vld [vmem:[#allocation8 + $0x70] sm:$0xff] }
 0x153   :  { %v5429_v45 = vpop.eup %4929 }
 0x154   :  { %v301_v49 = vrot.slane %v5429_v45, 2 }
 0x1ac   :  { %v288_v43 = vpop.permute.xlu0 %287 }
 0x1ad   :  { %v289_v44 = vrot.slane %v288_v43, 2  ;;  %v5480_v43 = vpack.c.bf16 %v322_v42, %v320_v41 }
 0x1af   :  { %4931 = vtanh.f32 %v289_v44  ;;  %4411 = vmatpush1.bf16.msra.mxu1 %v5480_v43  ;;  %v292_v44 = vmul.f32 0.0, %v5429_v45 }
 0x1b0   :  { %4461 = vmatprep.subr.bf16.mxu1 %v5385_v5 }
 0x1b9   :  { %v4932_v46 = vpop.eup %4931 }
 0x1ba   :  { %v293_v47 = vmul.f32 %v4932_v46, %v5429_v45  ;;  %v5512_v45 = vsub.s32 0, %v5419_v27 }
 0x1bc   :  { %295 = vrot.lane.b32.xlu0 %v293_v47, %s5257_s3  ;;  %v403_v57 = vrot.slane %v398_v54, %v5512_v45 }
 0x22e   :  { %v296_v46 = vpop.permute.xlu0 %295 }
 0x22f   :  { %v5486_v47 = vadd.f32 %v296_v46, %v292_v44 }
 0x231   :  { %4933 = vtanh.f32 %v5486_v47 }
 0x23b   :  { %v4934_v48 = vpop.eup %4933 }
 0x23c   :  { %304 = vrot.lane.b32.xlu1 %v4934_v48, %s5257_s3 }
 0x2ae   :  { %v305_v50 = vpop.permute.xlu1 %304 }
 0x2af   :  { %v307_v52 = vmul.f32 %v305_v50, %v301_v49 }
 0x2b1   :  { %4290 = vmatmul.mubr.msk.f32.vlgmr.msra.gmra.mrb[0].mxu1 %vm105_vm0, %v307_v52  ;;  %4293 = vmatmul.mubr.msk.f32.vlgmr.msra.gmra.mrb[2].mxu0 %vm105_vm0, %v307_v52 }
 0x2b2   :  { %4431 = vmatpush1.bf16.msra.mxu0 %v5435_v55  ;;  %4463 = vmatpush1.bf16.msra.mxu1 %v5387_v9 }
 0x2b3   :  { %4433 = vmatprep.subr.bf16.mxu0 %v5437_v56  ;;  %4465 = vmatprep.subr.bf16.mxu1 %v5389_v10 }
 0x2b4   :  { %614 = vmatprep.mubr.f32.mxu0 %v5261_v1  ;;  %879 = vmatprep.mubr.f32.mxu1 %v5261_v1 }
 0x2b6   :  { %4435 = vmatpush1.bf16.msra.mxu0 %v5442_v61  ;;  %4467 = vmatpush1.bf16.msra.mxu1 %v5393_v15 }
 0x2b7   :  { %4437 = vmatprep.subr.bf16.mxu0 %v5445_v62  ;;  %4469 = vmatprep.subr.bf16.mxu1 %v5396_v16 }
 0x2ba   :  { %4439 = vmatpush1.bf16.msra.mxu0 %v5448_v4  ;;  %4471 = vmatpush1.bf16.msra.mxu1 %v5399_v21 }
 0x2bb   :  { %4441 = vmatprep.subr.bf16.mxu0 %v5451_v6  ;;  %4473 = vmatprep.subr.bf16.mxu1 %v5402_v22 }
 0x2be   :  { %4443 = vmatpush1.bf16.msra.mxu0 %v5454_v13  ;;  %4475 = vmatpush1.bf16.msra.mxu1 %v5405_v25 }
 0x2bf   :  { %4445 = vmatprep.subr.bf16.mxu0 %v5457_v14  ;;  %4477 = vmatprep.subr.bf16.mxu1 %v5433_v51 }
 0x384   :  { %v393_v59 = vpop.f32.mrb[0].mxu1  ;;  %v526_v60 = vpop.f32.mrb[2].mxu0 }
 0x385   :  { %v410_v63 = vadd.f32 %v403_v57, %v393_v59  ;;  %v395_v0 = vpop.f32.mrb[1].mxu1  ;;  %v528_v2 = vpop.f32.mrb[3].mxu0 }
 0x386   :  { %v411_v3 = vadd.f32 %v407_v58, %v395_v0  ;;  %v625_v7 = vcombine.low %v526_v60, %v528_v2 }
 0x387   :  { %v4291_v17 = vmul.f32 -1.442695, %v410_v63 }
 0x388   :  { %4935 = vtanh.f32 %v411_v3  ;;  %v632_v27 = vrot.slane %v625_v7, %v5425_v34  ;;  %v4292_v58 = vmul.f32 -1.442695, %v411_v3 }
 0x389   :  { %4937 = vpow2.f32 %v4291_v17 }
 0x38a   :  { %v634_v11 = vadd.f32 %v632_v27, %v622_v8 }
 0x38c   :  { %642 = vrot.lane.b32.xlu0 %v634_v11, %s5257_s3  ;;  %v4295_v18 = vmul.f32 -1.442695, %v634_v11 }
 0x38e   :  { %4939 = vpow2.f32 %v4295_v18 }
 0x392   :  { %v4936_v12 = vpop.eup %4935 }
 0x393   :  { %427 = vrot.lane.b32.xlu1 %v4936_v12, %s5257_s3  ;;  %v4938_v19 = vpop.eup %4937 }
 0x394   :  { %v418_v20 = vadd.f32 1.0, %v4938_v19 }
 0x396   :  { %4941 = vrcp.f32 %v418_v20 }
 0x398   :  { %v4940_v26 = vpop.eup %4939 }
 0x399   :  { %v638_v28 = vadd.f32 1.0, %v4940_v26 }
 0x39b   :  { %4943 = vrcp.f32 %v638_v28 }
 0x3a0   :  { %v4942_v35 = vpop.eup %4941 }
 0x3a1   :  { %v425_v44 = vmul.f32 0.0, %v4942_v35 }
 0x3a5   :  { %v4944_v38 = vpop.eup %4943 }
 0x3a6   :  { %v647_v49 = vmul.f32 %v4944_v38, %v5486_v47  ;;  %v656_v2 = vrot.slane %v4944_v38, 2 }
 0x3fe   :  { %v643_v30 = vpop.permute.xlu0 %642 }
 0x3ff   :  { %v644_v31 = vrot.slane %v643_v30, 2 }
 0x401   :  { %4945 = vtanh.f32 %v644_v31 }
 0x405   :  { %v428_v36 = vpop.permute.xlu1 %427 }
 0x406   :  { %v430_v37 = vmul.f32 %v4942_v35, %v428_v36 }
 0x408   :  { %432 = vrot.lane.b32.xlu1 %v430_v37, %s5257_s3 }
 0x40b   :  { %v4946_v41 = vpop.eup %4945 }
 0x40c   :  { %v648_v42 = vmul.f32 %v4946_v41, %v4944_v38 }
 0x40e   :  { %650 = vrot.lane.b32.xlu0 %v648_v42, %s5257_s3 }
 0x47a   :  { %v433_v46 = vpop.permute.xlu1 %432 }
 0x47b   :  { %v5527_v48 = vadd.f32 %v433_v46, %v425_v44 }
 0x47d   :  { %4947 = vtanh.f32 %v5527_v48 }
 0x480   :  { %v651_v50 = vpop.permute.xlu0 %650 }
 0x481   :  { %v5531_v52 = vadd.f32 %v651_v50, %v647_v49 }
 0x483   :  { %4949 = vtanh.f32 %v5531_v52 }
 0x484   :  { %4951 = vpow2.f32 %v4292_v58 }
 0x487   :  { %v4948_v54 = vpop.eup %4947 }
 0x488   :  { %438 = vrot.lane.b32.xlu1 %v4948_v54, %s5257_s3 }
 0x48d   :  { %v4950_v57 = vpop.eup %4949 }
 0x48e   :  { %659 = vrot.lane.b32.xlu0 %v4950_v57, %s5257_s3  ;;  %v4952_v59 = vpop.eup %4951 }
 0x48f   :  { %v419_v60 = vadd.f32 1.0, %v4952_v59 }
 0x491   :  { %4953 = vrcp.f32 %v419_v60 }
 0x49b   :  { %v4954_v63 = vpop.eup %4953 }
 0x4fa   :  { %v439_v0 = vpop.permute.xlu1 %438 }
 0x4fb   :  { %v441_v47 = vmul.f32 %v4954_v63, %v439_v0 }
 0x4fd   :  { %443 = vst.msk [vmem:[#allocation2] sm:$0x3] %vm442_vm1, %v441_v47  ;;  %4294 = vmatmul.mubr.msk.f32.vlgmr.msra.gmra.mrb[4].mxu0 %vm105_vm0, %v441_v47 }
 0x4fe   :  { %4447 = vmatpush1.bf16.msra.mxu0 %v5460_v23  ;;  %746 = vmatprep.mubr.f32.mxu0 %v5261_v1 }
 0x4ff   :  { %4449 = vmatprep.subr.bf16.mxu0 %v5463_v24 }
 0x500   :  { %v660_v3 = vpop.permute.xlu0 %659 }
 0x501   :  { %v662_v7 = vmul.f32 %v660_v3, %v656_v2 }
 0x502   :  { %4451 = vmatpush1.bf16.msra.mxu0 %v5467_v32 }
 0x503   :  { %4299 = vmatmul.mubr.msk.f32.vlgmr.msra.gmra.mrb[2].mxu1 %vm105_vm0, %v662_v7  ;;  %4453 = vmatprep.subr.bf16.mxu0 %v5471_v33 }
 0x504   :  { %4479 = vmatpush1.bf16.msra.mxu1 %v5435_v55  ;;  %969 = vmatprep.mubr.f32.mxu1 %v5261_v1 }
 0x505   :  { %4481 = vmatprep.subr.bf16.mxu1 %v5437_v56 }
 0x506   :  { %4455 = vmatpush1.bf16.msra.mxu0 %v5474_v39 }
 0x507   :  { %4457 = vmatprep.subr.bf16.mxu0 %v5477_v40 }
 0x508   :  { %4483 = vmatpush1.bf16.msra.mxu1 %v5442_v61 }
 0x509   :  { %4485 = vmatprep.subr.bf16.mxu1 %v5445_v62 }
 0x50a   :  { %4459 = vmatpush1.bf16.msra.mxu0 %v5480_v43 }
 0x50b   :  { %4509 = vmatprep.subr.bf16.mxu0 %v5385_v5 }
 0x50c   :  { %4487 = vmatpush1.bf16.msra.mxu1 %v5448_v4 }
 0x50d   :  { %4296 = vmatmul.mubr.msk.f32.vlgmr.msra.gmra.mrb[4].mxu0 %vm105_vm0, %v662_v7  ;;  %4489 = vmatprep.subr.bf16.mxu1 %v5451_v6 }
 0x50e   :  { %4511 = vmatpush1.bf16.msra.mxu0 %v5387_v9  ;;  %1234 = vmatprep.mubr.f32.mxu0 %v5261_v1 }
 0x50f   :  { %4513 = vmatprep.subr.bf16.mxu0 %v5389_v10  ;;  %v977_v10 = vld [vmem:[#allocation4 + $0x8] sm:$0xf] }
 0x510   :  { %4491 = vmatpush1.bf16.msra.mxu1 %v5454_v13 }
 0x511   :  { %4493 = vmatprep.subr.bf16.mxu1 %v5457_v14 }
 0x512   :  { %4515 = vmatpush1.bf16.msra.mxu0 %v5393_v15  ;;  %v753_v15 = vld [vmem:[%s6257_s5] sm:$0x3] }
 0x513   :  { %4517 = vmatprep.subr.bf16.mxu0 %v5396_v16  ;;  %v758_v16 = vrot.slane %v753_v15, %v5512_v45 }
 0x516   :  { %4519 = vmatpush1.bf16.msra.mxu0 %v5399_v21  ;;  %v762_v21 = vrot.slane %v753_v15, %v5515_v53 }
 0x517   :  { %4521 = vmatprep.subr.bf16.mxu0 %v5402_v22 }
 0x51a   :  { %4523 = vmatpush1.bf16.msra.mxu0 %v5405_v25 }
 0x51b   :  { %4525 = vmatprep.subr.bf16.mxu0 %v5433_v51 }
 0x5d6   :  { %v881_v5 = vpop.f32.mrb[2].mxu1 }
 0x5d7   :  { %v883_v9 = vpop.f32.mrb[3].mxu1 }
 0x5d8   :  { %v980_v8 = vcombine.low %v881_v5, %v883_v9 }
 0x5da   :  { %v987_v27 = vrot.slane %v980_v8, %v5425_v34 }
 0x5dc   :  { %v989_v11 = vadd.f32 %v987_v27, %v977_v10 }
 0x5de   :  { %997 = vrot.lane.b32.xlu0 %v989_v11, %s5257_s3  ;;  %v4301_v18 = vmul.f32 -1.442695, %v989_v11 }
 0x5e0   :  { %v748_v22 = vpop.f32.mrb[4].mxu0 }
 0x5e1   :  { %v765_v25 = vadd.f32 %v758_v16, %v748_v22  ;;  %v750_v51 = vpop.f32.mrb[5].mxu0 }
 0x5e2   :  { %v766_v12 = vadd.f32 %v762_v21, %v750_v51 }
 0x5e3   :  { %v4297_v19 = vmul.f32 -1.442695, %v765_v25 }
 0x5e4   :  { %4955 = vtanh.f32 %v766_v12  ;;  %v4298_v63 = vmul.f32 -1.442695, %v766_v12 }
 0x5e5   :  { %4957 = vpow2.f32 %v4301_v18 }
 0x5e6   :  { %4959 = vpow2.f32 %v4297_v19 }
 0x5ee   :  { %v4956_v17 = vpop.eup %4955 }
 0x5ef   :  { %782 = vrot.lane.b32.xlu1 %v4956_v17, %s5257_s3  ;;  %v4958_v20 = vpop.eup %4957 }
 0x5f0   :  { %v993_v26 = vadd.f32 1.0, %v4958_v20  ;;  %v4960_v28 = vpop.eup %4959 }
 0x5f1   :  { %v773_v35 = vadd.f32 1.0, %v4960_v28 }
 0x5f2   :  { %4961 = vrcp.f32 %v993_v26 }
 0x5fc   :  { %v4962_v36 = vpop.eup %4961 }
 0x5fd   :  { %v1002_v46 = vmul.f32 %v4962_v36, %v5531_v52  ;;  %v1011_v47 = vrot.slane %v4962_v36, 2 }
 0x650   :  { %v998_v30 = vpop.permute.xlu0 %997 }
 0x651   :  { %v999_v31 = vrot.slane %v998_v30, 2 }
 0x653   :  { %4963 = vtanh.f32 %v999_v31 }
 0x654   :  { %4965 = vrcp.f32 %v773_v35  ;;  %v1510_v35 = vld [vmem:[#allocation6 + $0x8] sm:$0xff] }
 0x65d   :  { %v4964_v37 = vpop.eup %4963 }
 0x65e   :  { %v1003_v38 = vmul.f32 %v4964_v37, %v4962_v36  ;;  %v4966_v41 = vpop.eup %4965  ;;  %v1512_v36 = vld [vmem:[#allocation6 + $0x18] sm:$0xff]  ;;  %v1509_v37 = vld [vmem:[#allocation6] sm:$0xff] }
 0x65f   :  { %v780_v54 = vmul.f32 %v4966_v41, %v5527_v48 }
 0x660   :  { %1005 = vrot.lane.b32.xlu0 %v1003_v38, %s5257_s3  ;;  %v5622_v38 = vpack.c.bf16 %v1512_v36, %v1510_v35 }
 0x661   :  { %v783_v42 = vpop.permute.xlu1 %782 }
 0x662   :  { %v785_v44 = vmul.f32 %v4966_v41, %v783_v42  ;;  %v1511_v41 = vld [vmem:[#allocation6 + $0x10] sm:$0xff]  ;;  %v1514_v42 = vld [vmem:[#allocation6 + $0x28] sm:$0xff] }
 0x664   :  { %787 = vrot.lane.b32.xlu1 %v785_v44, %s5257_s3  ;;  %v1516_v44 = vld [vmem:[#allocation6 + $0x38] sm:$0xff] }
 0x6d2   :  { %v1006_v49 = vpop.permute.xlu0 %1005 }
 0x6d3   :  { %v5578_v50 = vadd.f32 %v1006_v49, %v1002_v46  ;;  %v5624_v46 = vpack.c.bf16 %v1511_v41, %v1509_v37  ;;  %v5626_v49 = vpack.c.bf16 %v1516_v44, %v1514_v42 }
 0x6d5   :  { %4967 = vtanh.f32 %v5578_v50 }
 0x6d6   :  { %v788_v57 = vpop.permute.xlu1 %787 }
 0x6d7   :  { %v5582_v58 = vadd.f32 %v788_v57, %v780_v54  ;;  %v1513_v54 = vld [vmem:[#allocation6 + $0x20] sm:$0xff]  ;;  %v1515_v57 = vld [vmem:[#allocation6 + $0x30] sm:$0xff] }
 0x6d9   :  { %4969 = vtanh.f32 %v5582_v58 }
 0x6da   :  { %4971 = vpow2.f32 %v4298_v63  ;;  %v5630_v63 = vpack.c.bf16 %v1515_v57, %v1513_v54 }
 0x6df   :  { %v4968_v59 = vpop.eup %4967 }
 0x6e0   :  { %1014 = vrot.lane.b32.xlu0 %v4968_v59, %s5257_s3  ;;  %v1518_v59 = vld [vmem:[#allocation6 + $0x48] sm:$0xff] }
 0x6e3   :  { %v4970_v60 = vpop.eup %4969 }
 0x6e4   :  { %793 = vrot.lane.b32.xlu1 %v4970_v60, %s5257_s3  ;;  %v4972_v52 = vpop.eup %4971  ;;  %v1520_v60 = vld [vmem:[#allocation6 + $0x58] sm:$0xff] }
 0x6e5   :  { %v774_v0 = vadd.f32 1.0, %v4972_v52  ;;  %v5633_v52 = vpack.c.bf16 %v1520_v60, %v1518_v59 }
 0x6e7   :  { %4973 = vrcp.f32 %v774_v0  ;;  %v1517_v0 = vld [vmem:[#allocation6 + $0x40] sm:$0xff] }
 0x6f1   :  { %v4974_v48 = vpop.eup %4973 }
 0x752   :  { %v1015_v2 = vpop.permute.xlu0 %1014 }
 0x753   :  { %v1017_v3 = vmul.f32 %v1015_v2, %v1011_v47  ;;  %v1519_v47 = vld [vmem:[#allocation6 + $0x50] sm:$0xff]  ;;  %v1522_v2 = vld [vmem:[#allocation6 + $0x68] sm:$0xff] }
 0x755   :  { %4305 = vmatmul.mubr.msk.f32.vlgmr.msra.gmra.mrb[6].mxu0 %vm105_vm0, %v1017_v3 }
 0x756   :  { %v794_v7 = vpop.permute.xlu1 %793  ;;  %4527 = vmatpush1.bf16.msra.mxu0 %v5435_v55  ;;  %1324 = vmatprep.mubr.f32.mxu0 %v5261_v1 }
 0x757   :  { %v796_v5 = vmul.f32 %v4974_v48, %v794_v7  ;;  %4529 = vmatprep.subr.bf16.mxu0 %v5437_v56  ;;  %v5636_v48 = vpack.c.bf16 %v1519_v47, %v1517_v0 }
 0x759   :  { %798 = vst.msk [vmem:[#allocation2 + $0x2] sm:$0x3] %vm442_vm1, %v796_v5  ;;  %4300 = vmatmul.mubr.msk.f32.vlgmr.msra.gmra.mrb[4].mxu1 %vm105_vm0, %v796_v5 }
 0x75a   :  { %4495 = vmatpush1.bf16.msra.mxu1 %v5460_v23  ;;  %1101 = vmatprep.mubr.f32.mxu1 %v5261_v1 }
 0x75b   :  { %4497 = vmatprep.subr.bf16.mxu1 %v5463_v24  ;;  %4531 = vmatpush1.bf16.msra.mxu0 %v5442_v61 }
 0x75c   :  { %4533 = vmatprep.subr.bf16.mxu0 %v5445_v62  ;;  %v1332_v62 = vld [vmem:[#allocation4 + $0xc] sm:$0xf] }
 0x75e   :  { %4499 = vmatpush1.bf16.msra.mxu1 %v5467_v32 }
 0x75f   :  { %4501 = vmatprep.subr.bf16.mxu1 %v5471_v33  ;;  %4535 = vmatpush1.bf16.msra.mxu0 %v5448_v4 }
 0x760   :  { %4537 = vmatprep.subr.bf16.mxu0 %v5451_v6 }
 0x762   :  { %4503 = vmatpush1.bf16.msra.mxu1 %v5474_v39 }
 0x763   :  { %4505 = vmatprep.subr.bf16.mxu1 %v5477_v40  ;;  %4539 = vmatpush1.bf16.msra.mxu0 %v5454_v13  ;;  %v1108_v13 = vld [vmem:[%s6257_s5] sm:$0x3] }
 0x764   :  { %4541 = vmatprep.subr.bf16.mxu0 %v5457_v14  ;;  %v1113_v14 = vrot.slane %v1108_v13, %v5512_v45  ;;  %v1117_v9 = vrot.slane %v1108_v13, %v5515_v53 }
 0x766   :  { %4507 = vmatpush1.bf16.msra.mxu1 %v5480_v43 }
 0x767   :  { %4557 = vmatprep.subr.bf16.mxu1 %v5622_v38 }
 0x769   :  { %4302 = vmatmul.mubr.msk.f32.vlgmr.msra.gmra.mrb[4].mxu1 %vm105_vm0, %v1017_v3  ;;  %v1524_v3 = vld [vmem:[#allocation6 + $0x78] sm:$0xff] }
 0x76a   :  { %1589 = vmatprep.mubr.f32.mxu1 %v5261_v1  ;;  %4559 = vmatpush1.bf16.msra.mxu1 %v5624_v46  ;;  %v5639_v7 = vpack.c.bf16 %v1524_v3, %v1522_v2  ;;  %v1597_v3 = vld [vmem:[#allocation9 + $0x8] sm:$0xff] }
 0x76b   :  { %4561 = vmatprep.subr.bf16.mxu1 %v5626_v49 }
 0x76e   :  { %4563 = vmatpush1.bf16.msra.mxu1 %v5630_v63 }
 0x76f   :  { %4565 = vmatprep.subr.bf16.mxu1 %v5633_v52 }
 0x772   :  { %4567 = vmatpush1.bf16.msra.mxu1 %v5636_v48 }
 0x773   :  { %4569 = vmatprep.subr.bf16.mxu1 %v5639_v7 }
 0x828   :  { %v1236_v55 = vpop.f32.mrb[6].mxu0 }
 0x829   :  { %v1238_v56 = vpop.f32.mrb[7].mxu0 }
 0x82a   :  { %v1335_v61 = vcombine.low %v1236_v55, %v1238_v56  ;;  %v1521_v55 = vld [vmem:[#allocation6 + $0x60] sm:$0xff]  ;;  %v1523_v56 = vld [vmem:[#allocation6 + $0x70] sm:$0xff] }
 0x82c   :  { %v1342_v4 = vrot.slane %v1335_v61, %v5425_v34 }
 0x82e   :  { %v1344_v6 = vadd.f32 %v1342_v4, %v1332_v62  ;;  %v5644_v62 = vpack.c.bf16 %v1523_v56, %v1521_v55  ;;  %v1596_v55 = vld [vmem:[#allocation9] sm:$0xff] }
 0x830   :  { %1352 = vrot.lane.b32.xlu0 %v1344_v6, %s5257_s3  ;;  %v4307_v16 = vmul.f32 -1.442695, %v1344_v6  ;;  %4571 = vmatpush1.bf16.msra.mxu1 %v5644_v62 }
 0x83c   :  { %v1103_v8 = vpop.f32.mrb[4].mxu1 }
 0x83d   :  { %v1120_v10 = vadd.f32 %v1113_v14, %v1103_v8  ;;  %v1105_v27 = vpop.f32.mrb[5].mxu1 }
 0x83e   :  { %v5616_v15 = vadd.f32 %v1117_v9, %v1105_v27 }
 0x83f   :  { %v4303_v22 = vmul.f32 -1.442695, %v1120_v10 }
 0x840   :  { %4975 = vtanh.f32 %v5616_v15  ;;  %v4304_v8 = vmul.f32 -1.442695, %v5616_v15 }
 0x841   :  { %4977 = vpow2.f32 %v4307_v16 }
 0x842   :  { %4979 = vpow2.f32 %v4303_v22 }
 0x84a   :  { %v4976_v11 = vpop.eup %4975 }
 0x84b   :  { %1137 = vrot.lane.b32.xlu1 %v4976_v11, %s5257_s3  ;;  %v4978_v21 = vpop.eup %4977 }
 0x84c   :  { %v1348_v25 = vadd.f32 1.0, %v4978_v21  ;;  %v4980_v17 = vpop.eup %4979 }
 0x84d   :  { %v1128_v20 = vadd.f32 1.0, %v4980_v17 }
 0x84e   :  { %4981 = vrcp.f32 %v1348_v25 }
 0x858   :  { %v4982_v18 = vpop.eup %4981 }
 0x859   :  { %v1357_v5 = vmul.f32 %v4982_v18, %v5578_v50  ;;  %v1366_v27 = vrot.slane %v4982_v18, 2 }
 0x8a2   :  { %v1353_v51 = vpop.permute.xlu0 %1352 }
 0x8a3   :  { %v1354_v12 = vrot.slane %v1353_v51, 2 }
 0x8a5   :  { %4983 = vtanh.f32 %v1354_v12 }
 0x8a6   :  { %4985 = vrcp.f32 %v1128_v20 }
 0x8af   :  { %v4984_v19 = vpop.eup %4983 }
 0x8b0   :  { %v1358_v26 = vmul.f32 %v4984_v19, %v4982_v18  ;;  %v4986_v28 = vpop.eup %4985 }
 0x8b1   :  { %v1135_v13 = vmul.f32 %v4986_v28, %v5582_v58 }
 0x8b2   :  { %1360 = vrot.lane.b32.xlu0 %v1358_v26, %s5257_s3 }
 0x8bd   :  { %v1138_v30 = vpop.permute.xlu1 %1137 }
 0x8be   :  { %v1140_v31 = vmul.f32 %v4986_v28, %v1138_v30 }
 0x8c0   :  { %1142 = vrot.lane.b32.xlu1 %v1140_v31, %s5257_s3 }
 0x924   :  { %v1361_v61 = vpop.permute.xlu0 %1360 }
 0x925   :  { %v5646_v4 = vadd.f32 %v1361_v61, %v1357_v5  ;;  %v1599_v5 = vld [vmem:[#allocation9 + $0x18] sm:$0xff]  ;;  %v1598_v61 = vld [vmem:[#allocation9 + $0x10] sm:$0xff] }
 0x926   :  { %v5700_v56 = vpack.c.bf16 %v1599_v5, %v1597_v3  ;;  %v1739_v3 = vld [vmem:[#allocation8 + $0x58] sm:$0xff] }
 0x927   :  { %4987 = vtanh.f32 %v5646_v4 }
 0x928   :  { %4573 = vmatprep.subr.bf16.mxu1 %v5700_v56 }
 0x931   :  { %v4988_v6 = vpop.eup %4987 }
 0x932   :  { %v1143_v14 = vpop.permute.xlu1 %1142  ;;  %1369 = vrot.lane.b32.xlu0 %v4988_v6, %s5257_s3  ;;  %v1601_v6 = vld [vmem:[#allocation9 + $0x28] sm:$0xff] }
 0x933   :  { %v5652_v9 = vadd.f32 %v1143_v14, %v1135_v13  ;;  %v1603_v13 = vld [vmem:[#allocation9 + $0x38] sm:$0xff]  ;;  %v5702_v14 = vpack.c.bf16 %v1598_v61, %v1596_v55  ;;  %v1736_v61 = vld [vmem:[#allocation8 + $0x40] sm:$0xff] }
 0x935   :  { %4989 = vtanh.f32 %v5652_v9 }
 0x936   :  { %4991 = vpow2.f32 %v4304_v8  ;;  %v1600_v8 = vld [vmem:[#allocation9 + $0x20] sm:$0xff] }
 0x93f   :  { %v4990_v50 = vpop.eup %4989 }
 0x940   :  { %1148 = vrot.lane.b32.xlu1 %v4990_v50, %s5257_s3  ;;  %v4992_v10 = vpop.eup %4991  ;;  %v5704_v50 = vpack.c.bf16 %v1603_v13, %v1601_v6  ;;  %v1738_v6 = vld [vmem:[#allocation8 + $0x50] sm:$0xff]  ;;  %v1741_v13 = vld [vmem:[#allocation8 + $0x68] sm:$0xff] }
 0x941   :  { %v1129_v11 = vadd.f32 1.0, %v4992_v10  ;;  %v1602_v10 = vld [vmem:[#allocation9 + $0x30] sm:$0xff] }
 0x943   :  { %4993 = vrcp.f32 %v1129_v11  ;;  %v5709_v11 = vpack.c.bf16 %v1602_v10, %v1600_v8  ;;  %v1743_v8 = vld [vmem:[#allocation8 + $0x78] sm:$0xff]  ;;  %v5760_v10 = vpack.c.bf16 %v1738_v6, %v1736_v61 }
 0x94d   :  { %v4994_v58 = vpop.eup %4993 }
 0x9a4   :  { %v1370_v16 = vpop.permute.xlu0 %1369 }
 0x9a5   :  { %v1372_v21 = vmul.f32 %v1370_v16, %v1366_v27  ;;  %v1607_v27 = vld [vmem:[#allocation9 + $0x58] sm:$0xff] }
 0x9a7   :  { %4311 = vmatmul.mubr.msk.f32.vlgmr.msra.gmra.mrb[6].mxu1 %vm105_vm0, %v1372_v21 }
 0x9a8   :  { %1679 = vmatprep.mubr.f32.mxu1 %v5261_v1  ;;  %4575 = vmatpush1.bf16.msra.mxu1 %v5702_v14 }
 0x9a9   :  { %4577 = vmatprep.subr.bf16.mxu1 %v5704_v50 }
 0x9ac   :  { %4579 = vmatpush1.bf16.msra.mxu1 %v5709_v11 }
 0x9b2   :  { %v1149_v22 = vpop.permute.xlu1 %1148 }
 0x9b3   :  { %v1151_v25 = vmul.f32 %v4994_v58, %v1149_v22  ;;  %v1606_v58 = vld [vmem:[#allocation9 + $0x50] sm:$0xff]  ;;  %v1609_v22 = vld [vmem:[#allocation9 + $0x68] sm:$0xff] }
 0x9b5   :  { %1153 = vst.msk [vmem:[#allocation2 + $0x4] sm:$0x3] %vm442_vm1, %v1151_v25  ;;  %4306 = vmatmul.mubr.msk.f32.vlgmr.msra.gmra.mrb[8].mxu0 %vm105_vm0, %v1151_v25  ;;  %v1611_v25 = vld [vmem:[#allocation9 + $0x78] sm:$0xff] }
 0x9b6   :  { %4543 = vmatpush1.bf16.msra.mxu0 %v5460_v23  ;;  %1456 = vmatprep.mubr.f32.mxu0 %v5261_v1 }
 0x9b7   :  { %4545 = vmatprep.subr.bf16.mxu0 %v5463_v24 }
 0x9ba   :  { %4547 = vmatpush1.bf16.msra.mxu0 %v5467_v32 }
 0x9bb   :  { %4549 = vmatprep.subr.bf16.mxu0 %v5471_v33  ;;  %v1687_v33 = vld [vmem:[#allocation4 + $0x10] sm:$0xf] }
 0x9be   :  { %4551 = vmatpush1.bf16.msra.mxu0 %v5474_v39 }
 0x9bf   :  { %4553 = vmatprep.subr.bf16.mxu0 %v5477_v40 }
 0x9c2   :  { %4555 = vmatpush1.bf16.msra.mxu0 %v5480_v43  ;;  %v1463_v43 = vld [vmem:[%s6257_s5] sm:$0x3] }
 0x9c3   :  { %4605 = vmatprep.subr.bf16.mxu0 %v5622_v38  ;;  %v1468_v15 = vrot.slane %v1463_v43, %v5512_v45  ;;  %v1472_v51 = vrot.slane %v1463_v43, %v5515_v53 }
 0x9c5   :  { %4308 = vmatmul.mubr.msk.f32.vlgmr.msra.gmra.mrb[8].mxu0 %vm105_vm0, %v1372_v21  ;;  %v1604_v21 = vld [vmem:[#allocation9 + $0x40] sm:$0xff] }
 0x9c6   :  { %4607 = vmatpush1.bf16.msra.mxu0 %v5624_v46  ;;  %1944 = vmatprep.mubr.f32.mxu0 %v5261_v1 }
 0x9c7   :  { %4609 = vmatprep.subr.bf16.mxu0 %v5626_v49 }
 0x9ca   :  { %4611 = vmatpush1.bf16.msra.mxu0 %v5630_v63 }
 0x9cb   :  { %4613 = vmatprep.subr.bf16.mxu0 %v5633_v52 }
 0x9ce   :  { %4615 = vmatpush1.bf16.msra.mxu0 %v5636_v48 }
 0x9cf   :  { %4617 = vmatprep.subr.bf16.mxu0 %v5639_v7 }
 0x9d2   :  { %4619 = vmatpush1.bf16.msra.mxu0 %v5644_v62 }
 0x9d3   :  { %4621 = vmatprep.subr.bf16.mxu0 %v5700_v56 }
 0xa7a   :  { %v1591_v23 = vpop.f32.mrb[6].mxu1 }
 0xa7b   :  { %v1593_v24 = vpop.f32.mrb[7].mxu1 }
 0xa7c   :  { %v1690_v32 = vcombine.low %v1591_v23, %v1593_v24  ;;  %v5715_v23 = vpack.c.bf16 %v1606_v58, %v1604_v21  ;;  %v5718_v24 = vpack.c.bf16 %v1611_v25, %v1609_v22  ;;  %v1742_v21 = vld [vmem:[#allocation8 + $0x70] sm:$0xff] }
 0xa7e   :  { %v1697_v39 = vrot.slane %v1690_v32, %v5425_v34  ;;  %v1608_v32 = vld [vmem:[#allocation9 + $0x60] sm:$0xff] }
 0xa80   :  { %v1699_v40 = vadd.f32 %v1697_v39, %v1687_v33  ;;  %v1610_v33 = vld [vmem:[#allocation9 + $0x70] sm:$0xff] }
 0xa82   :  { %1707 = vrot.lane.b32.xlu0 %v1699_v40, %s5257_s3  ;;  %v4313_v26 = vmul.f32 -1.442695, %v1699_v40  ;;  %v5722_v40 = vpack.c.bf16 %v1610_v33, %v1608_v32  ;;  %v2042_v33 = vld [vmem:[#allocation4 + $0x14] sm:$0xf] }
 0xa98   :  { %v1458_v12 = vpop.f32.mrb[8].mxu0 }
 0xa99   :  { %v1475_v17 = vadd.f32 %v1468_v15, %v1458_v12  ;;  %v1460_v18 = vpop.f32.mrb[9].mxu0  ;;  %v1729_v15 = vld [vmem:[#allocation8 + $0x8] sm:$0xff] }
 0xa9a   :  { %v5686_v19 = vadd.f32 %v1472_v51, %v1460_v18  ;;  %v1731_v51 = vld [vmem:[#allocation8 + $0x18] sm:$0xff] }
 0xa9b   :  { %v4309_v36 = vmul.f32 -1.442695, %v1475_v17  ;;  %v5727_v17 = vpack.c.bf16 %v1731_v51, %v1729_v15  ;;  %v1818_v15 = vld [vmem:[%s6257_s5] sm:$0x3] }
 0xa9c   :  { %4995 = vtanh.f32 %v5686_v19  ;;  %v1823_v51 = vrot.slane %v1818_v15, %v5512_v45 }
 0xa9d   :  { %4997 = vpow2.f32 %v4313_v26  ;;  %v4310_v26 = vmul.f32 -1.442695, %v5686_v19  ;;  %v1728_v19 = vld [vmem:[#allocation8] sm:$0xff] }
 0xaa6   :  { %v4996_v20 = vpop.eup %4995 }
 0xaa7   :  { %1492 = vrot.lane.b32.xlu1 %v4996_v20, %s5257_s3  ;;  %v4998_v28 = vpop.eup %4997 }
 0xaa8   :  { %v1703_v30 = vadd.f32 1.0, %v4998_v28 }
 0xaaa   :  { %4999 = vrcp.f32 %v1703_v30 }
 0xab4   :  { %v5690_v37 = vpop.eup %4999 }
 0xab5   :  { %v1712_v0 = vmul.f32 %v5690_v37, %v5646_v4  ;;  %v1605_v4 = vld [vmem:[#allocation9 + $0x48] sm:$0xff]  ;;  %v1721_v28 = vrot.slane %v5690_v37, 2 }
 0xab6   :  { %v5712_v16 = vpack.c.bf16 %v1607_v27, %v1605_v4  ;;  %v5763_v4 = vpack.c.bf16 %v1743_v8, %v1741_v13  ;;  %v1740_v27 = vld [vmem:[#allocation8 + $0x60] sm:$0xff] }
 0xab7   :  { %v5766_v58 = vpack.c.bf16 %v1742_v21, %v1740_v27 }
 0xab8   :  { %4581 = vmatprep.subr.bf16.mxu1 %v5712_v16 }
 0xab9   :  { %4583 = vmatpush1.bf16.msra.mxu1 %v5715_v23 }
 0xaba   :  { %4585 = vmatprep.subr.bf16.mxu1 %v5718_v24 }
 0xabd   :  { %4587 = vmatpush1.bf16.msra.mxu1 %v5722_v40 }
 0xabe   :  { %4589 = vmatprep.subr.bf16.mxu1 %v5727_v17 }
 0xaf4   :  { %v1708_v31 = vpop.permute.xlu0 %1707 }
 0xaf5   :  { %v1709_v35 = vrot.slane %v1708_v31, 2 }
 0xaf7   :  { %5001 = vtanh.f32 %v1709_v35 }
 0xaf8   :  { %5003 = vpow2.f32 %v4309_v36  ;;  %v1730_v36 = vld [vmem:[#allocation8 + $0x10] sm:$0xff] }
 0xb01   :  { %v5002_v41 = vpop.eup %5001 }
 0xb02   :  { %v1713_v42 = vmul.f32 %v5002_v41, %v5690_v37  ;;  %v5004_v44 = vpop.eup %5003  ;;  %v1733_v37 = vld [vmem:[#allocation8 + $0x28] sm:$0xff]  ;;  %v1735_v41 = vld [vmem:[#allocation8 + $0x38] sm:$0xff] }
 0xb03   :  { %v1483_v54 = vadd.f32 1.0, %v5004_v44 }
 0xb04   :  { %1715 = vrot.lane.b32.xlu0 %v1713_v42, %s5257_s3 }
 0xb05   :  { %5005 = vrcp.f32 %v1483_v54  ;;  %v5746_v54 = vpack.c.bf16 %v1730_v36, %v1728_v19 }
 0xb0f   :  { %v5006_v57 = vpop.eup %5005 }
 0xb10   :  { %v1490_v43 = vmul.f32 %v5006_v57, %v5652_v9 }
 0xb19   :  { %v1493_v59 = vpop.permute.xlu1 %1492 }
 0xb1a   :  { %v1495_v60 = vmul.f32 %v5006_v57, %v1493_v59  ;;  %v5748_v59 = vpack.c.bf16 %v1735_v41, %v1733_v37 }
 0xb1c   :  { %1497 = vrot.lane.b32.xlu1 %v1495_v60, %s5257_s3  ;;  %v1732_v60 = vld [vmem:[#allocation8 + $0x20] sm:$0xff] }
 0xb76   :  { %v1716_v47 = vpop.permute.xlu0 %1715 }
 0xb77   :  { %v5697_v2 = vadd.f32 %v1716_v47, %v1712_v0  ;;  %v1734_v0 = vld [vmem:[#allocation8 + $0x30] sm:$0xff]  ;;  %v1737_v47 = vld [vmem:[#allocation8 + $0x48] sm:$0xff] }
 0xb78   :  { %v5753_v5 = vpack.c.bf16 %v1734_v0, %v1732_v60  ;;  %v5757_v55 = vpack.c.bf16 %v1739_v3, %v1737_v47 }
 0xb79   :  { %5007 = vtanh.f32 %v5697_v2 }
 0xb83   :  { %v5008_v39 = vpop.eup %5007 }
 0xb84   :  { %1724 = vrot.lane.b32.xlu0 %v5008_v39, %s5257_s3 }
 0xb8e   :  { %v1498_v12 = vpop.permute.xlu1 %1497 }
 0xb8f   :  { %v5729_v18 = vadd.f32 %v1498_v12, %v1490_v43  ;;  %v1827_v12 = vrot.slane %v1818_v15, %v5515_v53 }
 0xb91   :  { %5009 = vtanh.f32 %v5729_v18 }
 0xb92   :  { %5011 = vpow2.f32 %v4310_v26 }
 0xb9b   :  { %v5010_v20 = vpop.eup %5009 }
 0xb9c   :  { %1503 = vrot.lane.b32.xlu1 %v5010_v20, %s5257_s3  ;;  %v5012_v31 = vpop.eup %5011 }
 0xb9d   :  { %v1484_v35 = vadd.f32 1.0, %v5012_v31 }
 0xb9f   :  { %5013 = vrcp.f32 %v1484_v35 }
 0xba9   :  { %v5014_v42 = vpop.eup %5013 }
 0xbf6   :  { %v1725_v9 = vpop.permute.xlu0 %1724 }
 0xbf7   :  { %v1727_v30 = vmul.f32 %v1725_v9, %v1721_v28 }
 0xbf9   :  { %4317 = vmatmul.mubr.msk.f32.vlgmr.msra.gmra.mrb[10].mxu0 %vm105_vm0, %v1727_v30 }
 0xbfa   :  { %4623 = vmatpush1.bf16.msra.mxu0 %v5702_v14  ;;  %2034 = vmatprep.mubr.f32.mxu0 %v5261_v1 }
 0xbfb   :  { %4625 = vmatprep.subr.bf16.mxu0 %v5704_v50 }
 0xbfe   :  { %4627 = vmatpush1.bf16.msra.mxu0 %v5709_v11 }
 0xbff   :  { %4629 = vmatprep.subr.bf16.mxu0 %v5712_v16 }
 0xc02   :  { %4631 = vmatpush1.bf16.msra.mxu0 %v5715_v23 }
 0xc03   :  { %4633 = vmatprep.subr.bf16.mxu0 %v5718_v24 }
 0xc06   :  { %4635 = vmatpush1.bf16.msra.mxu0 %v5722_v40 }
 0xc07   :  { %4637 = vmatprep.subr.bf16.mxu0 %v5727_v17 }
 0xc0e   :  { %v1504_v44 = vpop.permute.xlu1 %1503 }
 0xc0f   :  { %v1506_v57 = vmul.f32 %v5014_v42, %v1504_v44 }
 0xc11   :  { %1508 = vst.msk [vmem:[#allocation2 + $0x6] sm:$0x3] %vm442_vm1, %v1506_v57  ;;  %4312 = vmatmul.mubr.msk.f32.vlgmr.msra.gmra.mrb[8].mxu1 %vm105_vm0, %v1506_v57 }
 0xc12   :  { %4591 = vmatpush1.bf16.msra.mxu1 %v5746_v54  ;;  %1811 = vmatprep.mubr.f32.mxu1 %v5261_v1 }
 0xc13   :  { %4593 = vmatprep.subr.bf16.mxu1 %v5748_v59 }
 0xc16   :  { %4595 = vmatpush1.bf16.msra.mxu1 %v5753_v5 }
 0xc17   :  { %4597 = vmatprep.subr.bf16.mxu1 %v5757_v55 }
 0xc1a   :  { %4599 = vmatpush1.bf16.msra.mxu1 %v5760_v10 }
 0xc1b   :  { %4601 = vmatprep.subr.bf16.mxu1 %v5763_v4 }
 0xc1e   :  { %4603 = vmatpush1.bf16.msra.mxu1 %v5766_v58 }
 0xc1f   :  { %4653 = vmatprep.subr.bf16.mxu1 %v5622_v38 }
 0xc21   :  { %4314 = vmatmul.mubr.msk.f32.vlgmr.msra.gmra.mrb[8].mxu1 %vm105_vm0, %v1727_v30 }
 0xc22   :  { %4655 = vmatpush1.bf16.msra.mxu1 %v5624_v46  ;;  %2299 = vmatprep.mubr.f32.mxu1 %v5261_v1 }
 0xc23   :  { %4657 = vmatprep.subr.bf16.mxu1 %v5626_v49 }
 0xc26   :  { %4659 = vmatpush1.bf16.msra.mxu1 %v5630_v63 }
 0xc27   :  { %4661 = vmatprep.subr.bf16.mxu1 %v5633_v52 }
 0xc2a   :  { %4663 = vmatpush1.bf16.msra.mxu1 %v5636_v48 }
 0xc2b   :  { %4665 = vmatprep.subr.bf16.mxu1 %v5639_v7 }
 0xc2e   :  { %4667 = vmatpush1.bf16.msra.mxu1 %v5644_v62 }
 0xc2f   :  { %4669 = vmatprep.subr.bf16.mxu1 %v5700_v56 }
 0xccc   :  { %v1946_v22 = vpop.f32.mrb[10].mxu0 }
 0xccd   :  { %v1948_v25 = vpop.f32.mrb[11].mxu0 }
 0xcce   :  { %v2045_v32 = vcombine.low %v1946_v22, %v1948_v25 }
 0xcd0   :  { %v2052_v39 = vrot.slane %v2045_v32, %v5425_v34 }
 0xcd2   :  { %v2054_v43 = vadd.f32 %v2052_v39, %v2042_v33 }
 0xcd4   :  { %2062 = vrot.lane.b32.xlu0 %v2054_v43, %s5257_s3  ;;  %v4319_v31 = vmul.f32 -1.442695, %v2054_v43 }
 0xcf4   :  { %v1813_v20 = vpop.f32.mrb[8].mxu1 }
 0xcf5   :  { %v1830_v26 = vadd.f32 %v1823_v51, %v1813_v20  ;;  %v1815_v28 = vpop.f32.mrb[9].mxu1 }
 0xcf6   :  { %v1831_v9 = vadd.f32 %v1827_v12, %v1815_v28 }
 0xcf7   :  { %v4315_v57 = vmul.f32 -1.442695, %v1830_v26 }
 0xcf8   :  { %5015 = vtanh.f32 %v1831_v9  ;;  %v4316_v43 = vmul.f32 -1.442695, %v1831_v9 }
 0xcf9   :  { %5017 = vpow2.f32 %v4319_v31 }
 0xd02   :  { %v5016_v30 = vpop.eup %5015 }
 0xd03   :  { %1847 = vrot.lane.b32.xlu1 %v5016_v30, %s5257_s3  ;;  %v5018_v35 = vpop.eup %5017 }
 0xd04   :  { %v2058_v19 = vadd.f32 1.0, %v5018_v35 }
 0xd06   :  { %5019 = vrcp.f32 %v2058_v19 }
 0xd10   :  { %v5020_v41 = vpop.eup %5019 }
 0xd11   :  { %v2067_v6 = vmul.f32 %v5020_v41, %v5697_v2  ;;  %v2076_v33 = vrot.slane %v5020_v41, 2 }
 0xd46   :  { %v2063_v36 = vpop.permute.xlu0 %2062 }
 0xd47   :  { %v2064_v37 = vrot.slane %v2063_v36, 2 }
 0xd49   :  { %5021 = vtanh.f32 %v2064_v37 }
 0xd4a   :  { %5023 = vpow2.f32 %v4315_v57 }
 0xd53   :  { %v5022_v42 = vpop.eup %5021 }
 0xd54   :  { %v2068_v44 = vmul.f32 %v5022_v42, %v5020_v41  ;;  %v5024_v60 = vpop.eup %5023 }
 0xd55   :  { %v1838_v0 = vadd.f32 1.0, %v5024_v60 }
 0xd56   :  { %2070 = vrot.lane.b32.xlu0 %v2068_v44, %s5257_s3 }
 0xd57   :  { %5025 = vrcp.f32 %v1838_v0 }
 0xd61   :  { %v5026_v47 = vpop.eup %5025 }
 0xd62   :  { %v1845_v21 = vmul.f32 %v5026_v47, %v5729_v18 }
 0xd75   :  { %v1848_v3 = vpop.permute.xlu1 %1847 }
 0xd76   :  { %v1850_v61 = vmul.f32 %v5026_v47, %v1848_v3 }
 0xd78   :  { %1852 = vrot.lane.b32.xlu1 %v1850_v61, %s5257_s3 }
 0xdc8   :  { %v2071_v13 = vpop.permute.xlu0 %2070 }
 0xdc9   :  { %v5792_v8 = vadd.f32 %v2071_v13, %v2067_v6 }
 0xdcb   :  { %5027 = vtanh.f32 %v5792_v8 }
 0xdd5   :  { %v5028_v27 = vpop.eup %5027 }
 0xdd6   :  { %2079 = vrot.lane.b32.xlu0 %v5028_v27, %s5257_s3 }
 0xdea   :  { %v1853_v22 = vpop.permute.xlu1 %1852 }
 0xdeb   :  { %v5797_v25 = vadd.f32 %v1853_v22, %v1845_v21 }
 0xded   :  { %5029 = vtanh.f32 %v5797_v25 }
 0xdee   :  { %5031 = vpow2.f32 %v4316_v43 }
 0xdf7   :  { %v5030_v32 = vpop.eup %5029 }
 0xdf8   :  { %1858 = vrot.lane.b32.xlu1 %v5030_v32, %s5257_s3  ;;  %v5032_v18 = vpop.eup %5031 }
 0xdf9   :  { %v1839_v15 = vadd.f32 1.0, %v5032_v18 }
 0xdfb   :  { %5033 = vrcp.f32 %v1839_v15 }
 0xe05   :  { %v5034_v51 = vpop.eup %5033 }
 0xe48   :  { %v2080_v2 = vpop.permute.xlu0 %2079 }
 0xe49   :  { %v2082_v39 = vmul.f32 %v2080_v2, %v2076_v33 }
 0xe4b   :  { %4323 = vmatmul.mubr.msk.f32.vlgmr.msra.gmra.mrb[10].mxu1 %vm105_vm0, %v2082_v39 }
 0xe4c   :  { %4671 = vmatpush1.bf16.msra.mxu1 %v5702_v14  ;;  %2389 = vmatprep.mubr.f32.mxu1 %v5261_v1 }
 0xe4d   :  { %4673 = vmatprep.subr.bf16.mxu1 %v5704_v50 }
 0xe50   :  { %4675 = vmatpush1.bf16.msra.mxu1 %v5709_v11 }
 0xe51   :  { %4677 = vmatprep.subr.bf16.mxu1 %v5712_v16 }
 0xe54   :  { %4679 = vmatpush1.bf16.msra.mxu1 %v5715_v23 }
 0xe55   :  { %4681 = vmatprep.subr.bf16.mxu1 %v5718_v24 }
 0xe58   :  { %4683 = vmatpush1.bf16.msra.mxu1 %v5722_v40 }
 0xe59   :  { %4685 = vmatprep.subr.bf16.mxu1 %v5727_v17 }
 0xe6a   :  { %v1859_v12 = vpop.permute.xlu1 %1858 }
 0xe6b   :  { %v1861_v20 = vmul.f32 %v5034_v51, %v1859_v12 }
 0xe6d   :  { %1863 = vst.msk [vmem:[#allocation2 + $0x8] sm:$0x3] %vm442_vm1, %v1861_v20  ;;  %4318 = vmatmul.mubr.msk.f32.vlgmr.msra.gmra.mrb[12].mxu0 %vm105_vm0, %v1861_v20  ;;  %v2528_v20 = vld [vmem:[%s6257_s5] sm:$0x3] }
 0xe6e   :  { %4639 = vmatpush1.bf16.msra.mxu0 %v5746_v54  ;;  %2166 = vmatprep.mubr.f32.mxu0 %v5261_v1 }
 0xe6f   :  { %4641 = vmatprep.subr.bf16.mxu0 %v5748_v59 }
 0xe72   :  { %4643 = vmatpush1.bf16.msra.mxu0 %v5753_v5 }
 0xe73   :  { %4645 = vmatprep.subr.bf16.mxu0 %v5757_v55 }
 0xe76   :  { %4647 = vmatpush1.bf16.msra.mxu0 %v5760_v10 }
 0xe77   :  { %4649 = vmatprep.subr.bf16.mxu0 %v5763_v4 }
 0xe7a   :  { %4651 = vmatpush1.bf16.msra.mxu0 %v5766_v58 }
 0xe7b   :  { %4701 = vmatprep.subr.bf16.mxu0 %v5622_v38 }
 0xe7d   :  { %4320 = vmatmul.mubr.msk.f32.vlgmr.msra.gmra.mrb[12].mxu0 %vm105_vm0, %v2082_v39 }
 0xe7e   :  { %4703 = vmatpush1.bf16.msra.mxu0 %v5624_v46  ;;  %2654 = vmatprep.mubr.f32.mxu0 %v5261_v1  ;;  %v2397_v46 = vld [vmem:[#allocation4 + $0x18] sm:$0xf] }
 0xe7f   :  { %4705 = vmatprep.subr.bf16.mxu0 %v5626_v49  ;;  %v2173_v49 = vld [vmem:[%s6257_s5] sm:$0x3] }
 0xe82   :  { %4707 = vmatpush1.bf16.msra.mxu0 %v5630_v63  ;;  %v2178_v63 = vrot.slane %v2173_v49, %v5512_v45 }
 0xe83   :  { %4709 = vmatprep.subr.bf16.mxu0 %v5633_v52  ;;  %v2182_v52 = vrot.slane %v2173_v49, %v5515_v53 }
 0xe86   :  { %4711 = vmatpush1.bf16.msra.mxu0 %v5636_v48 }
 0xe87   :  { %4713 = vmatprep.subr.bf16.mxu0 %v5639_v7 }
 0xe8a   :  { %4715 = vmatpush1.bf16.msra.mxu0 %v5644_v62 }
 0xe8b   :  { %4717 = vmatprep.subr.bf16.mxu0 %v5700_v56 }
 0xf1e   :  { %v2301_v38 = vpop.f32.mrb[10].mxu1 }
 0xf1f   :  { %v2303_v26 = vpop.f32.mrb[11].mxu1 }
 0xf20   :  { %v2400_v28 = vcombine.low %v2301_v38, %v2303_v26  ;;  %v2533_v38 = vrot.slane %v2528_v20, %v5512_v45  ;;  %v2537_v26 = vrot.slane %v2528_v20, %v5515_v53 }
 0xf22   :  { %v2407_v9 = vrot.slane %v2400_v28, %v5425_v34 }
 0xf24   :  { %v2409_v30 = vadd.f32 %v2407_v9, %v2397_v46 }
 0xf26   :  { %2417 = vrot.lane.b32.xlu0 %v2409_v30, %s5257_s3  ;;  %v4325_v35 = vmul.f32 -1.442695, %v2409_v30 }
 0xf50   :  { %v2168_v48 = vpop.f32.mrb[12].mxu0 }
 0xf51   :  { %v2185_v7 = vadd.f32 %v2178_v63, %v2168_v48  ;;  %v2170_v62 = vpop.f32.mrb[13].mxu0 }
 0xf52   :  { %v2186_v56 = vadd.f32 %v2182_v52, %v2170_v62 }
 0xf53   :  { %v4321_v60 = vmul.f32 -1.442695, %v2185_v7 }
 0xf54   :  { %5035 = vtanh.f32 %v2186_v56 }
 0xf55   :  { %5037 = vpow2.f32 %v4325_v35 }
 0xf5e   :  { %v5036_v31 = vpop.eup %5035 }
 0xf5f   :  { %2202 = vrot.lane.b32.xlu1 %v5036_v31, %s5257_s3  ;;  %v5038_v19 = vpop.eup %5037 }
 0xf60   :  { %v2413_v36 = vadd.f32 1.0, %v5038_v19 }
 0xf62   :  { %5039 = vrcp.f32 %v2413_v36 }
 0xf6c   :  { %v5040_v42 = vpop.eup %5039 }
 0xf6d   :  { %v2422_v13 = vmul.f32 %v5040_v42, %v5792_v8  ;;  %v2431_v43 = vrot.slane %v5040_v42, 2 }
 0xf98   :  { %v2418_v37 = vpop.permute.xlu0 %2417 }
 0xf99   :  { %v2419_v41 = vrot.slane %v2418_v37, 2 }
 0xf9b   :  { %5041 = vtanh.f32 %v2419_v41 }
 0xf9c   :  { %5043 = vpow2.f32 %v4321_v60  ;;  %v2981_v60 = vld [vmem:[#allocation6] sm:$0xff] }
 0xfa5   :  { %v5042_v44 = vpop.eup %5041 }
 0xfa6   :  { %v2423_v57 = vmul.f32 %v5042_v44, %v5040_v42  ;;  %v5044_v0 = vpop.eup %5043  ;;  %v2982_v44 = vld [vmem:[#allocation6 + $0x8] sm:$0xff] }
 0xfa7   :  { %v2193_v47 = vadd.f32 1.0, %v5044_v0 }
 0xfa8   :  { %2425 = vrot.lane.b32.xlu0 %v2423_v57, %s5257_s3  ;;  %v2984_v57 = vld [vmem:[#allocation6 + $0x18] sm:$0xff] }
 0xfa9   :  { %5045 = vrcp.f32 %v2193_v47  ;;  %v5887_v0 = vpack.c.bf16 %v2984_v57, %v2982_v44  ;;  %v2983_v47 = vld [vmem:[#allocation6 + $0x10] sm:$0xff] }
 0xfaa   :  { %v3070_v57 = vld [vmem:[#allocation9 + $0x10] sm:$0xff] }
 0xfb3   :  { %v5046_v3 = vpop.eup %5045 }
 0xfb4   :  { %v2200_v32 = vmul.f32 %v5046_v3, %v5797_v25  ;;  %v4322_v25 = vmul.f32 -1.442695, %v2186_v56 }
 0xfd1   :  { %v2203_v61 = vpop.permute.xlu1 %2202 }
 0xfd2   :  { %v2205_v6 = vmul.f32 %v5046_v3, %v2203_v61  ;;  %v2986_v3 = vld [vmem:[#allocation6 + $0x28] sm:$0xff]  ;;  %v2988_v61 = vld [vmem:[#allocation6 + $0x38] sm:$0xff] }
 0xfd4   :  { %2207 = vrot.lane.b32.xlu1 %v2205_v6, %s5257_s3  ;;  %v5889_v6 = vpack.c.bf16 %v2983_v47, %v2981_v60  ;;  %v3073_v60 = vld [vmem:[#allocation9 + $0x28] sm:$0xff]  ;;  %v3075_v47 = vld [vmem:[#allocation9 + $0x38] sm:$0xff] }
0x101a   :  { %v2426_v27 = vpop.permute.xlu0 %2425 }
0x101b   :  { %v5843_v21 = vadd.f32 %v2426_v27, %v2422_v13  ;;  %v5891_v13 = vpack.c.bf16 %v2988_v61, %v2986_v3  ;;  %v2985_v27 = vld [vmem:[#allocation6 + $0x20] sm:$0xff]  ;;  %v5959_v61 = vpack.c.bf16 %v3075_v47, %v3073_v60 }
0x101d   :  { %5047 = vtanh.f32 %v5843_v21 }
0x1027   :  { %v5048_v22 = vpop.eup %5047 }
0x1028   :  { %2434 = vrot.lane.b32.xlu0 %v5048_v22, %s5257_s3  ;;  %v2987_v22 = vld [vmem:[#allocation6 + $0x30] sm:$0xff] }
0x1046   :  { %v2208_v33 = vpop.permute.xlu1 %2207 }
0x1047   :  { %v5848_v2 = vadd.f32 %v2208_v33, %v2200_v32  ;;  %v2990_v32 = vld [vmem:[#allocation6 + $0x48] sm:$0xff]  ;;  %v2992_v33 = vld [vmem:[#allocation6 + $0x58] sm:$0xff] }
0x1049   :  { %5049 = vtanh.f32 %v5848_v2 }
0x104a   :  { %5051 = vpow2.f32 %v4322_v25  ;;  %v2994_v25 = vld [vmem:[#allocation6 + $0x68] sm:$0xff] }
0x1053   :  { %v5050_v39 = vpop.eup %5049 }
0x1054   :  { %2213 = vrot.lane.b32.xlu1 %v5050_v39, %s5257_s3  ;;  %v5052_v15 = vpop.eup %5051  ;;  %v5895_v39 = vpack.c.bf16 %v2987_v22, %v2985_v27  ;;  %v3072_v27 = vld [vmem:[#allocation9 + $0x20] sm:$0xff]  ;;  %v3074_v22 = vld [vmem:[#allocation9 + $0x30] sm:$0xff] }
0x109a   :  { %v2435_v8 = vpop.permute.xlu0 %2434 }
0x109b   :  { %v2437_v18 = vmul.f32 %v2435_v8, %v2431_v43  ;;  %v5898_v43 = vpack.c.bf16 %v2992_v33, %v2990_v32  ;;  %v2989_v8 = vld [vmem:[#allocation6 + $0x40] sm:$0xff]  ;;  %v3077_v32 = vld [vmem:[#allocation9 + $0x48] sm:$0xff]  ;;  %v3079_v33 = vld [vmem:[#allocation9 + $0x58] sm:$0xff] }
0x109d   :  { %4329 = vmatmul.mubr.msk.f32.vlgmr.msra.gmra.mrb[14].mxu0 %vm105_vm0, %v2437_v18 }
0x109e   :  { %4719 = vmatpush1.bf16.msra.mxu0 %v5702_v14  ;;  %2744 = vmatprep.mubr.f32.mxu0 %v5261_v1  ;;  %v2194_v14 = vadd.f32 1.0, %v5052_v15  ;;  %v2996_v15 = vld [vmem:[#allocation6 + $0x78] sm:$0xff] }
0x109f   :  { %4721 = vmatprep.subr.bf16.mxu0 %v5704_v50 }
0x10a0   :  { %5053 = vrcp.f32 %v2194_v14 }
0x10a2   :  { %4723 = vmatpush1.bf16.msra.mxu0 %v5709_v11 }
0x10a3   :  { %4725 = vmatprep.subr.bf16.mxu0 %v5712_v16 }
0x10a6   :  { %4727 = vmatpush1.bf16.msra.mxu0 %v5715_v23 }
0x10a7   :  { %4729 = vmatprep.subr.bf16.mxu0 %v5718_v24  ;;  %v2752_v24 = vld [vmem:[#allocation4 + $0x1c] sm:$0xf] }
0x10aa   :  { %4731 = vmatpush1.bf16.msra.mxu0 %v5722_v40  ;;  %v5054_v51 = vpop.eup %5053 }
0x10ab   :  { %4733 = vmatprep.subr.bf16.mxu0 %v5727_v17 }
0x10c6   :  { %v2214_v12 = vpop.permute.xlu1 %2213 }
0x10c7   :  { %v2216_v50 = vmul.f32 %v5054_v51, %v2214_v12  ;;  %v5904_v51 = vpack.c.bf16 %v2996_v15, %v2994_v25  ;;  %v3076_v25 = vld [vmem:[#allocation9 + $0x40] sm:$0xff]  ;;  %v3078_v15 = vld [vmem:[#allocation9 + $0x50] sm:$0xff] }
0x10c9   :  { %2218 = vst.msk [vmem:[#allocation2 + $0xa] sm:$0x3] %vm442_vm1, %v2216_v50  ;;  %4324 = vmatmul.mubr.msk.f32.vlgmr.msra.gmra.mrb[12].mxu1 %vm105_vm0, %v2216_v50 }
0x10ca   :  { %4687 = vmatpush1.bf16.msra.mxu1 %v5746_v54  ;;  %2521 = vmatprep.mubr.f32.mxu1 %v5261_v1 }
0x10cb   :  { %4689 = vmatprep.subr.bf16.mxu1 %v5748_v59 }
0x10ce   :  { %4691 = vmatpush1.bf16.msra.mxu1 %v5753_v5 }
0x10cf   :  { %4693 = vmatprep.subr.bf16.mxu1 %v5757_v55 }
0x10d2   :  { %4695 = vmatpush1.bf16.msra.mxu1 %v5760_v10 }
0x10d3   :  { %4697 = vmatprep.subr.bf16.mxu1 %v5763_v4 }
0x10d6   :  { %4699 = vmatpush1.bf16.msra.mxu1 %v5766_v58 }
0x10d7   :  { %4749 = vmatprep.subr.bf16.mxu1 %v5887_v0 }
0x10d9   :  { %4326 = vmatmul.mubr.msk.f32.vlgmr.msra.gmra.mrb[12].mxu1 %vm105_vm0, %v2437_v18  ;;  %v2991_v18 = vld [vmem:[#allocation6 + $0x50] sm:$0xff] }
0x10da   :  { %3061 = vmatprep.mubr.f32.mxu1 %v5261_v1  ;;  %4751 = vmatpush1.bf16.msra.mxu1 %v5889_v6  ;;  %v5901_v14 = vpack.c.bf16 %v2991_v18, %v2989_v8  ;;  %v5964_v8 = vpack.c.bf16 %v3074_v22, %v3072_v27  ;;  %v5967_v18 = vpack.c.bf16 %v3079_v33, %v3077_v32 }
0x10db   :  { %4753 = vmatprep.subr.bf16.mxu1 %v5891_v13 }
0x10de   :  { %4755 = vmatpush1.bf16.msra.mxu1 %v5895_v39 }
0x10df   :  { %4757 = vmatprep.subr.bf16.mxu1 %v5898_v43 }
0x10e2   :  { %4759 = vmatpush1.bf16.msra.mxu1 %v5901_v14 }
0x10e3   :  { %4761 = vmatprep.subr.bf16.mxu1 %v5904_v51 }
0x1170   :  { %v2656_v11 = vpop.f32.mrb[14].mxu0 }
0x1171   :  { %v2658_v16 = vpop.f32.mrb[15].mxu0 }
0x1172   :  { %v2755_v23 = vcombine.low %v2656_v11, %v2658_v16  ;;  %v2993_v16 = vld [vmem:[#allocation6 + $0x60] sm:$0xff] }
0x1174   :  { %v2762_v40 = vrot.slane %v2755_v23, %v5425_v34  ;;  %v2995_v23 = vld [vmem:[#allocation6 + $0x70] sm:$0xff] }
0x1176   :  { %v2764_v17 = vadd.f32 %v2762_v40, %v2752_v24  ;;  %v5911_v24 = vpack.c.bf16 %v2995_v23, %v2993_v16  ;;  %v5970_v16 = vpack.c.bf16 %v3078_v15, %v3076_v25 }
0x1178   :  { %2772 = vrot.lane.b32.xlu0 %v2764_v17, %s5257_s3  ;;  %v4331_v34 = vmul.f32 -1.442695, %v2764_v17  ;;  %4763 = vmatpush1.bf16.msra.mxu1 %v5911_v24 }
0x11ac   :  { %v2523_v28 = vpop.f32.mrb[12].mxu1 }
0x11ad   :  { %v2540_v46 = vadd.f32 %v2533_v38, %v2523_v28  ;;  %v2525_v9 = vpop.f32.mrb[13].mxu1 }
0x11ae   :  { %v5881_v30 = vadd.f32 %v2537_v26, %v2525_v9 }
0x11af   :  { %v4327_v35 = vmul.f32 -1.442695, %v2540_v46 }
0x11b0   :  { %5055 = vtanh.f32 %v5881_v30  ;;  %v4328_v9 = vmul.f32 -1.442695, %v5881_v30 }
0x11b1   :  { %5057 = vpow2.f32 %v4331_v34 }
0x11ba   :  { %v5056_v49 = vpop.eup %5055 }
0x11bb   :  { %2557 = vrot.lane.b32.xlu1 %v5056_v49, %s5257_s3  ;;  %v5058_v63 = vpop.eup %5057 }
0x11bc   :  { %v2768_v52 = vadd.f32 1.0, %v5058_v63 }
0x11be   :  { %5059 = vrcp.f32 %v2768_v52 }
0x11c8   :  { %v5060_v62 = vpop.eup %5059 }
0x11c9   :  { %v2777_v12 = vmul.f32 %v5060_v62, %v5843_v21  ;;  %v2786_v26 = vrot.slane %v5060_v62, 2 }
0x11ea   :  { %v2773_v48 = vpop.permute.xlu0 %2772 }
0x11eb   :  { %v2774_v7 = vrot.slane %v2773_v48, 2 }
0x11ed   :  { %5061 = vtanh.f32 %v2774_v7 }
0x11ee   :  { %5063 = vpow2.f32 %v4327_v35 }
0x11f7   :  { %v5062_v56 = vpop.eup %5061 }
0x11f8   :  { %v2778_v31 = vmul.f32 %v5062_v56, %v5060_v62  ;;  %v5064_v19 = vpop.eup %5063 }
0x11f9   :  { %v2548_v36 = vadd.f32 1.0, %v5064_v19 }
0x11fa   :  { %2780 = vrot.lane.b32.xlu0 %v2778_v31, %s5257_s3 }
0x11fb   :  { %5065 = vrcp.f32 %v2548_v36 }
0x1205   :  { %v5066_v37 = vpop.eup %5065 }
0x1206   :  { %v2555_v17 = vmul.f32 %v5066_v37, %v5848_v2 }
0x122d   :  { %v2558_v41 = vpop.permute.xlu1 %2557 }
0x122e   :  { %v2560_v42 = vmul.f32 %v5066_v37, %v2558_v41  ;;  %v3069_v37 = vld [vmem:[#allocation9 + $0x8] sm:$0xff]  ;;  %v3071_v41 = vld [vmem:[#allocation9 + $0x18] sm:$0xff] }
0x122f   :  { %v5955_v44 = vpack.c.bf16 %v3071_v41, %v3069_v37 }
0x1230   :  { %2562 = vrot.lane.b32.xlu1 %v2560_v42, %s5257_s3  ;;  %v3068_v42 = vld [vmem:[#allocation9] sm:$0xff] }
0x1231   :  { %v5957_v3 = vpack.c.bf16 %v3070_v57, %v3068_v42  ;;  %4765 = vmatprep.subr.bf16.mxu1 %v5955_v44 }
0x126c   :  { %v2781_v50 = vpop.permute.xlu0 %2780 }
0x126d   :  { %v5909_v11 = vadd.f32 %v2781_v50, %v2777_v12  ;;  %v3081_v12 = vld [vmem:[#allocation9 + $0x68] sm:$0xff]  ;;  %v3083_v50 = vld [vmem:[#allocation9 + $0x78] sm:$0xff] }
0x126e   :  { %v5973_v23 = vpack.c.bf16 %v3083_v50, %v3081_v12  ;;  %v3191_v12 = vld [vmem:[#allocation8 + $0x8] sm:$0xff]  ;;  %v3193_v50 = vld [vmem:[#allocation8 + $0x18] sm:$0xff] }
0x126f   :  { %5067 = vtanh.f32 %v5909_v11 }
0x1279   :  { %v5068_v40 = vpop.eup %5067 }
0x127a   :  { %2789 = vrot.lane.b32.xlu0 %v5068_v40, %s5257_s3  ;;  %v3080_v40 = vld [vmem:[#allocation9 + $0x60] sm:$0xff] }
0x12a2   :  { %v2563_v20 = vpop.permute.xlu1 %2562 }
0x12a3   :  { %v5917_v38 = vadd.f32 %v2563_v20, %v2555_v17  ;;  %v3082_v17 = vld [vmem:[#allocation9 + $0x70] sm:$0xff] }
0x12a4   :  { %v5976_v20 = vpack.c.bf16 %v3082_v17, %v3080_v40  ;;  %v3190_v40 = vld [vmem:[#allocation8] sm:$0xff]  ;;  %v3195_v17 = vld [vmem:[#allocation8 + $0x28] sm:$0xff] }
0x12a5   :  { %5069 = vtanh.f32 %v5917_v38 }
0x12a6   :  { %5071 = vpow2.f32 %v4328_v9 }
0x12af   :  { %v5070_v21 = vpop.eup %5069 }
0x12b0   :  { %2568 = vrot.lane.b32.xlu1 %v5070_v21, %s5257_s3  ;;  %v5072_v49 = vpop.eup %5071 }
0x12b1   :  { %v2549_v2 = vadd.f32 1.0, %v5072_v49 }
0x12b3   :  { %5073 = vrcp.f32 %v2549_v2 }
0x12bd   :  { %v5074_v34 = vpop.eup %5073 }
0x12ec   :  { %v2790_v28 = vpop.permute.xlu0 %2789 }
0x12ed   :  { %v2792_v46 = vmul.f32 %v2790_v28, %v2786_v26 }
0x12ef   :  { %4337 = vmatmul.mubr.msk.f32.vlgmr.msra.gmra.mrb[14].mxu1 %vm105_vm0, %v2792_v46 }
0x12f0   :  { %3151 = vmatprep.mubr.f32.mxu1 %v5261_v1  ;;  %4767 = vmatpush1.bf16.msra.mxu1 %v5957_v3 }
0x12f1   :  { %4769 = vmatprep.subr.bf16.mxu1 %v5959_v61 }
0x12f4   :  { %4771 = vmatpush1.bf16.msra.mxu1 %v5964_v8 }
0x12f5   :  { %4773 = vmatprep.subr.bf16.mxu1 %v5967_v18 }
0x12f8   :  { %4775 = vmatpush1.bf16.msra.mxu1 %v5970_v16 }
0x12f9   :  { %4777 = vmatprep.subr.bf16.mxu1 %v5973_v23 }
0x12fc   :  { %4779 = vmatpush1.bf16.msra.mxu1 %v5976_v20 }
0x1322   :  { %v2569_v63 = vpop.permute.xlu1 %2568 }
0x1323   :  { %v2571_v52 = vmul.f32 %v5074_v34, %v2569_v63 }
0x1325   :  { %2573 = vst.msk [vmem:[#allocation2 + $0xc] sm:$0x3] %vm442_vm1, %v2571_v52  ;;  %4330 = vmatmul.mubr.msk.f32.vlgmr.msra.gmra.mrb[16].mxu0 %vm105_vm0, %v2571_v52 }
0x1326   :  { %4735 = vmatpush1.bf16.msra.mxu0 %v5746_v54  ;;  %2876 = vmatprep.mubr.f32.mxu0 %v5261_v1 }
0x1327   :  { %4737 = vmatprep.subr.bf16.mxu0 %v5748_v59 }
0x132a   :  { %4739 = vmatpush1.bf16.msra.mxu0 %v5753_v5  ;;  %v2883_v5 = vld [vmem:[%s6257_s5] sm:$0x3] }
0x132b   :  { %4741 = vmatprep.subr.bf16.mxu0 %v5757_v55  ;;  %v2888_v55 = vrot.slane %v2883_v5, %v5512_v45 }
0x132e   :  { %4743 = vmatpush1.bf16.msra.mxu0 %v5760_v10  ;;  %v2892_v10 = vrot.slane %v2883_v5, %v5515_v53 }
0x132f   :  { %4745 = vmatprep.subr.bf16.mxu0 %v5763_v4 }
0x1332   :  { %4747 = vmatpush1.bf16.msra.mxu0 %v5766_v58 }
0x1333   :  { %4797 = vmatprep.subr.bf16.mxu0 %v5887_v0 }
0x1335   :  { %4332 = vmatmul.mubr.msk.f32.vlgmr.msra.gmra.mrb[16].mxu0 %vm105_vm0, %v2792_v46 }
0x1336   :  { %4799 = vmatpush1.bf16.msra.mxu0 %v5889_v6  ;;  %3458 = vmatprep.mubr.f32.mxu0 %v5261_v1 }
0x1337   :  { %4801 = vmatprep.subr.bf16.mxu0 %v5891_v13 }
0x133a   :  { %4803 = vmatpush1.bf16.msra.mxu0 %v5895_v39 }
0x133b   :  { %4805 = vmatprep.subr.bf16.mxu0 %v5898_v43 }
0x133e   :  { %4807 = vmatpush1.bf16.msra.mxu0 %v5901_v14 }
0x133f   :  { %4809 = vmatprep.subr.bf16.mxu0 %v5904_v51 }
0x1342   :  { %4811 = vmatpush1.bf16.msra.mxu0 %v5911_v24 }
0x1343   :  { %4813 = vmatprep.subr.bf16.mxu0 %v5955_v44 }
0x13c2   :  { %v5944_v54 = vpop.f32.mrb[14].mxu1 }
0x13c3   :  { %v5946_v59 = vpop.f32.mrb[15].mxu1 }
0x1408   :  { %v2878_v4 = vpop.f32.mrb[16].mxu0 }
0x1409   :  { %v2895_v58 = vadd.f32 %v2888_v55, %v2878_v4  ;;  %v2880_v30 = vpop.f32.mrb[17].mxu0  ;;  %v5995_v4 = vld [vmem:[#allocation3] ss:$0 sm:$0xff] }
0x140a   :  { %v2896_v48 = vadd.f32 %v2892_v10, %v2880_v30  ;;  %v5263_v10 = vmov 0  }
0x140b   :  { %v4333_v62 = vmul.f32 -1.442695, %v2895_v58  ;;  %4925 = vset.pattern.permute.xlu1 %v5263_v10  ;;  %4926 = vset.pattern.permute.xlu0 %v5263_v10  ;;  %v3203_v10 = vld [vmem:[#allocation8 + $0x68] sm:$0xff] }
0x140c   :  { %5075 = vtanh.f32 %v2896_v48  ;;  %v4334_v9 = vmul.f32 -1.442695, %v2896_v48  ;;  %v2948_v48 = vld [vmem:[%s6253_s1] sm:$0x3] }
0x140d   :  { %5077 = vpow2.f32 %v4333_v62  ;;  %v2958_v62 = vrot.slane %v2948_v48, %v5512_v45 }
0x1416   :  { %v5076_v7 = vpop.eup %5075 }
0x1417   :  { %2912 = vrot.lane.b32.xlu1 %v5076_v7, %s5257_s3  ;;  %v5078_v56 = vpop.eup %5077  ;;  %v2967_v7 = vld [vmem:[%s6254_s2] sm:$0x3] }
0x1418   :  { %v2903_v31 = vadd.f32 1.0, %v5078_v56  ;;  %v2962_v56 = vrot.slane %v2948_v48, %v5515_v53 }
0x141a   :  { %5079 = vrcp.f32 %v2903_v31  ;;  %v2972_v31 = vrot.slane %v2967_v7, %v5512_v45 }
0x1424   :  { %v5080_v35 = vpop.eup %5079 }
0x1425   :  { %v2910_v21 = vmul.f32 %v5080_v35, %v5917_v38  ;;  %v5988_v38 = vld [vmem:[%s6259_s7] ss:$0 sm:$0xff] }
0x1489   :  { %v2913_v19 = vpop.permute.xlu1 %2912 }
0x148a   :  { %v2915_v36 = vmul.f32 %v5080_v35, %v2913_v19  ;;  %v2976_v35 = vrot.slane %v2967_v7, %v5515_v53  ;;  %v3202_v7 = vld [vmem:[#allocation8 + $0x60] sm:$0xff] }
0x148c   :  { %2917 = vrot.lane.b32.xlu0 %v2915_v36, %s5257_s3 }
0x14fe   :  { %v2918_v26 = vpop.permute.xlu0 %2917 }
0x14ff   :  { %v5981_v28 = vadd.f32 %v2918_v26, %v2910_v21  ;;  %v3197_v21 = vld [vmem:[#allocation8 + $0x38] sm:$0xff] }
0x1501   :  { %5081 = vtanh.f32 %v5981_v28 }
0x1502   :  { %5083 = vpow2.f32 %v4334_v9  ;;  %v3194_v9 = vld [vmem:[#allocation8 + $0x20] sm:$0xff] }
0x150b   :  { %v5082_v46 = vpop.eup %5081 }
0x150c   :  { %2923 = vrot.lane.b32.xlu1 %v5082_v46, %s5257_s3  ;;  %v5084_v49 = vpop.eup %5083  ;;  %v6016_v46 = vpack.c.bf16 %v3197_v21, %v3195_v17 }
0x150d   :  { %v2904_v2 = vadd.f32 1.0, %v5084_v49  ;;  %v3196_v49 = vld [vmem:[#allocation8 + $0x30] sm:$0xff] }
0x150f   :  { %5085 = vrcp.f32 %v2904_v2  ;;  %v3199_v2 = vld [vmem:[#allocation8 + $0x48] sm:$0xff] }
0x1519   :  { %v5086_v34 = vpop.eup %5085 }
0x157e   :  { %v2924_v63 = vpop.permute.xlu1 %2923 }
0x157f   :  { %v2926_v52 = vmul.f32 %v5086_v34, %v2924_v63  ;;  %v3201_v34 = vld [vmem:[#allocation8 + $0x58] sm:$0xff]  ;;  %v6020_v63 = vpack.c.bf16 %v3196_v49, %v3194_v9 }
0x1581   :  { %2928 = vst.msk [vmem:[#allocation2 + $0xe] sm:$0x3] %vm442_vm1, %v2926_v52  ;;  %4338 = vmatmul.mubr.msk.f32.vlgmr.msra.gmra.mrb[16].mxu1 %vm105_vm0, %v2926_v52  ;;  %v2936_v5 = vmul.f32 %v5988_v38, %v2926_v52  ;;  %v6023_v52 = vpack.c.bf16 %v3201_v34, %v3199_v2 }
0x1582   :  { %3273 = vmatprep.mubr.f32.mxu1 %v5261_v1 }
0x1583   :  { %v2937_v55 = vsel %vm442_vm1, %v2936_v5, 0.0  ;;  %v3198_v5 = vld [vmem:[#allocation8 + $0x40] sm:$0xff] }
0x1584   :  { %2938 = vadd.xlane.f32.xlu0 %v2937_v55  ;;  %v3200_v55 = vld [vmem:[#allocation8 + $0x50] sm:$0xff] }
0x1611   :  { %v2939_v58 = vpop.xlane.xlu0 %2938 }
0x1612   :  { %v2947_v30 = vadd.f32 %v5995_v4, %v2939_v58  ;;  %v3205_v58 = vld [vmem:[#allocation8 + $0x78] sm:$0xff] }
0x1613   :  { %v6029_v48 = vpack.c.bf16 %v3205_v58, %v3203_v10  ;;  %v3345_v58 = vld [vmem:[%s6253_s1] sm:$0x3] }
0x1614   :  { %2951 = vperm.xlu1 %4925, %v2947_v30   ;;  %v6026_v30 = vpack.c.bf16 %v3200_v55, %v3198_v5 }
0x1693   :  { %v2952_v19 = vpop.permute.xlu1 %2951 }
0x1694   :  { %v2965_v36 = vmul.f32 %v2958_v62, %v2952_v19  ;;  %v2966_v37 = vmul.f32 %v2962_v56, %v2952_v19  ;;  %v3204_v62 = vld [vmem:[#allocation8 + $0x70] sm:$0xff] }
0x1695   :  { %v6032_v56 = vpack.c.bf16 %v3204_v62, %v3202_v7  ;;  %v3364_v7 = vld [vmem:[%s6254_s2] sm:$0x3]  ;;  %v3355_v62 = vrot.slane %v3345_v58, %v5512_v45 }
0x1696   :  { %v2979_v41 = vadd.f32 %v2972_v31, %v2965_v36  ;;  %v2980_v42 = vadd.f32 %v2976_v35, %v2966_v37 }
0x1698   :  { %v3158_v57 = vadd.f32 %v5944_v54, %v2979_v41  ;;  %v3159_v60 = vadd.f32 %v5946_v59, %v2980_v42  ;;  %v6012_v54 = vpack.c.bf16 %v3193_v50, %v3191_v12  ;;  %v3192_v59 = vld [vmem:[#allocation8 + $0x10] sm:$0xff] }
0x1699   :  { %v6014_v26 = vpack.c.bf16 %v3192_v59, %v3190_v40 }
0x169a   :  { %5087 = vtanh.f32 %v3159_v60  ;;  %v4339_v27 = vmul.f32 -1.442695, %v3158_v57  ;;  %4781 = vmatprep.subr.bf16.mxu1 %v6012_v54  ;;  %v4340_v37 = vmul.f32 -1.442695, %v3159_v60 }
0x169b   :  { %4783 = vmatpush1.bf16.msra.mxu1 %v6014_v26 }
0x169c   :  { %5089 = vpow2.f32 %v4339_v27  ;;  %4785 = vmatprep.subr.bf16.mxu1 %v6016_v46 }
0x169f   :  { %4787 = vmatpush1.bf16.msra.mxu1 %v6020_v63 }
0x16a0   :  { %4789 = vmatprep.subr.bf16.mxu1 %v6023_v52 }
0x16a3   :  { %4791 = vmatpush1.bf16.msra.mxu1 %v6026_v30 }
0x16a4   :  { %v5088_v47 = vpop.eup %5087  ;;  %4793 = vmatprep.subr.bf16.mxu1 %v6029_v48 }
0x16a5   :  { %3175 = vrot.lane.b32.xlu1 %v5088_v47, %s5257_s3 }
0x16a6   :  { %v5090_v22 = vpop.eup %5089 }
0x16a7   :  { %v3166_v32 = vadd.f32 1.0, %v5090_v22  ;;  %4795 = vmatpush1.bf16.msra.mxu1 %v6032_v56 }
0x16a8   :  { %4845 = vmatprep.subr.bf16.mxu1 %v5887_v0  ;;  %v3280_v0 = vld [vmem:[%s6257_s5] sm:$0x3] }
0x16a9   :  { %5091 = vrcp.f32 %v3166_v32 }
0x16b3   :  { %v5092_v33 = vpop.eup %5091 }
0x16b4   :  { %v3173_v31 = vmul.f32 %v5092_v33, %v5909_v11 }
0x1717   :  { %v3176_v25 = vpop.permute.xlu1 %3175 }
0x1718   :  { %v3178_v15 = vmul.f32 %v5092_v33, %v3176_v25 }
0x171a   :  { %3180 = vrot.lane.b32.xlu1 %v3178_v15, %s5257_s3 }
0x178c   :  { %v3181_v35 = vpop.permute.xlu1 %3180 }
0x178d   :  { %v6038_v19 = vadd.f32 %v3181_v35, %v3173_v31  ;;  %v3359_v31 = vrot.slane %v3345_v58, %v5515_v53  ;;  %v3369_v35 = vrot.slane %v3364_v7, %v5512_v45 }
0x178f   :  { %5093 = vtanh.f32 %v6038_v19 }
0x1790   :  { %5095 = vpow2.f32 %v4340_v37 }
0x1799   :  { %v5094_v36 = vpop.eup %5093 }
0x179a   :  { %3186 = vrot.lane.b32.xlu1 %v5094_v36, %s5257_s3  ;;  %v5096_v41 = vpop.eup %5095  ;;  %v3373_v36 = vrot.slane %v3364_v7, %v5515_v53 }
0x179b   :  { %v3167_v42 = vadd.f32 1.0, %v5096_v41 }
0x179d   :  { %5097 = vrcp.f32 %v3167_v42 }
0x17a7   :  { %v5098_v57 = vpop.eup %5097 }
0x180c   :  { %v3187_v47 = vpop.permute.xlu1 %3186 }
0x180d   :  { %v3189_v27 = vmul.f32 %v5098_v57, %v3187_v47 }
0x180f   :  { %4341 = vmatmul.mubr.msk.f32.vlgmr.msra.gmra.mrb[16].mxu1 %vm105_vm0, %v3189_v27  ;;  %4346 = vmatmul.mubr.msk.f32.vlgmr.msra.gmra.mrb[18].mxu0 %vm105_vm0, %v3189_v27 }
0x1810   :  { %4815 = vmatpush1.bf16.msra.mxu0 %v5957_v3  ;;  %3548 = vmatprep.mubr.f32.mxu0 %v5261_v1 }
0x1811   :  { %4817 = vmatprep.subr.bf16.mxu0 %v5959_v61  ;;  %4847 = vmatpush1.bf16.msra.mxu1 %v5889_v6  ;;  %v3285_v6 = vrot.slane %v3280_v0, %v5512_v45 }
0x1812   :  { %4849 = vmatprep.subr.bf16.mxu1 %v5891_v13  ;;  %3855 = vmatprep.mubr.f32.mxu1 %v5261_v1  ;;  %v3289_v13 = vrot.slane %v3280_v0, %v5515_v53 }
0x1814   :  { %4819 = vmatpush1.bf16.msra.mxu0 %v5964_v8 }
0x1815   :  { %4821 = vmatprep.subr.bf16.mxu0 %v5967_v18  ;;  %4851 = vmatpush1.bf16.msra.mxu1 %v5895_v39 }
0x1816   :  { %4853 = vmatprep.subr.bf16.mxu1 %v5898_v43 }
0x1818   :  { %4823 = vmatpush1.bf16.msra.mxu0 %v5970_v16 }
0x1819   :  { %4825 = vmatprep.subr.bf16.mxu0 %v5973_v23  ;;  %4855 = vmatpush1.bf16.msra.mxu1 %v5901_v14 }
0x181a   :  { %4857 = vmatprep.subr.bf16.mxu1 %v5904_v51 }
0x181c   :  { %4827 = vmatpush1.bf16.msra.mxu0 %v5976_v20 }
0x181d   :  { %4829 = vmatprep.subr.bf16.mxu0 %v6012_v54  ;;  %4859 = vmatpush1.bf16.msra.mxu1 %v5911_v24 }
0x181e   :  { %4861 = vmatprep.subr.bf16.mxu1 %v5955_v44 }
0x18e2   :  { %v3275_v39 = vpop.f32.mrb[16].mxu1  ;;  %v3460_v43 = vpop.f32.mrb[18].mxu0 }
0x18e3   :  { %v3292_v14 = vadd.f32 %v3285_v6, %v3275_v39  ;;  %v3277_v51 = vpop.f32.mrb[17].mxu1  ;;  %v3462_v11 = vpop.f32.mrb[19].mxu0 }
0x18e4   :  { %v3293_v60 = vadd.f32 %v3289_v13, %v3277_v51 }
0x18e5   :  { %v4342_v24 = vmul.f32 -1.442695, %v3292_v14 }
0x18e6   :  { %5099 = vtanh.f32 %v3293_v60  ;;  %v4343_v17 = vmul.f32 -1.442695, %v3293_v60 }
0x18e7   :  { %5101 = vpow2.f32 %v4342_v24 }
0x18f0   :  { %v5100_v22 = vpop.eup %5099 }
0x18f1   :  { %3309 = vrot.lane.b32.xlu1 %v5100_v22, %s5257_s3  ;;  %v5102_v44 = vpop.eup %5101 }
0x18f2   :  { %v3300_v32 = vadd.f32 1.0, %v5102_v44 }
0x18f4   :  { %5103 = vrcp.f32 %v3300_v32 }
0x18fe   :  { %v5104_v33 = vpop.eup %5103 }
0x18ff   :  { %v3307_v12 = vmul.f32 %v5104_v33, %v5981_v28 }
0x1963   :  { %v3310_v25 = vpop.permute.xlu1 %3309 }
0x1964   :  { %v3312_v15 = vmul.f32 %v5104_v33, %v3310_v25 }
0x1966   :  { %3314 = vrot.lane.b32.xlu1 %v3312_v15, %s5257_s3 }
0x19d8   :  { %v3315_v50 = vpop.permute.xlu1 %3314 }
0x19d9   :  { %v6070_v40 = vadd.f32 %v3315_v50, %v3307_v12 }
0x19db   :  { %5105 = vtanh.f32 %v6070_v40 }
0x19dc   :  { %5107 = vpow2.f32 %v4343_v17 }
0x19e5   :  { %v5106_v59 = vpop.eup %5105 }
0x19e6   :  { %3320 = vrot.lane.b32.xlu1 %v5106_v59, %s5257_s3  ;;  %v5108_v21 = vpop.eup %5107 }
0x19e7   :  { %v3301_v9 = vadd.f32 1.0, %v5108_v21 }
0x19e9   :  { %5109 = vrcp.f32 %v3301_v9 }
0x19f3   :  { %v5110_v49 = vpop.eup %5109 }
0x1a58   :  { %v3321_v2 = vpop.permute.xlu1 %3320 }
0x1a59   :  { %v3323_v34 = vmul.f32 %v5110_v49, %v3321_v2 }
0x1a5b   :  { %3325 = vst.msk [vmem:[#allocation2 + $0x10] sm:$0x3] %vm442_vm1, %v3323_v34  ;;  %4347 = vmatmul.mubr.msk.f32.vlgmr.msra.gmra.mrb[20].mxu0 %vm105_vm0, %v3323_v34  ;;  %v3333_v28 = vmul.f32 %v5988_v38, %v3323_v34 }
0x1a5c   :  { %4831 = vmatpush1.bf16.msra.mxu0 %v6014_v26  ;;  %3670 = vmatprep.mubr.f32.mxu0 %v5261_v1 }
0x1a5d   :  { %v3334_v5 = vsel %vm442_vm1, %v3333_v28, 0.0  ;;  %4833 = vmatprep.subr.bf16.mxu0 %v6016_v46 }
0x1a5e   :  { %3335 = vadd.xlane.f32.xlu1 %v3334_v5 }
0x1a60   :  { %4835 = vmatpush1.bf16.msra.mxu0 %v6020_v63 }
0x1a61   :  { %4837 = vmatprep.subr.bf16.mxu0 %v6023_v52 }
0x1a64   :  { %4839 = vmatpush1.bf16.msra.mxu0 %v6026_v30 }
0x1a65   :  { %4841 = vmatprep.subr.bf16.mxu0 %v6029_v48 }
0x1a68   :  { %4843 = vmatpush1.bf16.msra.mxu0 %v6032_v56 }
0x1aeb   :  { %v3336_v55 = vpop.xlane.xlu1 %3335 }
0x1aec   :  { %v3344_v10 = vadd.f32 %v5995_v4, %v3336_v55 }
0x1aee   :  { %3348 = vperm.xlu0 %4926, %v3344_v10  }
0x1b6d   :  { %v3349_v37 = vpop.permute.xlu0 %3348 }
0x1b6e   :  { %v3362_v41 = vmul.f32 %v3355_v62, %v3349_v37  ;;  %v3363_v42 = vmul.f32 %v3359_v31, %v3349_v37  ;;  %v4121_v37 = vld [vmem:[#allocation2 + $0x2] sm:$0x3] }
0x1b70   :  { %v3376_v57 = vadd.f32 %v3369_v35, %v3362_v41  ;;  %v3377_v47 = vadd.f32 %v3373_v36, %v3363_v42  ;;  %v4139_v42 = vmul.f32 %v5988_v38, %v4121_v37 }
0x1b72   :  { %v3555_v27 = vadd.f32 %v3460_v43, %v3376_v57  ;;  %v3556_v0 = vadd.f32 %v3462_v11, %v3377_v47  ;;  %v4122_v57 = vld [vmem:[#allocation2 + $0x4] sm:$0x3]  ;;  %v4152_v47 = vsel %vm442_vm1, %v4139_v42, 0.0 }
0x1b74   :  { %5111 = vtanh.f32 %v3556_v0  ;;  %v4348_v13 = vmul.f32 -1.442695, %v3555_v27  ;;  %v4349_v11 = vmul.f32 -1.442695, %v3556_v0  ;;  %v4140_v27 = vmul.f32 %v5988_v38, %v4122_v57 }
0x1b76   :  { %5113 = vpow2.f32 %v4348_v13 }
0x1b7e   :  { %v5112_v6 = vpop.eup %5111 }
0x1b7f   :  { %3572 = vrot.lane.b32.xlu1 %v5112_v6, %s5257_s3 }
0x1b80   :  { %v5114_v39 = vpop.eup %5113 }
0x1b81   :  { %v3563_v14 = vadd.f32 1.0, %v5114_v39  ;;  %v4126_v39 = vld [vmem:[#allocation2 + $0xc] sm:$0x3] }
0x1b83   :  { %5115 = vrcp.f32 %v3563_v14 }
0x1b8d   :  { %v5116_v51 = vpop.eup %5115 }
0x1b8e   :  { %v3570_v24 = vmul.f32 %v5116_v51, %v6038_v19 }
0x1bf1   :  { %v3573_v60 = vpop.permute.xlu1 %3572 }
0x1bf2   :  { %v3575_v22 = vmul.f32 %v5116_v51, %v3573_v60  ;;  %v4128_v51 = vld [vmem:[#allocation2 + $0x10] sm:$0x3] }
0x1bf3   :  { %v4146_v60 = vmul.f32 %v5988_v38, %v4128_v51 }
0x1bf4   :  { %3577 = vrot.lane.b32.xlu0 %v3575_v22, %s5257_s3 }
0x1c66   :  { %v3578_v44 = vpop.permute.xlu0 %3577 }
0x1c67   :  { %v6100_v32 = vadd.f32 %v3578_v44, %v3570_v24  ;;  %v4173_v24 = vsel %vm442_vm1, %v4146_v60, 0.0 }
0x1c69   :  { %5117 = vtanh.f32 %v6100_v32 }
0x1c6a   :  { %5119 = vpow2.f32 %v4349_v11 }
0x1c73   :  { %v5118_v43 = vpop.eup %5117 }
0x1c74   :  { %3583 = vrot.lane.b32.xlu0 %v5118_v43, %s5257_s3  ;;  %v5120_v33 = vpop.eup %5119  ;;  %v4127_v43 = vld [vmem:[#allocation2 + $0xe] sm:$0x3] }
0x1c75   :  { %v3564_v25 = vadd.f32 1.0, %v5120_v33  ;;  %v4145_v33 = vmul.f32 %v5988_v38, %v4127_v43 }
0x1c77   :  { %5121 = vrcp.f32 %v3564_v25  ;;  %v4170_v25 = vsel %vm442_vm1, %v4145_v33, 0.0 }
0x1c81   :  { %v5122_v15 = vpop.eup %5121 }
0x1ce6   :  { %v3584_v12 = vpop.permute.xlu0 %3583 }
0x1ce7   :  { %v3586_v50 = vmul.f32 %v5122_v15, %v3584_v12 }
0x1ce9   :  { %4350 = vmatmul.mubr.msk.f32.vlgmr.msra.gmra.mrb[20].mxu0 %vm105_vm0, %v3586_v50  ;;  %4355 = vmatmul.mubr.msk.f32.vlgmr.msra.gmra.mrb[18].mxu1 %vm105_vm0, %v3586_v50 }
0x1cea   :  { %4863 = vmatpush1.bf16.msra.mxu1 %v5957_v3  ;;  %3945 = vmatprep.mubr.f32.mxu1 %v5261_v1  ;;  %v3677_v3 = vld [vmem:[%s6257_s5] sm:$0x3] }
0x1ceb   :  { %4865 = vmatprep.subr.bf16.mxu1 %v5959_v61  ;;  %v3682_v19 = vrot.slane %v3677_v3, %v5512_v45  ;;  %v3686_v61 = vrot.slane %v3677_v3, %v5515_v53 }
0x1cee   :  { %4867 = vmatpush1.bf16.msra.mxu1 %v5964_v8 }
0x1cef   :  { %4869 = vmatprep.subr.bf16.mxu1 %v5967_v18 }
0x1cf2   :  { %4871 = vmatpush1.bf16.msra.mxu1 %v5970_v16 }
0x1cf3   :  { %4873 = vmatprep.subr.bf16.mxu1 %v5973_v23 }
0x1cf6   :  { %4875 = vmatpush1.bf16.msra.mxu1 %v5976_v20 }
0x1cf7   :  { %4877 = vmatprep.subr.bf16.mxu1 %v6012_v54 }
0x1dbc   :  { %v3672_v59 = vpop.f32.mrb[20].mxu0  ;;  %v6120_v8 = vpop.f32.mrb[18].mxu1 }
0x1dbd   :  { %v3689_v18 = vadd.f32 %v3682_v19, %v3672_v59  ;;  %v3674_v17 = vpop.f32.mrb[21].mxu0  ;;  %v6122_v16 = vpop.f32.mrb[19].mxu1 }
0x1dbe   :  { %v3690_v23 = vadd.f32 %v3686_v61, %v3674_v17 }
0x1dbf   :  { %v4351_v54 = vmul.f32 -1.442695, %v3689_v18 }
0x1dc0   :  { %5123 = vtanh.f32 %v3690_v23  ;;  %v4352_v58 = vmul.f32 -1.442695, %v3690_v23 }
0x1dc1   :  { %5125 = vpow2.f32 %v4351_v54 }
0x1dca   :  { %v5124_v20 = vpop.eup %5123 }
0x1dcb   :  { %3706 = vrot.lane.b32.xlu1 %v5124_v20, %s5257_s3  ;;  %v5126_v21 = vpop.eup %5125 }
0x1dcc   :  { %v3697_v9 = vadd.f32 1.0, %v5126_v21 }
0x1dce   :  { %5127 = vrcp.f32 %v3697_v9 }
0x1dd8   :  { %v5128_v49 = vpop.eup %5127 }
0x1dd9   :  { %v3704_v28 = vmul.f32 %v5128_v49, %v6070_v40 }
0x1e3d   :  { %v3707_v2 = vpop.permute.xlu1 %3706 }
0x1e3e   :  { %v3709_v34 = vmul.f32 %v5128_v49, %v3707_v2 }
0x1e40   :  { %3711 = vrot.lane.b32.xlu0 %v3709_v34, %s5257_s3  ;;  %v3742_v34 = vld [vmem:[%s6253_s1] sm:$0x3] }
0x1eb2   :  { %v3712_v5 = vpop.permute.xlu0 %3711 }
0x1eb3   :  { %v6127_v55 = vadd.f32 %v3712_v5, %v3704_v28  ;;  %v3761_v28 = vld [vmem:[%s6254_s2] sm:$0x3]  ;;  %v3752_v5 = vrot.slane %v3742_v34, %v5512_v45 }
0x1eb5   :  { %5129 = vtanh.f32 %v6127_v55 }
0x1eb6   :  { %5131 = vpow2.f32 %v4352_v58  ;;  %v3766_v58 = vrot.slane %v3761_v28, %v5512_v45 }
0x1ebf   :  { %v5130_v10 = vpop.eup %5129 }
0x1ec0   :  { %3717 = vrot.lane.b32.xlu1 %v5130_v10, %s5257_s3  ;;  %v5132_v7 = vpop.eup %5131  ;;  %v3756_v10 = vrot.slane %v3742_v34, %v5515_v53 }
0x1ec1   :  { %v3698_v62 = vadd.f32 1.0, %v5132_v7  ;;  %v3770_v7 = vrot.slane %v3761_v28, %v5515_v53 }
0x1ec3   :  { %5133 = vrcp.f32 %v3698_v62 }
0x1ecd   :  { %v5134_v31 = vpop.eup %5133 }
0x1f32   :  { %v3718_v35 = vpop.permute.xlu1 %3717 }
0x1f33   :  { %v3720_v36 = vmul.f32 %v5134_v31, %v3718_v35 }
0x1f35   :  { %3722 = vst.msk [vmem:[#allocation2 + $0x12] sm:$0x3] %vm442_vm1, %v3720_v36  ;;  %4356 = vmatmul.mubr.msk.f32.vlgmr.msra.gmra.mrb[20].mxu1 %vm105_vm0, %v3720_v36  ;;  %v3730_v40 = vmul.f32 %v5988_v38, %v3720_v36 }
0x1f36   :  { %4879 = vmatpush1.bf16.msra.mxu1 %v6014_v26  ;;  %4067 = vmatprep.mubr.f32.mxu1 %v5261_v1  ;;  %v4123_v26 = vld [vmem:[#allocation2 + $0x6] sm:$0x3]  ;;  %v4155_v1 = vsel %vm442_vm1, %v4140_v27, 0.0 }
0x1f37   :  { %v3731_v41 = vsel %vm442_vm1, %v3730_v40, 0.0  ;;  %4881 = vmatprep.subr.bf16.mxu1 %v6016_v46  ;;  %v4141_v0 = vmul.f32 %v5988_v38, %v4123_v26  ;;  %v4124_v46 = vld [vmem:[#allocation2 + $0x8] sm:$0x3] }
0x1f38   :  { %3732 = vadd.xlane.f32.xlu0 %v3731_v41  ;;  %v4142_v6 = vmul.f32 %v5988_v38, %v4124_v46 }
0x1f3a   :  { %4883 = vmatpush1.bf16.msra.mxu1 %v6020_v63  ;;  %v4158_v63 = vsel %vm442_vm1, %v4141_v0, 0.0  ;;  %v4161_v13 = vsel %vm442_vm1, %v4142_v6, 0.0 }
0x1f3b   :  { %4885 = vmatprep.subr.bf16.mxu1 %v6023_v52  ;;  %v4125_v52 = vld [vmem:[#allocation2 + $0xa] sm:$0x3] }
0x1f3c   :  { %4153 = vadd.xlane.f32.xlu0 %v4152_v47  ;;  %v4129_v22 = vld [vmem:[#allocation2 + $0x12] sm:$0x3] }
0x1f3d   :  { %v4147_v44 = vmul.f32 %v5988_v38, %v4129_v22 }
0x1f3e   :  { %4887 = vmatpush1.bf16.msra.mxu1 %v6026_v30  ;;  %v4143_v30 = vmul.f32 %v5988_v38, %v4125_v52 }
0x1f3f   :  { %4889 = vmatprep.subr.bf16.mxu1 %v6029_v48  ;;  %v4144_v48 = vmul.f32 %v5988_v38, %v4126_v39  ;;  %v4176_v11 = vsel %vm442_vm1, %v4147_v44, 0.0 }
0x1f40   :  { %4156 = vadd.xlane.f32.xlu0 %v4155_v1  ;;  %v4164_v14 = vsel %vm442_vm1, %v4143_v30, 0.0 }
0x1f42   :  { %4891 = vmatpush1.bf16.msra.mxu1 %v6032_v56  ;;  %v4167_v56 = vsel %vm442_vm1, %v4144_v48, 0.0 }
0x1f44   :  { %4159 = vadd.xlane.f32.xlu0 %v4158_v63 }
0x1f48   :  { %4162 = vadd.xlane.f32.xlu0 %v4161_v13 }
0x1f4c   :  { %4165 = vadd.xlane.f32.xlu0 %v4164_v14 }
0x1f50   :  { %4168 = vadd.xlane.f32.xlu0 %v4167_v56 }
0x1f54   :  { %4174 = vadd.xlane.f32.xlu0 %v4173_v24 }
0x1f58   :  { %4177 = vadd.xlane.f32.xlu0 %v4176_v11 }
0x1f5c   :  { %4171 = vadd.xlane.f32.xlu0 %v4170_v25 }
0x1f72   :  { %4189 = vperm.xlu0 %4926, %v5995_v4  }
0x1fc5   :  { %v3733_v15 = vpop.xlane.xlu0 %3732 }
0x1fc6   :  { %v3741_v12 = vadd.f32 %v5995_v4, %v3733_v15 }
0x1fc8   :  { %3745 = vperm.xlu1 %4925, %v3741_v12  }
0x1fc9   :  { %v6163_v50 = vpop.xlane.xlu0 %4153 }
0x1fcd   :  { %v6165_v3 = vpop.xlane.xlu0 %4156 }
0x1fd1   :  { %v6167_v19 = vpop.xlane.xlu0 %4159 }
0x1fd5   :  { %v6169_v61 = vpop.xlane.xlu0 %4162 }
0x1fd9   :  { %v6171_v59 = vpop.xlane.xlu0 %4165 }
0x1fdd   :  { %v6173_v18 = vpop.xlane.xlu0 %4168 }
0x1fe1   :  { %v4175_v17 = vpop.xlane.xlu0 %4174 }
0x1fe5   :  { %v4178_v23 = vpop.xlane.xlu0 %4177 }
0x1fe9   :  { %v6175_v20 = vpop.xlane.xlu0 %4171 }
0x1ff1   :  { %v6177_v54 = vpop.permute.xlu0 %4189 }
0x1ff2   :  { %v4200_v4 = vadd.f32 %v6177_v54, %v4175_v17  ;;  %v4201_v21 = vadd.f32 %v6177_v54, %v4178_v23 }
0x1ff4   :  { %v4251_v9 = vrot.slane %v4200_v4, %v5422_v29  ;;  %v4255_v49 = vrot.slane %v4201_v21, %v5422_v29  ;;  %v4120_v4 = vld [vmem:[#allocation2] sm:$0x3] }
0x1ff5   :  { %v4138_v21 = vmul.f32 %v5988_v38, %v4120_v4 }
0x1ff6   :  { %v6184_v2 = vsel %vm4260_vm2, %v4255_v49, %v4251_v9 }
0x1ff7   :  { %v4149_v9 = vsel %vm442_vm1, %v4138_v21, 0.0 }
0x2047   :  { %v3746_v62 = vpop.permute.xlu1 %3745 }
0x2048   :  { %v3759_v31 = vmul.f32 %v3752_v5, %v3746_v62  ;;  %v3760_v35 = vmul.f32 %v3756_v10, %v3746_v62 }
0x204a   :  { %v3773_v36 = vadd.f32 %v3766_v58, %v3759_v31  ;;  %v3774_v37 = vadd.f32 %v3770_v7, %v3760_v35  ;;  %v4193_v31 = vadd.f32 %v6177_v54, %v6163_v50  ;;  %v4194_v35 = vadd.f32 %v6177_v54, %v6165_v3 }
0x204b   :  { %v4198_v3 = vadd.f32 %v6177_v54, %v6173_v18 }
0x204c   :  { %v3952_v40 = vadd.f32 %v6120_v8, %v3773_v36  ;;  %v3953_v41 = vadd.f32 %v6122_v16, %v3774_v37  ;;  %v4195_v37 = vadd.f32 %v6177_v54, %v6167_v19  ;;  %v4199_v19 = vadd.f32 %v6177_v54, %v6175_v20 }
0x204e   :  { %5135 = vtanh.f32 %v3953_v41  ;;  %v4357_v57 = vmul.f32 -1.442695, %v3952_v40  ;;  %v4358_v6 = vmul.f32 -1.442695, %v3953_v41  ;;  %v4196_v41 = vadd.f32 %v6177_v54, %v6169_v61 }
0x204f   :  { %v4247_v20 = vrot.slane %v4199_v19, %v5422_v29 }
0x2050   :  { %5137 = vpow2.f32 %v4357_v57  ;;  %v4227_v57 = vrot.slane %v4194_v35, %v5422_v29 }
0x2058   :  { %v5136_v42 = vpop.eup %5135 }
0x2059   :  { %3969 = vrot.lane.b32.xlu1 %v5136_v42, %s5257_s3  ;;  %v4223_v42 = vrot.slane %v4193_v31, %v5422_v29 }
0x205a   :  { %v5138_v47 = vpop.eup %5137 }
0x205b   :  { %v3960_v27 = vadd.f32 1.0, %v5138_v47  ;;  %v4231_v47 = vrot.slane %v4195_v37, %v5422_v29 }
0x205d   :  { %5139 = vrcp.f32 %v3960_v27 }
0x2067   :  { %v5140_v26 = vpop.eup %5139 }
0x2068   :  { %v3967_v46 = vmul.f32 %v5140_v26, %v6100_v32  ;;  %v4074_v32 = vld [vmem:[%s6257_s5] sm:$0x3] }
0x2069   :  { %v4079_v48 = vrot.slane %v4074_v32, %v5512_v45  ;;  %v4083_v51 = vrot.slane %v4074_v32, %v5515_v53 }
0x20cb   :  { %v3970_v1 = vpop.permute.xlu1 %3969 }
0x20cc   :  { %v3972_v0 = vmul.f32 %v5140_v26, %v3970_v1  ;;  %v4243_v1 = vrot.slane %v4198_v3, %v5422_v29 }
0x20ce   :  { %3974 = vrot.lane.b32.xlu1 %v3972_v0, %s5257_s3 }
0x2140   :  { %v3975_v63 = vpop.permute.xlu1 %3974 }
0x2141   :  { %v3977_v8 = vadd.f32 %v3975_v63, %v3967_v46 }
0x2143   :  { %5141 = vtanh.f32 %v3977_v8 }
0x2144   :  { %5143 = vpow2.f32 %v4358_v6 }
0x214d   :  { %v5142_v16 = vpop.eup %5141 }
0x214e   :  { %3980 = vrot.lane.b32.xlu1 %v5142_v16, %s5257_s3  ;;  %v5144_v52 = vpop.eup %5143 }
0x214f   :  { %v3961_v13 = vadd.f32 1.0, %v5144_v52 }
0x2151   :  { %5145 = vrcp.f32 %v3961_v13 }
0x215b   :  { %v5146_v30 = vpop.eup %5145 }
0x21c0   :  { %v3981_v39 = vpop.permute.xlu1 %3980 }
0x21c1   :  { %v3983_v14 = vmul.f32 %v5146_v30, %v3981_v39 }
0x21c3   :  { %4359 = vmatmul.mubr.msk.f32.vlgmr.msra.gmra.mrb[20].mxu1 %vm105_vm0, %v3983_v14 }
0x2296   :  { %v4069_v56 = vpop.f32.mrb[20].mxu1 }
0x2297   :  { %v4086_v60 = vadd.f32 %v4079_v48, %v4069_v56  ;;  %v4071_v22 = vpop.f32.mrb[21].mxu1 }
0x2298   :  { %v4087_v24 = vadd.f32 %v4083_v51, %v4071_v22 }
0x2299   :  { %v4360_v43 = vmul.f32 -1.442695, %v4086_v60 }
0x229a   :  { %5147 = vtanh.f32 %v4087_v24  ;;  %v4361_v49 = vmul.f32 -1.442695, %v4087_v24 }
0x229b   :  { %5149 = vpow2.f32 %v4360_v43 }
0x22a4   :  { %v5148_v44 = vpop.eup %5147 }
0x22a5   :  { %4103 = vrot.lane.b32.xlu1 %v5148_v44, %s5257_s3  ;;  %v5150_v11 = vpop.eup %5149 }
0x22a6   :  { %v4094_v33 = vadd.f32 1.0, %v5150_v11 }
0x22a8   :  { %5151 = vrcp.f32 %v4094_v33 }
0x22b2   :  { %v5152_v25 = vpop.eup %5151 }
0x22b3   :  { %v4101_v45 = vmul.f32 %v5152_v25, %v6127_v55 }
0x2317   :  { %v4104_v15 = vpop.permute.xlu1 %4103 }
0x2318   :  { %v4106_v12 = vmul.f32 %v5152_v25, %v4104_v15 }
0x231a   :  { %4108 = vrot.lane.b32.xlu1 %v4106_v12, %s5257_s3 }
0x238c   :  { %v4109_v53 = vpop.permute.xlu1 %4108 }
0x238d   :  { %v4111_v17 = vadd.f32 %v4109_v53, %v4101_v45 }
0x238f   :  { %5153 = vtanh.f32 %v4111_v17 }
0x2390   :  { %5155 = vpow2.f32 %v4361_v49 }
0x2399   :  { %v5154_v23 = vpop.eup %5153 }
0x239a   :  { %4114 = vrot.lane.b32.xlu1 %v5154_v23, %s5257_s3  ;;  %v5156_v34 = vpop.eup %5155 }
0x239b   :  { %v4095_v28 = vadd.f32 1.0, %v5156_v34 }
0x239d   :  { %5157 = vrcp.f32 %v4095_v28 }
0x23a7   :  { %v5158_v5 = vpop.eup %5157 }
0x23be   :  { %4150 = vadd.xlane.f32.xlu1 %v4149_v9 }
0x240c   :  { %v4115_v10 = vpop.permute.xlu1 %4114 }
0x240d   :  { %v4117_v55 = vmul.f32 %v5158_v5, %v4115_v10 }
0x240f   :  { %4119 = vst.msk [vmem:[#allocation2 + $0x14] sm:$0x3] %vm442_vm1, %v4117_v55 }
0x2416   :  { %v4130_v58 = vld [vmem:[#allocation2 + $0x14] sm:$0x3] }
0x2417   :  { %v4148_v7 = vmul.f32 %v5988_v38, %v4130_v58  ;;  %v4197_v38 = vadd.f32 %v6177_v54, %v6171_v59  ;;  %v4235_v59 = vrot.slane %v4196_v41, %v5422_v29 }
0x2419   :  { %v4179_v62 = vsel %vm442_vm1, %v4148_v7, 0.0  ;;  %v4239_v26 = vrot.slane %v4197_v38, %v5422_v29 }
0x241a   :  { %4180 = vadd.xlane.f32.xlu1 %v4179_v62 }
0x244b   :  { %v4151_v36 = vpop.xlane.xlu1 %4150 }
0x244c   :  { %v4192_v40 = vadd.f32 %v6177_v54, %v4151_v36 }
0x244e   :  { %v4219_v50 = vrot.slane %v4192_v40, %v5422_v29 }
0x2450   :  { %v4261_v61 = vsel %vm4260_vm2, %v4223_v42, %v4219_v50 }
0x2451   :  { %v4263_v27 = vsel %vm4262_vm3, %v4227_v57, %v4261_v61 }
0x2452   :  { %v4265_v18 = vsel %vm4264_vm4, %v4231_v47, %v4263_v27 }
0x2453   :  { %v4267_v0 = vsel %vm4266_vm5, %v4235_v59, %v4265_v18 }
0x2454   :  { %v4269_v46 = vsel %vm4268_vm6, %v4239_v26, %v4267_v0 }
0x2455   :  { %v4271_v63 = vsel %vm4270_vm7, %v4243_v1, %v4269_v46 }
0x2456   :  { %v4273_v8 = vsel %vm4272_vm8, %v4247_v20, %v4271_v63 }
0x2457   :  { %4279 = vst.msk [vmem:[%s6261_s9] sm:$0xff] %vm4278_vm9, %v4273_v8 }
0x24a7   :  { %v4181_v16 = vpop.xlane.xlu1 %4180 }
0x24a8   :  { %v4202_v6 = vadd.f32 %v6177_v54, %v4181_v16 }
0x24aa   :  { %v4259_v52 = vrot.slane %v4202_v6, %v5422_v29 }
0x24ac   :  { %v4275_v13 = vsel %vm4262_vm3, %v4259_v52, %v6184_v2 }
0x24ad   :  { %4281 = vst.msk [vmem:[%s6261_s9 + $0x8] sm:$0x7] %vm4280_vm10, %v4275_v13 }
0x24ae   :  { %4286 = vsyncpa [#allocation5], 1 }
0x24af   :  { %4287 = vsyncpa [#allocation7], 1 }
0x24b0   :  { %4288 = vsyncpa [#allocation10], 1 }

</bundles_post_ra>
